<compile_context>
chip_gen: v6e
topology: v6e:2x2x1
jax: 0.10.0
libtpu: 0.0.40
codegen_flags: <defaults>
</compile_context>

<pallas_src>
import jax
import jax.numpy as jnp
from jax.experimental import pallas as pl
from jax.experimental.pallas import tpu as pltpu


# ----------------------------------------------------------------------------
# Fused kernel: one image per grid step, everything below runs out of VMEM.
# ----------------------------------------------------------------------------
def _cnn_fused_kernel(p_ref, w1_ref, b1_ref, w2_ref, b2_ref, wfc_ref, bfc_ref,
                      o_ref, p1_ref):
    """Refs:
      p_ref  : (1, 4, 169, 9)  bf16  conv1 patches, grouped by 2x2-pool sub-pos
      w1_ref : (9, 64)         bf16
      b1_ref : (1, 64)         f32
      w2_ref : (9, 64, 128)    bf16
      b2_ref : (1, 128)        f32
      wfc_ref: (25, 128, 10)   bf16  fc weight, pre-permuted to pool-cell order
      bfc_ref: (1, 10)         f32
      o_ref  : (1, 1, 10)      f32   softmax probabilities
      p1_ref : (176, 64)       f32   scratch: pooled conv1 map, row = 13*h + w
    """
    # ---- conv1 + relu + maxpool1 -------------------------------------------
    # q indexes the 4 conv positions inside each 2x2 pool window; pooling is a
    # plain max over the 4 matmul results (shared bias + monotone relu commute).
    y = jnp.dot(p_ref[0, 0, :, :], w1_ref[...],
                preferred_element_type=jnp.float32)            # (169, 64)
    for q in range(1, 4):
        yq = jnp.dot(p_ref[0, q, :, :], w1_ref[...],
                     preferred_element_type=jnp.float32)
        y = jnp.maximum(y, yq)
    pooled1 = jnp.maximum(y + b1_ref[...], 0.0)                # (169, 64)

    p1_ref[0:169, :] = pooled1
    p1_ref[169:176, :] = jnp.zeros((7, 64), jnp.float32)       # pad tail

    # ---- conv2: 9 shifted contiguous-slice matmuls over the 13x13 map -------
    # acc2[13*oh + ow] == pre-bias conv2 output at (oh, ow) for ow <= 10; the
    # few "wrapped" rows (ow in {11,12}) are never read by the pooling below.
    acc2 = None
    for di in range(3):
        for dj in range(3):
            s = 13 * di + dj
            lhs = p1_ref[s:s + 143, :].astype(jnp.bfloat16)    # (143, 64)
            part = jnp.dot(lhs, w2_ref[3 * di + dj],
                           preferred_element_type=jnp.float32)  # (143, 128)
            acc2 = part if acc2 is None else acc2 + part

    # ---- maxpool2 + bias + relu + flatten + fc1 (fused), then softmax -------
    logits = bfc_ref[...]                                      # (1, 10) f32
    b2 = b2_ref[...]
    for ph in range(5):
        top = acc2[26 * ph:26 * ph + 10, :]                    # oh = 2*ph,   ow=0..9
        bot = acc2[26 * ph + 13:26 * ph + 23, :]               # oh = 2*ph+1, ow=0..9
        m = jnp.maximum(top, bot)                              # (10, 128)
        for pw in range(5):
            cell = jnp.maximum(m[2 * pw:2 * pw + 1, :],
                               m[2 * pw + 1:2 * pw + 2, :])    # (1, 128)
            feat = jnp.maximum(cell + b2, 0.0).astype(jnp.bfloat16)
            logits = logits + jnp.dot(feat, wfc_ref[5 * ph + pw],
                                      preferred_element_type=jnp.float32)

    mx = jnp.max(logits, axis=-1, keepdims=True)
    e = jnp.exp(logits - mx)
    denom = jnp.sum(e, axis=-1, keepdims=True)
    o_ref[0] = (e * pl.reciprocal(denom, approx=True)).astype(o_ref.dtype)


# ----------------------------------------------------------------------------
# Wrapper-side glue (tiny, runs once per forward on the raw 28x28 input only)
# ----------------------------------------------------------------------------
def _conv1_pool_patches(x):
    """x: (B, 28, 28) f32 -> (B, 4, 169, 9) conv1 patches grouped by pool cell.

    patches[n, 2*a+b, 13*ph+pw, 3*di+dj] = x[n, 2*ph + a + di, 2*pw + b + dj]
    so group (a, b) is one of the 4 conv1 output positions inside pool cell
    (ph, pw); max-pooling becomes a max over the 4 groups inside the kernel.
    """
    B = x.shape[0]
    groups = []
    for a in (0, 1):
        for b in (0, 1):
            taps = []
            for di in range(3):
                for dj in range(3):
                    sub = x[:, a + di:a + di + 26:2, b + dj:b + dj + 26:2]
                    taps.append(sub.reshape(B, 169))           # (B, 169)
            groups.append(jnp.stack(taps, axis=-1))            # (B, 169, 9)
    return jnp.stack(groups, axis=1)                           # (B, 4, 169, 9)


@jax.jit
def cnn_forward(pixel_values, params):
    """pixel_values: (B, 1, 28, 28) NCHW, same as the PyTorch module."""
    x = pixel_values[:, 0].astype(jnp.float32)                 # (B, 28, 28)
    patches = _conv1_pool_patches(x).astype(jnp.bfloat16)      # (B, 4, 169, 9)
    B = patches.shape[0]

    out = pl.pallas_call(
        _cnn_fused_kernel,
        out_shape=jax.ShapeDtypeStruct((B, 1, 10), jnp.float32),
        grid_spec=pltpu.PrefetchScalarGridSpec(
            num_scalar_prefetch=0,
            grid=(B,),
            in_specs=[
                pl.BlockSpec((1, 4, 169, 9), lambda n: (n, 0, 0, 0)),  # patches
                pl.BlockSpec((9, 64), lambda n: (0, 0)),               # w1
                pl.BlockSpec((1, 64), lambda n: (0, 0)),               # b1
                pl.BlockSpec((9, 64, 128), lambda n: (0, 0, 0)),       # w2
                pl.BlockSpec((1, 128), lambda n: (0, 0)),              # b2
                pl.BlockSpec((25, 128, 10), lambda n: (0, 0, 0)),      # wfc
                pl.BlockSpec((1, 10), lambda n: (0, 0)),               # bfc
            ],
            out_specs=pl.BlockSpec((1, 1, 10), lambda n: (n, 0, 0)),
            scratch_shapes=[pltpu.VMEM((176, 64), jnp.float32)],
        ),
        compiler_params=pltpu.CompilerParams(
            dimension_semantics=("parallel",),
        ),
    )(patches, params["w1"], params["b1"], params["w2"], params["b2"],
      params["wfc"], params["bfc"])

    # TODO(synk): nn.Dropout(0.5) is identity in eval mode; training-mode RNG
    # masking is intentionally not implemented.
    return out[:, 0, :]                                        # (B, 10)


def init_params(key, d_out=10):
    # Layouts (mapping from the PyTorch module's parameters):
    #   w1[3*di+dj, co]     == conv1.weight[co, 0, di, dj]          -> (9, 64)
    #   w2[3*di+dj, ci, co] == conv2.weight[co, ci, di, dj]         -> (9, 64, 128)
    #   wfc[5*ph+pw, c, d]  == fc1.weight[d, c*25 + 5*ph + pw]      -> (25, 128, 10)
    # Weights are stored bf16 (matmul inputs); biases stay f32.
    k1, k2, k3 = jax.random.split(key, 3)
    w1 = (0.1 * jax.random.normal(k1, (9, 64), jnp.float32)).astype(jnp.bfloat16)
    b1 = jnp.zeros((1, 64), jnp.float32)
    w2 = (0.05 * jax.random.normal(k2, (9, 64, 128), jnp.float32)).astype(jnp.bfloat16)
    b2 = jnp.zeros((1, 128), jnp.float32)
    wfc = (0.02 * jax.random.normal(k3, (25, 128, d_out), jnp.float32)).astype(jnp.bfloat16)
    bfc = jnp.zeros((1, d_out), jnp.float32)
    return dict(w1=w1, b1=b1, w2=w2, b2=b2, wfc=wfc, bfc=bfc)


if __name__ == "__main__":
    key = jax.random.PRNGKey(0)
    kx, kp = jax.random.split(key)
    # fc1 in_features=3200 pins the input to 1x28x28 (fashion-mnist).
    pixel_values = jax.random.uniform(kx, (2, 1, 28, 28), jnp.float32)
    params = init_params(kp, d_out=10)

    preds = cnn_forward(pixel_values, params)
    preds = jax.block_until_ready(preds)

    assert preds.shape == (2, 10)
    assert bool(jnp.all(jnp.isfinite(preds)))
    # softmax rows sum to ~1 (approx reciprocal + bf16 matmuls -> loose tol)
    assert bool(jnp.allclose(jnp.sum(preds, axis=-1), 1.0, atol=5e-3))
    print("KERNEL_OK")
</pallas_src>

<mosaic_0001>
module attributes {stable_mosaic.version = 11 : i64} {
  func.func @_cnn_fused_kernel(%arg0: i32, %arg1: memref<1x4x169x9xbf16, #tpu.memory_space<vmem>>, %arg2: memref<9x64xbf16, #tpu.memory_space<vmem>>, %arg3: memref<1x64xf32, #tpu.memory_space<vmem>>, %arg4: memref<9x64x128xbf16, #tpu.memory_space<vmem>>, %arg5: memref<1x128xf32, #tpu.memory_space<vmem>>, %arg6: memref<25x128x10xbf16, #tpu.memory_space<vmem>>, %arg7: memref<1x10xf32, #tpu.memory_space<vmem>>, %arg8: memref<1x1x10xf32, #tpu.memory_space<vmem>>, %arg9: memref<176x64xf32, #tpu.memory_space<vmem>>) attributes {dimension_semantics = [#tpu.dimension_semantics<parallel>], iteration_bounds = array<i64: 2>, scalar_prefetch = 0 : i64, scratch_operands = 1 : i64, tpu.core_type = #tpu.core_type<tc>, window_params = [{transform_indices = @transform_0, window_bounds = array<i64: 1, 4, 169, 9>}, {pipeline_mode = #tpu.pipeline_mode<synchronous>, transform_indices = @transform_1, window_bounds = array<i64: 9, 64>}, {pipeline_mode = #tpu.pipeline_mode<synchronous>, transform_indices = @transform_2, window_bounds = array<i64: 1, 64>}, {pipeline_mode = #tpu.pipeline_mode<synchronous>, transform_indices = @transform_3, window_bounds = array<i64: 9, 64, 128>}, {pipeline_mode = #tpu.pipeline_mode<synchronous>, transform_indices = @transform_4, window_bounds = array<i64: 1, 128>}, {pipeline_mode = #tpu.pipeline_mode<synchronous>, transform_indices = @transform_5, window_bounds = array<i64: 25, 128, 10>}, {pipeline_mode = #tpu.pipeline_mode<synchronous>, transform_indices = @transform_6, window_bounds = array<i64: 1, 10>}, {transform_indices = @transform_7, window_bounds = array<i64: 1, 1, 10>}]} {
    %c0 = arith.constant 0 : index
    %c0_0 = arith.constant 0 : index
    %c0_1 = arith.constant 0 : index
    %c0_2 = arith.constant 0 : index
    %0 = vector.load %arg1[%c0, %c0_0, %c0_1, %c0_2] : memref<1x4x169x9xbf16, #tpu.memory_space<vmem>>, vector<1x1x169x9xbf16>
    %1 = vector.shape_cast %0 : vector<1x1x169x9xbf16> to vector<169x9xbf16>
    %c0_3 = arith.constant 0 : index
    %c0_4 = arith.constant 0 : index
    %2 = vector.load %arg2[%c0_3, %c0_4] : memref<9x64xbf16, #tpu.memory_space<vmem>>, vector<9x64xbf16>
    %cst = arith.constant dense<0.000000e+00> : vector<169x64xf32>
    %3 = tpu.matmul %1, %2, %cst {dimension_numbers = #tpu.dot_dimension_numbers<[1], [0], [0], [1], [0, 0, 1, 1], [], []>} : vector<169x9xbf16>, vector<9x64xbf16>, vector<169x64xf32> -> vector<169x64xf32>
    %c0_5 = arith.constant 0 : index
    %c1 = arith.constant 1 : index
    %c0_6 = arith.constant 0 : index
    %c0_7 = arith.constant 0 : index
    %4 = vector.load %arg1[%c0_5, %c1, %c0_6, %c0_7] : memref<1x4x169x9xbf16, #tpu.memory_space<vmem>>, vector<1x1x169x9xbf16>
    %5 = vector.shape_cast %4 : vector<1x1x169x9xbf16> to vector<169x9xbf16>
    %c0_8 = arith.constant 0 : index
    %c0_9 = arith.constant 0 : index
    %6 = vector.load %arg2[%c0_8, %c0_9] : memref<9x64xbf16, #tpu.memory_space<vmem>>, vector<9x64xbf16>
    %cst_10 = arith.constant dense<0.000000e+00> : vector<169x64xf32>
    %7 = tpu.matmul %5, %6, %cst_10 {dimension_numbers = #tpu.dot_dimension_numbers<[1], [0], [0], [1], [0, 0, 1, 1], [], []>} : vector<169x9xbf16>, vector<9x64xbf16>, vector<169x64xf32> -> vector<169x64xf32>
    %8 = arith.maximumf %3, %7 : vector<169x64xf32>
    %c0_11 = arith.constant 0 : index
    %c2 = arith.constant 2 : index
    %c0_12 = arith.constant 0 : index
    %c0_13 = arith.constant 0 : index
    %9 = vector.load %arg1[%c0_11, %c2, %c0_12, %c0_13] : memref<1x4x169x9xbf16, #tpu.memory_space<vmem>>, vector<1x1x169x9xbf16>
    %10 = vector.shape_cast %9 : vector<1x1x169x9xbf16> to vector<169x9xbf16>
    %c0_14 = arith.constant 0 : index
    %c0_15 = arith.constant 0 : index
    %11 = vector.load %arg2[%c0_14, %c0_15] : memref<9x64xbf16, #tpu.memory_space<vmem>>, vector<9x64xbf16>
    %cst_16 = arith.constant dense<0.000000e+00> : vector<169x64xf32>
    %12 = tpu.matmul %10, %11, %cst_16 {dimension_numbers = #tpu.dot_dimension_numbers<[1], [0], [0], [1], [0, 0, 1, 1], [], []>} : vector<169x9xbf16>, vector<9x64xbf16>, vector<169x64xf32> -> vector<169x64xf32>
    %13 = arith.maximumf %8, %12 : vector<169x64xf32>
    %c0_17 = arith.constant 0 : index
    %c3 = arith.constant 3 : index
    %c0_18 = arith.constant 0 : index
    %c0_19 = arith.constant 0 : index
    %14 = vector.load %arg1[%c0_17, %c3, %c0_18, %c0_19] : memref<1x4x169x9xbf16, #tpu.memory_space<vmem>>, vector<1x1x169x9xbf16>
    %15 = vector.shape_cast %14 : vector<1x1x169x9xbf16> to vector<169x9xbf16>
    %c0_20 = arith.constant 0 : index
    %c0_21 = arith.constant 0 : index
    %16 = vector.load %arg2[%c0_20, %c0_21] : memref<9x64xbf16, #tpu.memory_space<vmem>>, vector<9x64xbf16>
    %cst_22 = arith.constant dense<0.000000e+00> : vector<169x64xf32>
    %17 = tpu.matmul %15, %16, %cst_22 {dimension_numbers = #tpu.dot_dimension_numbers<[1], [0], [0], [1], [0, 0, 1, 1], [], []>} : vector<169x9xbf16>, vector<9x64xbf16>, vector<169x64xf32> -> vector<169x64xf32>
    %18 = arith.maximumf %13, %17 : vector<169x64xf32>
    %c0_23 = arith.constant 0 : index
    %c0_24 = arith.constant 0 : index
    %19 = vector.load %arg3[%c0_23, %c0_24] : memref<1x64xf32, #tpu.memory_space<vmem>>, vector<1x64xf32>
    %20 = vector.broadcast %19 : vector<1x64xf32> to vector<169x64xf32>
    %21 = arith.addf %18, %20 : vector<169x64xf32>
    %cst_25 = arith.constant 0.000000e+00 : f32
    %22 = vector.broadcast %cst_25 : f32 to vector<169x64xf32>
    %23 = arith.maximumf %21, %22 : vector<169x64xf32>
    %c0_26 = arith.constant 0 : index
    %c0_27 = arith.constant 0 : index
    %24 = vector.load %arg9[%c0_26, %c0_27] : memref<176x64xf32, #tpu.memory_space<vmem>>, vector<169x64xf32>
    tpu.vector_store %arg9[%c0_26, %c0_27], %23 {strides = array<i32>} : memref<176x64xf32, #tpu.memory_space<vmem>>, vector<169x64xf32>,
    %cst_28 = arith.constant 0.000000e+00 : f32
    %25 = vector.broadcast %cst_28 : f32 to vector<7x64xf32>
    %c169 = arith.constant 169 : index
    %c0_29 = arith.constant 0 : index
    %26 = vector.load %arg9[%c169, %c0_29] : memref<176x64xf32, #tpu.memory_space<vmem>>, vector<7x64xf32>
    tpu.vector_store %arg9[%c169, %c0_29], %25 {strides = array<i32>} : memref<176x64xf32, #tpu.memory_space<vmem>>, vector<7x64xf32>,
    %c0_30 = arith.constant 0 : index
    %c0_31 = arith.constant 0 : index
    %27 = vector.load %arg9[%c0_30, %c0_31] : memref<176x64xf32, #tpu.memory_space<vmem>>, vector<143x64xf32>
    %28 = arith.truncf %27 : vector<143x64xf32> to vector<143x64xbf16>
    %c0_32 = arith.constant 0 : index
    %c0_33 = arith.constant 0 : index
    %c0_34 = arith.constant 0 : index
    %29 = vector.load %arg4[%c0_32, %c0_33, %c0_34] : memref<9x64x128xbf16, #tpu.memory_space<vmem>>, vector<1x64x128xbf16>
    %30 = vector.shape_cast %29 : vector<1x64x128xbf16> to vector<64x128xbf16>
    %cst_35 = arith.constant dense<0.000000e+00> : vector<143x128xf32>
    %31 = tpu.matmul %28, %30, %cst_35 {dimension_numbers = #tpu.dot_dimension_numbers<[1], [0], [0], [1], [0, 0, 1, 1], [], []>} : vector<143x64xbf16>, vector<64x128xbf16>, vector<143x128xf32> -> vector<143x128xf32>
    %c1_36 = arith.constant 1 : index
    %c0_37 = arith.constant 0 : index
    %32 = vector.load %arg9[%c1_36, %c0_37] : memref<176x64xf32, #tpu.memory_space<vmem>>, vector<143x64xf32>
    %33 = arith.truncf %32 : vector<143x64xf32> to vector<143x64xbf16>
    %c1_38 = arith.constant 1 : index
    %c0_39 = arith.constant 0 : index
    %c0_40 = arith.constant 0 : index
    %34 = vector.load %arg4[%c1_38, %c0_39, %c0_40] : memref<9x64x128xbf16, #tpu.memory_space<vmem>>, vector<1x64x128xbf16>
    %35 = vector.shape_cast %34 : vector<1x64x128xbf16> to vector<64x128xbf16>
    %cst_41 = arith.constant dense<0.000000e+00> : vector<143x128xf32>
    %36 = tpu.matmul %33, %35, %cst_41 {dimension_numbers = #tpu.dot_dimension_numbers<[1], [0], [0], [1], [0, 0, 1, 1], [], []>} : vector<143x64xbf16>, vector<64x128xbf16>, vector<143x128xf32> -> vector<143x128xf32>
    %37 = arith.addf %31, %36 : vector<143x128xf32>
    %c2_42 = arith.constant 2 : index
    %c0_43 = arith.constant 0 : index
    %38 = vector.load %arg9[%c2_42, %c0_43] : memref<176x64xf32, #tpu.memory_space<vmem>>, vector<143x64xf32>
    %39 = arith.truncf %38 : vector<143x64xf32> to vector<143x64xbf16>
    %c2_44 = arith.constant 2 : index
    %c0_45 = arith.constant 0 : index
    %c0_46 = arith.constant 0 : index
    %40 = vector.load %arg4[%c2_44, %c0_45, %c0_46] : memref<9x64x128xbf16, #tpu.memory_space<vmem>>, vector<1x64x128xbf16>
    %41 = vector.shape_cast %40 : vector<1x64x128xbf16> to vector<64x128xbf16>
    %cst_47 = arith.constant dense<0.000000e+00> : vector<143x128xf32>
    %42 = tpu.matmul %39, %41, %cst_47 {dimension_numbers = #tpu.dot_dimension_numbers<[1], [0], [0], [1], [0, 0, 1, 1], [], []>} : vector<143x64xbf16>, vector<64x128xbf16>, vector<143x128xf32> -> vector<143x128xf32>
    %43 = arith.addf %37, %42 : vector<143x128xf32>
    %c13 = arith.constant 13 : index
    %c0_48 = arith.constant 0 : index
    %44 = vector.load %arg9[%c13, %c0_48] : memref<176x64xf32, #tpu.memory_space<vmem>>, vector<143x64xf32>
    %45 = arith.truncf %44 : vector<143x64xf32> to vector<143x64xbf16>
    %c3_49 = arith.constant 3 : index
    %c0_50 = arith.constant 0 : index
    %c0_51 = arith.constant 0 : index
    %46 = vector.load %arg4[%c3_49, %c0_50, %c0_51] : memref<9x64x128xbf16, #tpu.memory_space<vmem>>, vector<1x64x128xbf16>
    %47 = vector.shape_cast %46 : vector<1x64x128xbf16> to vector<64x128xbf16>
    %cst_52 = arith.constant dense<0.000000e+00> : vector<143x128xf32>
    %48 = tpu.matmul %45, %47, %cst_52 {dimension_numbers = #tpu.dot_dimension_numbers<[1], [0], [0], [1], [0, 0, 1, 1], [], []>} : vector<143x64xbf16>, vector<64x128xbf16>, vector<143x128xf32> -> vector<143x128xf32>
    %49 = arith.addf %43, %48 : vector<143x128xf32>
    %c14 = arith.constant 14 : index
    %c0_53 = arith.constant 0 : index
    %50 = vector.load %arg9[%c14, %c0_53] : memref<176x64xf32, #tpu.memory_space<vmem>>, vector<143x64xf32>
    %51 = arith.truncf %50 : vector<143x64xf32> to vector<143x64xbf16>
    %c4 = arith.constant 4 : index
    %c0_54 = arith.constant 0 : index
    %c0_55 = arith.constant 0 : index
    %52 = vector.load %arg4[%c4, %c0_54, %c0_55] : memref<9x64x128xbf16, #tpu.memory_space<vmem>>, vector<1x64x128xbf16>
    %53 = vector.shape_cast %52 : vector<1x64x128xbf16> to vector<64x128xbf16>
    %cst_56 = arith.constant dense<0.000000e+00> : vector<143x128xf32>
    %54 = tpu.matmul %51, %53, %cst_56 {dimension_numbers = #tpu.dot_dimension_numbers<[1], [0], [0], [1], [0, 0, 1, 1], [], []>} : vector<143x64xbf16>, vector<64x128xbf16>, vector<143x128xf32> -> vector<143x128xf32>
    %55 = arith.addf %49, %54 : vector<143x128xf32>
    %c15 = arith.constant 15 : index
    %c0_57 = arith.constant 0 : index
    %56 = vector.load %arg9[%c15, %c0_57] : memref<176x64xf32, #tpu.memory_space<vmem>>, vector<143x64xf32>
    %57 = arith.truncf %56 : vector<143x64xf32> to vector<143x64xbf16>
    %c5 = arith.constant 5 : index
    %c0_58 = arith.constant 0 : index
    %c0_59 = arith.constant 0 : index
    %58 = vector.load %arg4[%c5, %c0_58, %c0_59] : memref<9x64x128xbf16, #tpu.memory_space<vmem>>, vector<1x64x128xbf16>
    %59 = vector.shape_cast %58 : vector<1x64x128xbf16> to vector<64x128xbf16>
    %cst_60 = arith.constant dense<0.000000e+00> : vector<143x128xf32>
    %60 = tpu.matmul %57, %59, %cst_60 {dimension_numbers = #tpu.dot_dimension_numbers<[1], [0], [0], [1], [0, 0, 1, 1], [], []>} : vector<143x64xbf16>, vector<64x128xbf16>, vector<143x128xf32> -> vector<143x128xf32>
    %61 = arith.addf %55, %60 : vector<143x128xf32>
    %c26 = arith.constant 26 : index
    %c0_61 = arith.constant 0 : index
    %62 = vector.load %arg9[%c26, %c0_61] : memref<176x64xf32, #tpu.memory_space<vmem>>, vector<143x64xf32>
    %63 = arith.truncf %62 : vector<143x64xf32> to vector<143x64xbf16>
    %c6 = arith.constant 6 : index
    %c0_62 = arith.constant 0 : index
    %c0_63 = arith.constant 0 : index
    %64 = vector.load %arg4[%c6, %c0_62, %c0_63] : memref<9x64x128xbf16, #tpu.memory_space<vmem>>, vector<1x64x128xbf16>
    %65 = vector.shape_cast %64 : vector<1x64x128xbf16> to vector<64x128xbf16>
    %cst_64 = arith.constant dense<0.000000e+00> : vector<143x128xf32>
    %66 = tpu.matmul %63, %65, %cst_64 {dimension_numbers = #tpu.dot_dimension_numbers<[1], [0], [0], [1], [0, 0, 1, 1], [], []>} : vector<143x64xbf16>, vector<64x128xbf16>, vector<143x128xf32> -> vector<143x128xf32>
    %67 = arith.addf %61, %66 : vector<143x128xf32>
    %c27 = arith.constant 27 : index
    %c0_65 = arith.constant 0 : index
    %68 = vector.load %arg9[%c27, %c0_65] : memref<176x64xf32, #tpu.memory_space<vmem>>, vector<143x64xf32>
    %69 = arith.truncf %68 : vector<143x64xf32> to vector<143x64xbf16>
    %c7 = arith.constant 7 : index
    %c0_66 = arith.constant 0 : index
    %c0_67 = arith.constant 0 : index
    %70 = vector.load %arg4[%c7, %c0_66, %c0_67] : memref<9x64x128xbf16, #tpu.memory_space<vmem>>, vector<1x64x128xbf16>
    %71 = vector.shape_cast %70 : vector<1x64x128xbf16> to vector<64x128xbf16>
    %cst_68 = arith.constant dense<0.000000e+00> : vector<143x128xf32>
    %72 = tpu.matmul %69, %71, %cst_68 {dimension_numbers = #tpu.dot_dimension_numbers<[1], [0], [0], [1], [0, 0, 1, 1], [], []>} : vector<143x64xbf16>, vector<64x128xbf16>, vector<143x128xf32> -> vector<143x128xf32>
    %73 = arith.addf %67, %72 : vector<143x128xf32>
    %c28 = arith.constant 28 : index
    %c0_69 = arith.constant 0 : index
    %74 = vector.load %arg9[%c28, %c0_69] : memref<176x64xf32, #tpu.memory_space<vmem>>, vector<143x64xf32>
    %75 = arith.truncf %74 : vector<143x64xf32> to vector<143x64xbf16>
    %c8 = arith.constant 8 : index
    %c0_70 = arith.constant 0 : index
    %c0_71 = arith.constant 0 : index
    %76 = vector.load %arg4[%c8, %c0_70, %c0_71] : memref<9x64x128xbf16, #tpu.memory_space<vmem>>, vector<1x64x128xbf16>
    %77 = vector.shape_cast %76 : vector<1x64x128xbf16> to vector<64x128xbf16>
    %cst_72 = arith.constant dense<0.000000e+00> : vector<143x128xf32>
    %78 = tpu.matmul %75, %77, %cst_72 {dimension_numbers = #tpu.dot_dimension_numbers<[1], [0], [0], [1], [0, 0, 1, 1], [], []>} : vector<143x64xbf16>, vector<64x128xbf16>, vector<143x128xf32> -> vector<143x128xf32>
    %79 = arith.addf %73, %78 : vector<143x128xf32>
    %c0_73 = arith.constant 0 : index
    %c0_74 = arith.constant 0 : index
    %80 = vector.load %arg7[%c0_73, %c0_74] : memref<1x10xf32, #tpu.memory_space<vmem>>, vector<1x10xf32>
    %c0_75 = arith.constant 0 : index
    %c0_76 = arith.constant 0 : index
    %81 = vector.load %arg5[%c0_75, %c0_76] : memref<1x128xf32, #tpu.memory_space<vmem>>, vector<1x128xf32>
    %82 = vector.extract_strided_slice %79 {offsets = [0, 0], sizes = [10, 128], strides = [1, 1]} : vector<143x128xf32> to vector<10x128xf32>
    %83 = vector.extract_strided_slice %79 {offsets = [13, 0], sizes = [10, 128], strides = [1, 1]} : vector<143x128xf32> to vector<10x128xf32>
    %84 = arith.maximumf %82, %83 : vector<10x128xf32>
    %85 = vector.extract_strided_slice %84 {offsets = [0, 0], sizes = [1, 128], strides = [1, 1]} : vector<10x128xf32> to vector<1x128xf32>
    %86 = vector.extract_strided_slice %84 {offsets = [1, 0], sizes = [1, 128], strides = [1, 1]} : vector<10x128xf32> to vector<1x128xf32>
    %87 = arith.maximumf %85, %86 : vector<1x128xf32>
    %88 = arith.addf %87, %81 : vector<1x128xf32>
    %cst_77 = arith.constant 0.000000e+00 : f32
    %89 = vector.broadcast %cst_77 : f32 to vector<1x128xf32>
    %90 = arith.maximumf %88, %89 : vector<1x128xf32>
    %91 = arith.truncf %90 : vector<1x128xf32> to vector<1x128xbf16>
    %c0_78 = arith.constant 0 : index
    %c0_79 = arith.constant 0 : index
    %c0_80 = arith.constant 0 : index
    %92 = vector.load %arg6[%c0_78, %c0_79, %c0_80] : memref<25x128x10xbf16, #tpu.memory_space<vmem>>, vector<1x128x10xbf16>
    %93 = vector.shape_cast %92 : vector<1x128x10xbf16> to vector<128x10xbf16>
    %cst_81 = arith.constant dense<0.000000e+00> : vector<1x10xf32>
    %94 = tpu.matmul %91, %93, %cst_81 {dimension_numbers = #tpu.dot_dimension_numbers<[1], [0], [0], [1], [0, 0, 1, 1], [], []>} : vector<1x128xbf16>, vector<128x10xbf16>, vector<1x10xf32> -> vector<1x10xf32>
    %95 = arith.addf %80, %94 : vector<1x10xf32>
    %96 = vector.extract_strided_slice %84 {offsets = [2, 0], sizes = [1, 128], strides = [1, 1]} : vector<10x128xf32> to vector<1x128xf32>
    %97 = vector.extract_strided_slice %84 {offsets = [3, 0], sizes = [1, 128], strides = [1, 1]} : vector<10x128xf32> to vector<1x128xf32>
    %98 = arith.maximumf %96, %97 : vector<1x128xf32>
    %99 = arith.addf %98, %81 : vector<1x128xf32>
    %cst_82 = arith.constant 0.000000e+00 : f32
    %100 = vector.broadcast %cst_82 : f32 to vector<1x128xf32>
    %101 = arith.maximumf %99, %100 : vector<1x128xf32>
    %102 = arith.truncf %101 : vector<1x128xf32> to vector<1x128xbf16>
    %c1_83 = arith.constant 1 : index
    %c0_84 = arith.constant 0 : index
    %c0_85 = arith.constant 0 : index
    %103 = vector.load %arg6[%c1_83, %c0_84, %c0_85] : memref<25x128x10xbf16, #tpu.memory_space<vmem>>, vector<1x128x10xbf16>
    %104 = vector.shape_cast %103 : vector<1x128x10xbf16> to vector<128x10xbf16>
    %cst_86 = arith.constant dense<0.000000e+00> : vector<1x10xf32>
    %105 = tpu.matmul %102, %104, %cst_86 {dimension_numbers = #tpu.dot_dimension_numbers<[1], [0], [0], [1], [0, 0, 1, 1], [], []>} : vector<1x128xbf16>, vector<128x10xbf16>, vector<1x10xf32> -> vector<1x10xf32>
    %106 = arith.addf %95, %105 : vector<1x10xf32>
    %107 = vector.extract_strided_slice %84 {offsets = [4, 0], sizes = [1, 128], strides = [1, 1]} : vector<10x128xf32> to vector<1x128xf32>
    %108 = vector.extract_strided_slice %84 {offsets = [5, 0], sizes = [1, 128], strides = [1, 1]} : vector<10x128xf32> to vector<1x128xf32>
    %109 = arith.maximumf %107, %108 : vector<1x128xf32>
    %110 = arith.addf %109, %81 : vector<1x128xf32>
    %cst_87 = arith.constant 0.000000e+00 : f32
    %111 = vector.broadcast %cst_87 : f32 to vector<1x128xf32>
    %112 = arith.maximumf %110, %111 : vector<1x128xf32>
    %113 = arith.truncf %112 : vector<1x128xf32> to vector<1x128xbf16>
    %c2_88 = arith.constant 2 : index
    %c0_89 = arith.constant 0 : index
    %c0_90 = arith.constant 0 : index
    %114 = vector.load %arg6[%c2_88, %c0_89, %c0_90] : memref<25x128x10xbf16, #tpu.memory_space<vmem>>, vector<1x128x10xbf16>
    %115 = vector.shape_cast %114 : vector<1x128x10xbf16> to vector<128x10xbf16>
    %cst_91 = arith.constant dense<0.000000e+00> : vector<1x10xf32>
    %116 = tpu.matmul %113, %115, %cst_91 {dimension_numbers = #tpu.dot_dimension_numbers<[1], [0], [0], [1], [0, 0, 1, 1], [], []>} : vector<1x128xbf16>, vector<128x10xbf16>, vector<1x10xf32> -> vector<1x10xf32>
    %117 = arith.addf %106, %116 : vector<1x10xf32>
    %118 = vector.extract_strided_slice %84 {offsets = [6, 0], sizes = [1, 128], strides = [1, 1]} : vector<10x128xf32> to vector<1x128xf32>
    %119 = vector.extract_strided_slice %84 {offsets = [7, 0], sizes = [1, 128], strides = [1, 1]} : vector<10x128xf32> to vector<1x128xf32>
    %120 = arith.maximumf %118, %119 : vector<1x128xf32>
    %121 = arith.addf %120, %81 : vector<1x128xf32>
    %cst_92 = arith.constant 0.000000e+00 : f32
    %122 = vector.broadcast %cst_92 : f32 to vector<1x128xf32>
    %123 = arith.maximumf %121, %122 : vector<1x128xf32>
    %124 = arith.truncf %123 : vector<1x128xf32> to vector<1x128xbf16>
    %c3_93 = arith.constant 3 : index
    %c0_94 = arith.constant 0 : index
    %c0_95 = arith.constant 0 : index
    %125 = vector.load %arg6[%c3_93, %c0_94, %c0_95] : memref<25x128x10xbf16, #tpu.memory_space<vmem>>, vector<1x128x10xbf16>
    %126 = vector.shape_cast %125 : vector<1x128x10xbf16> to vector<128x10xbf16>
    %cst_96 = arith.constant dense<0.000000e+00> : vector<1x10xf32>
    %127 = tpu.matmul %124, %126, %cst_96 {dimension_numbers = #tpu.dot_dimension_numbers<[1], [0], [0], [1], [0, 0, 1, 1], [], []>} : vector<1x128xbf16>, vector<128x10xbf16>, vector<1x10xf32> -> vector<1x10xf32>
    %128 = arith.addf %117, %127 : vector<1x10xf32>
    %129 = vector.extract_strided_slice %84 {offsets = [8, 0], sizes = [1, 128], strides = [1, 1]} : vector<10x128xf32> to vector<1x128xf32>
    %130 = vector.extract_strided_slice %84 {offsets = [9, 0], sizes = [1, 128], strides = [1, 1]} : vector<10x128xf32> to vector<1x128xf32>
    %131 = arith.maximumf %129, %130 : vector<1x128xf32>
    %132 = arith.addf %131, %81 : vector<1x128xf32>
    %cst_97 = arith.constant 0.000000e+00 : f32
    %133 = vector.broadcast %cst_97 : f32 to vector<1x128xf32>
    %134 = arith.maximumf %132, %133 : vector<1x128xf32>
    %135 = arith.truncf %134 : vector<1x128xf32> to vector<1x128xbf16>
    %c4_98 = arith.constant 4 : index
    %c0_99 = arith.constant 0 : index
    %c0_100 = arith.constant 0 : index
    %136 = vector.load %arg6[%c4_98, %c0_99, %c0_100] : memref<25x128x10xbf16, #tpu.memory_space<vmem>>, vector<1x128x10xbf16>
    %137 = vector.shape_cast %136 : vector<1x128x10xbf16> to vector<128x10xbf16>
    %cst_101 = arith.constant dense<0.000000e+00> : vector<1x10xf32>
    %138 = tpu.matmul %135, %137, %cst_101 {dimension_numbers = #tpu.dot_dimension_numbers<[1], [0], [0], [1], [0, 0, 1, 1], [], []>} : vector<1x128xbf16>, vector<128x10xbf16>, vector<1x10xf32> -> vector<1x10xf32>
    %139 = arith.addf %128, %138 : vector<1x10xf32>
    %140 = vector.extract_strided_slice %79 {offsets = [26, 0], sizes = [10, 128], strides = [1, 1]} : vector<143x128xf32> to vector<10x128xf32>
    %141 = vector.extract_strided_slice %79 {offsets = [39, 0], sizes = [10, 128], strides = [1, 1]} : vector<143x128xf32> to vector<10x128xf32>
    %142 = arith.maximumf %140, %141 : vector<10x128xf32>
    %143 = vector.extract_strided_slice %142 {offsets = [0, 0], sizes = [1, 128], strides = [1, 1]} : vector<10x128xf32> to vector<1x128xf32>
    %144 = vector.extract_strided_slice %142 {offsets = [1, 0], sizes = [1, 128], strides = [1, 1]} : vector<10x128xf32> to vector<1x128xf32>
    %145 = arith.maximumf %143, %144 : vector<1x128xf32>
    %146 = arith.addf %145, %81 : vector<1x128xf32>
    %cst_102 = arith.constant 0.000000e+00 : f32
    %147 = vector.broadcast %cst_102 : f32 to vector<1x128xf32>
    %148 = arith.maximumf %146, %147 : vector<1x128xf32>
    %149 = arith.truncf %148 : vector<1x128xf32> to vector<1x128xbf16>
    %c5_103 = arith.constant 5 : index
    %c0_104 = arith.constant 0 : index
    %c0_105 = arith.constant 0 : index
    %150 = vector.load %arg6[%c5_103, %c0_104, %c0_105] : memref<25x128x10xbf16, #tpu.memory_space<vmem>>, vector<1x128x10xbf16>
    %151 = vector.shape_cast %150 : vector<1x128x10xbf16> to vector<128x10xbf16>
    %cst_106 = arith.constant dense<0.000000e+00> : vector<1x10xf32>
    %152 = tpu.matmul %149, %151, %cst_106 {dimension_numbers = #tpu.dot_dimension_numbers<[1], [0], [0], [1], [0, 0, 1, 1], [], []>} : vector<1x128xbf16>, vector<128x10xbf16>, vector<1x10xf32> -> vector<1x10xf32>
    %153 = arith.addf %139, %152 : vector<1x10xf32>
    %154 = vector.extract_strided_slice %142 {offsets = [2, 0], sizes = [1, 128], strides = [1, 1]} : vector<10x128xf32> to vector<1x128xf32>
    %155 = vector.extract_strided_slice %142 {offsets = [3, 0], sizes = [1, 128], strides = [1, 1]} : vector<10x128xf32> to vector<1x128xf32>
    %156 = arith.maximumf %154, %155 : vector<1x128xf32>
    %157 = arith.addf %156, %81 : vector<1x128xf32>
    %cst_107 = arith.constant 0.000000e+00 : f32
    %158 = vector.broadcast %cst_107 : f32 to vector<1x128xf32>
    %159 = arith.maximumf %157, %158 : vector<1x128xf32>
    %160 = arith.truncf %159 : vector<1x128xf32> to vector<1x128xbf16>
    %c6_108 = arith.constant 6 : index
    %c0_109 = arith.constant 0 : index
    %c0_110 = arith.constant 0 : index
    %161 = vector.load %arg6[%c6_108, %c0_109, %c0_110] : memref<25x128x10xbf16, #tpu.memory_space<vmem>>, vector<1x128x10xbf16>
    %162 = vector.shape_cast %161 : vector<1x128x10xbf16> to vector<128x10xbf16>
    %cst_111 = arith.constant dense<0.000000e+00> : vector<1x10xf32>
    %163 = tpu.matmul %160, %162, %cst_111 {dimension_numbers = #tpu.dot_dimension_numbers<[1], [0], [0], [1], [0, 0, 1, 1], [], []>} : vector<1x128xbf16>, vector<128x10xbf16>, vector<1x10xf32> -> vector<1x10xf32>
    %164 = arith.addf %153, %163 : vector<1x10xf32>
    %165 = vector.extract_strided_slice %142 {offsets = [4, 0], sizes = [1, 128], strides = [1, 1]} : vector<10x128xf32> to vector<1x128xf32>
    %166 = vector.extract_strided_slice %142 {offsets = [5, 0], sizes = [1, 128], strides = [1, 1]} : vector<10x128xf32> to vector<1x128xf32>
    %167 = arith.maximumf %165, %166 : vector<1x128xf32>
    %168 = arith.addf %167, %81 : vector<1x128xf32>
    %cst_112 = arith.constant 0.000000e+00 : f32
    %169 = vector.broadcast %cst_112 : f32 to vector<1x128xf32>
    %170 = arith.maximumf %168, %169 : vector<1x128xf32>
    %171 = arith.truncf %170 : vector<1x128xf32> to vector<1x128xbf16>
    %c7_113 = arith.constant 7 : index
    %c0_114 = arith.constant 0 : index
    %c0_115 = arith.constant 0 : index
    %172 = vector.load %arg6[%c7_113, %c0_114, %c0_115] : memref<25x128x10xbf16, #tpu.memory_space<vmem>>, vector<1x128x10xbf16>
    %173 = vector.shape_cast %172 : vector<1x128x10xbf16> to vector<128x10xbf16>
    %cst_116 = arith.constant dense<0.000000e+00> : vector<1x10xf32>
    %174 = tpu.matmul %171, %173, %cst_116 {dimension_numbers = #tpu.dot_dimension_numbers<[1], [0], [0], [1], [0, 0, 1, 1], [], []>} : vector<1x128xbf16>, vector<128x10xbf16>, vector<1x10xf32> -> vector<1x10xf32>
    %175 = arith.addf %164, %174 : vector<1x10xf32>
    %176 = vector.extract_strided_slice %142 {offsets = [6, 0], sizes = [1, 128], strides = [1, 1]} : vector<10x128xf32> to vector<1x128xf32>
    %177 = vector.extract_strided_slice %142 {offsets = [7, 0], sizes = [1, 128], strides = [1, 1]} : vector<10x128xf32> to vector<1x128xf32>
    %178 = arith.maximumf %176, %177 : vector<1x128xf32>
    %179 = arith.addf %178, %81 : vector<1x128xf32>
    %cst_117 = arith.constant 0.000000e+00 : f32
    %180 = vector.broadcast %cst_117 : f32 to vector<1x128xf32>
    %181 = arith.maximumf %179, %180 : vector<1x128xf32>
    %182 = arith.truncf %181 : vector<1x128xf32> to vector<1x128xbf16>
    %c8_118 = arith.constant 8 : index
    %c0_119 = arith.constant 0 : index
    %c0_120 = arith.constant 0 : index
    %183 = vector.load %arg6[%c8_118, %c0_119, %c0_120] : memref<25x128x10xbf16, #tpu.memory_space<vmem>>, vector<1x128x10xbf16>
    %184 = vector.shape_cast %183 : vector<1x128x10xbf16> to vector<128x10xbf16>
    %cst_121 = arith.constant dense<0.000000e+00> : vector<1x10xf32>
    %185 = tpu.matmul %182, %184, %cst_121 {dimension_numbers = #tpu.dot_dimension_numbers<[1], [0], [0], [1], [0, 0, 1, 1], [], []>} : vector<1x128xbf16>, vector<128x10xbf16>, vector<1x10xf32> -> vector<1x10xf32>
    %186 = arith.addf %175, %185 : vector<1x10xf32>
    %187 = vector.extract_strided_slice %142 {offsets = [8, 0], sizes = [1, 128], strides = [1, 1]} : vector<10x128xf32> to vector<1x128xf32>
    %188 = vector.extract_strided_slice %142 {offsets = [9, 0], sizes = [1, 128], strides = [1, 1]} : vector<10x128xf32> to vector<1x128xf32>
    %189 = arith.maximumf %187, %188 : vector<1x128xf32>
    %190 = arith.addf %189, %81 : vector<1x128xf32>
    %cst_122 = arith.constant 0.000000e+00 : f32
    %191 = vector.broadcast %cst_122 : f32 to vector<1x128xf32>
    %192 = arith.maximumf %190, %191 : vector<1x128xf32>
    %193 = arith.truncf %192 : vector<1x128xf32> to vector<1x128xbf16>
    %c9 = arith.constant 9 : index
    %c0_123 = arith.constant 0 : index
    %c0_124 = arith.constant 0 : index
    %194 = vector.load %arg6[%c9, %c0_123, %c0_124] : memref<25x128x10xbf16, #tpu.memory_space<vmem>>, vector<1x128x10xbf16>
    %195 = vector.shape_cast %194 : vector<1x128x10xbf16> to vector<128x10xbf16>
    %cst_125 = arith.constant dense<0.000000e+00> : vector<1x10xf32>
    %196 = tpu.matmul %193, %195, %cst_125 {dimension_numbers = #tpu.dot_dimension_numbers<[1], [0], [0], [1], [0, 0, 1, 1], [], []>} : vector<1x128xbf16>, vector<128x10xbf16>, vector<1x10xf32> -> vector<1x10xf32>
    %197 = arith.addf %186, %196 : vector<1x10xf32>
    %198 = vector.extract_strided_slice %79 {offsets = [52, 0], sizes = [10, 128], strides = [1, 1]} : vector<143x128xf32> to vector<10x128xf32>
    %199 = vector.extract_strided_slice %79 {offsets = [65, 0], sizes = [10, 128], strides = [1, 1]} : vector<143x128xf32> to vector<10x128xf32>
    %200 = arith.maximumf %198, %199 : vector<10x128xf32>
    %201 = vector.extract_strided_slice %200 {offsets = [0, 0], sizes = [1, 128], strides = [1, 1]} : vector<10x128xf32> to vector<1x128xf32>
    %202 = vector.extract_strided_slice %200 {offsets = [1, 0], sizes = [1, 128], strides = [1, 1]} : vector<10x128xf32> to vector<1x128xf32>
    %203 = arith.maximumf %201, %202 : vector<1x128xf32>
    %204 = arith.addf %203, %81 : vector<1x128xf32>
    %cst_126 = arith.constant 0.000000e+00 : f32
    %205 = vector.broadcast %cst_126 : f32 to vector<1x128xf32>
    %206 = arith.maximumf %204, %205 : vector<1x128xf32>
    %207 = arith.truncf %206 : vector<1x128xf32> to vector<1x128xbf16>
    %c10 = arith.constant 10 : index
    %c0_127 = arith.constant 0 : index
    %c0_128 = arith.constant 0 : index
    %208 = vector.load %arg6[%c10, %c0_127, %c0_128] : memref<25x128x10xbf16, #tpu.memory_space<vmem>>, vector<1x128x10xbf16>
    %209 = vector.shape_cast %208 : vector<1x128x10xbf16> to vector<128x10xbf16>
    %cst_129 = arith.constant dense<0.000000e+00> : vector<1x10xf32>
    %210 = tpu.matmul %207, %209, %cst_129 {dimension_numbers = #tpu.dot_dimension_numbers<[1], [0], [0], [1], [0, 0, 1, 1], [], []>} : vector<1x128xbf16>, vector<128x10xbf16>, vector<1x10xf32> -> vector<1x10xf32>
    %211 = arith.addf %197, %210 : vector<1x10xf32>
    %212 = vector.extract_strided_slice %200 {offsets = [2, 0], sizes = [1, 128], strides = [1, 1]} : vector<10x128xf32> to vector<1x128xf32>
    %213 = vector.extract_strided_slice %200 {offsets = [3, 0], sizes = [1, 128], strides = [1, 1]} : vector<10x128xf32> to vector<1x128xf32>
    %214 = arith.maximumf %212, %213 : vector<1x128xf32>
    %215 = arith.addf %214, %81 : vector<1x128xf32>
    %cst_130 = arith.constant 0.000000e+00 : f32
    %216 = vector.broadcast %cst_130 : f32 to vector<1x128xf32>
    %217 = arith.maximumf %215, %216 : vector<1x128xf32>
    %218 = arith.truncf %217 : vector<1x128xf32> to vector<1x128xbf16>
    %c11 = arith.constant 11 : index
    %c0_131 = arith.constant 0 : index
    %c0_132 = arith.constant 0 : index
    %219 = vector.load %arg6[%c11, %c0_131, %c0_132] : memref<25x128x10xbf16, #tpu.memory_space<vmem>>, vector<1x128x10xbf16>
    %220 = vector.shape_cast %219 : vector<1x128x10xbf16> to vector<128x10xbf16>
    %cst_133 = arith.constant dense<0.000000e+00> : vector<1x10xf32>
    %221 = tpu.matmul %218, %220, %cst_133 {dimension_numbers = #tpu.dot_dimension_numbers<[1], [0], [0], [1], [0, 0, 1, 1], [], []>} : vector<1x128xbf16>, vector<128x10xbf16>, vector<1x10xf32> -> vector<1x10xf32>
    %222 = arith.addf %211, %221 : vector<1x10xf32>
    %223 = vector.extract_strided_slice %200 {offsets = [4, 0], sizes = [1, 128], strides = [1, 1]} : vector<10x128xf32> to vector<1x128xf32>
    %224 = vector.extract_strided_slice %200 {offsets = [5, 0], sizes = [1, 128], strides = [1, 1]} : vector<10x128xf32> to vector<1x128xf32>
    %225 = arith.maximumf %223, %224 : vector<1x128xf32>
    %226 = arith.addf %225, %81 : vector<1x128xf32>
    %cst_134 = arith.constant 0.000000e+00 : f32
    %227 = vector.broadcast %cst_134 : f32 to vector<1x128xf32>
    %228 = arith.maximumf %226, %227 : vector<1x128xf32>
    %229 = arith.truncf %228 : vector<1x128xf32> to vector<1x128xbf16>
    %c12 = arith.constant 12 : index
    %c0_135 = arith.constant 0 : index
    %c0_136 = arith.constant 0 : index
    %230 = vector.load %arg6[%c12, %c0_135, %c0_136] : memref<25x128x10xbf16, #tpu.memory_space<vmem>>, vector<1x128x10xbf16>
    %231 = vector.shape_cast %230 : vector<1x128x10xbf16> to vector<128x10xbf16>
    %cst_137 = arith.constant dense<0.000000e+00> : vector<1x10xf32>
    %232 = tpu.matmul %229, %231, %cst_137 {dimension_numbers = #tpu.dot_dimension_numbers<[1], [0], [0], [1], [0, 0, 1, 1], [], []>} : vector<1x128xbf16>, vector<128x10xbf16>, vector<1x10xf32> -> vector<1x10xf32>
    %233 = arith.addf %222, %232 : vector<1x10xf32>
    %234 = vector.extract_strided_slice %200 {offsets = [6, 0], sizes = [1, 128], strides = [1, 1]} : vector<10x128xf32> to vector<1x128xf32>
    %235 = vector.extract_strided_slice %200 {offsets = [7, 0], sizes = [1, 128], strides = [1, 1]} : vector<10x128xf32> to vector<1x128xf32>
    %236 = arith.maximumf %234, %235 : vector<1x128xf32>
    %237 = arith.addf %236, %81 : vector<1x128xf32>
    %cst_138 = arith.constant 0.000000e+00 : f32
    %238 = vector.broadcast %cst_138 : f32 to vector<1x128xf32>
    %239 = arith.maximumf %237, %238 : vector<1x128xf32>
    %240 = arith.truncf %239 : vector<1x128xf32> to vector<1x128xbf16>
    %c13_139 = arith.constant 13 : index
    %c0_140 = arith.constant 0 : index
    %c0_141 = arith.constant 0 : index
    %241 = vector.load %arg6[%c13_139, %c0_140, %c0_141] : memref<25x128x10xbf16, #tpu.memory_space<vmem>>, vector<1x128x10xbf16>
    %242 = vector.shape_cast %241 : vector<1x128x10xbf16> to vector<128x10xbf16>
    %cst_142 = arith.constant dense<0.000000e+00> : vector<1x10xf32>
    %243 = tpu.matmul %240, %242, %cst_142 {dimension_numbers = #tpu.dot_dimension_numbers<[1], [0], [0], [1], [0, 0, 1, 1], [], []>} : vector<1x128xbf16>, vector<128x10xbf16>, vector<1x10xf32> -> vector<1x10xf32>
    %244 = arith.addf %233, %243 : vector<1x10xf32>
    %245 = vector.extract_strided_slice %200 {offsets = [8, 0], sizes = [1, 128], strides = [1, 1]} : vector<10x128xf32> to vector<1x128xf32>
    %246 = vector.extract_strided_slice %200 {offsets = [9, 0], sizes = [1, 128], strides = [1, 1]} : vector<10x128xf32> to vector<1x128xf32>
    %247 = arith.maximumf %245, %246 : vector<1x128xf32>
    %248 = arith.addf %247, %81 : vector<1x128xf32>
    %cst_143 = arith.constant 0.000000e+00 : f32
    %249 = vector.broadcast %cst_143 : f32 to vector<1x128xf32>
    %250 = arith.maximumf %248, %249 : vector<1x128xf32>
    %251 = arith.truncf %250 : vector<1x128xf32> to vector<1x128xbf16>
    %c14_144 = arith.constant 14 : index
    %c0_145 = arith.constant 0 : index
    %c0_146 = arith.constant 0 : index
    %252 = vector.load %arg6[%c14_144, %c0_145, %c0_146] : memref<25x128x10xbf16, #tpu.memory_space<vmem>>, vector<1x128x10xbf16>
    %253 = vector.shape_cast %252 : vector<1x128x10xbf16> to vector<128x10xbf16>
    %cst_147 = arith.constant dense<0.000000e+00> : vector<1x10xf32>
    %254 = tpu.matmul %251, %253, %cst_147 {dimension_numbers = #tpu.dot_dimension_numbers<[1], [0], [0], [1], [0, 0, 1, 1], [], []>} : vector<1x128xbf16>, vector<128x10xbf16>, vector<1x10xf32> -> vector<1x10xf32>
    %255 = arith.addf %244, %254 : vector<1x10xf32>
    %256 = vector.extract_strided_slice %79 {offsets = [78, 0], sizes = [10, 128], strides = [1, 1]} : vector<143x128xf32> to vector<10x128xf32>
    %257 = vector.extract_strided_slice %79 {offsets = [91, 0], sizes = [10, 128], strides = [1, 1]} : vector<143x128xf32> to vector<10x128xf32>
    %258 = arith.maximumf %256, %257 : vector<10x128xf32>
    %259 = vector.extract_strided_slice %258 {offsets = [0, 0], sizes = [1, 128], strides = [1, 1]} : vector<10x128xf32> to vector<1x128xf32>
    %260 = vector.extract_strided_slice %258 {offsets = [1, 0], sizes = [1, 128], strides = [1, 1]} : vector<10x128xf32> to vector<1x128xf32>
    %261 = arith.maximumf %259, %260 : vector<1x128xf32>
    %262 = arith.addf %261, %81 : vector<1x128xf32>
    %cst_148 = arith.constant 0.000000e+00 : f32
    %263 = vector.broadcast %cst_148 : f32 to vector<1x128xf32>
    %264 = arith.maximumf %262, %263 : vector<1x128xf32>
    %265 = arith.truncf %264 : vector<1x128xf32> to vector<1x128xbf16>
    %c15_149 = arith.constant 15 : index
    %c0_150 = arith.constant 0 : index
    %c0_151 = arith.constant 0 : index
    %266 = vector.load %arg6[%c15_149, %c0_150, %c0_151] : memref<25x128x10xbf16, #tpu.memory_space<vmem>>, vector<1x128x10xbf16>
    %267 = vector.shape_cast %266 : vector<1x128x10xbf16> to vector<128x10xbf16>
    %cst_152 = arith.constant dense<0.000000e+00> : vector<1x10xf32>
    %268 = tpu.matmul %265, %267, %cst_152 {dimension_numbers = #tpu.dot_dimension_numbers<[1], [0], [0], [1], [0, 0, 1, 1], [], []>} : vector<1x128xbf16>, vector<128x10xbf16>, vector<1x10xf32> -> vector<1x10xf32>
    %269 = arith.addf %255, %268 : vector<1x10xf32>
    %270 = vector.extract_strided_slice %258 {offsets = [2, 0], sizes = [1, 128], strides = [1, 1]} : vector<10x128xf32> to vector<1x128xf32>
    %271 = vector.extract_strided_slice %258 {offsets = [3, 0], sizes = [1, 128], strides = [1, 1]} : vector<10x128xf32> to vector<1x128xf32>
    %272 = arith.maximumf %270, %271 : vector<1x128xf32>
    %273 = arith.addf %272, %81 : vector<1x128xf32>
    %cst_153 = arith.constant 0.000000e+00 : f32
    %274 = vector.broadcast %cst_153 : f32 to vector<1x128xf32>
    %275 = arith.maximumf %273, %274 : vector<1x128xf32>
    %276 = arith.truncf %275 : vector<1x128xf32> to vector<1x128xbf16>
    %c16 = arith.constant 16 : index
    %c0_154 = arith.constant 0 : index
    %c0_155 = arith.constant 0 : index
    %277 = vector.load %arg6[%c16, %c0_154, %c0_155] : memref<25x128x10xbf16, #tpu.memory_space<vmem>>, vector<1x128x10xbf16>
    %278 = vector.shape_cast %277 : vector<1x128x10xbf16> to vector<128x10xbf16>
    %cst_156 = arith.constant dense<0.000000e+00> : vector<1x10xf32>
    %279 = tpu.matmul %276, %278, %cst_156 {dimension_numbers = #tpu.dot_dimension_numbers<[1], [0], [0], [1], [0, 0, 1, 1], [], []>} : vector<1x128xbf16>, vector<128x10xbf16>, vector<1x10xf32> -> vector<1x10xf32>
    %280 = arith.addf %269, %279 : vector<1x10xf32>
    %281 = vector.extract_strided_slice %258 {offsets = [4, 0], sizes = [1, 128], strides = [1, 1]} : vector<10x128xf32> to vector<1x128xf32>
    %282 = vector.extract_strided_slice %258 {offsets = [5, 0], sizes = [1, 128], strides = [1, 1]} : vector<10x128xf32> to vector<1x128xf32>
    %283 = arith.maximumf %281, %282 : vector<1x128xf32>
    %284 = arith.addf %283, %81 : vector<1x128xf32>
    %cst_157 = arith.constant 0.000000e+00 : f32
    %285 = vector.broadcast %cst_157 : f32 to vector<1x128xf32>
    %286 = arith.maximumf %284, %285 : vector<1x128xf32>
    %287 = arith.truncf %286 : vector<1x128xf32> to vector<1x128xbf16>
    %c17 = arith.constant 17 : index
    %c0_158 = arith.constant 0 : index
    %c0_159 = arith.constant 0 : index
    %288 = vector.load %arg6[%c17, %c0_158, %c0_159] : memref<25x128x10xbf16, #tpu.memory_space<vmem>>, vector<1x128x10xbf16>
    %289 = vector.shape_cast %288 : vector<1x128x10xbf16> to vector<128x10xbf16>
    %cst_160 = arith.constant dense<0.000000e+00> : vector<1x10xf32>
    %290 = tpu.matmul %287, %289, %cst_160 {dimension_numbers = #tpu.dot_dimension_numbers<[1], [0], [0], [1], [0, 0, 1, 1], [], []>} : vector<1x128xbf16>, vector<128x10xbf16>, vector<1x10xf32> -> vector<1x10xf32>
    %291 = arith.addf %280, %290 : vector<1x10xf32>
    %292 = vector.extract_strided_slice %258 {offsets = [6, 0], sizes = [1, 128], strides = [1, 1]} : vector<10x128xf32> to vector<1x128xf32>
    %293 = vector.extract_strided_slice %258 {offsets = [7, 0], sizes = [1, 128], strides = [1, 1]} : vector<10x128xf32> to vector<1x128xf32>
    %294 = arith.maximumf %292, %293 : vector<1x128xf32>
    %295 = arith.addf %294, %81 : vector<1x128xf32>
    %cst_161 = arith.constant 0.000000e+00 : f32
    %296 = vector.broadcast %cst_161 : f32 to vector<1x128xf32>
    %297 = arith.maximumf %295, %296 : vector<1x128xf32>
    %298 = arith.truncf %297 : vector<1x128xf32> to vector<1x128xbf16>
    %c18 = arith.constant 18 : index
    %c0_162 = arith.constant 0 : index
    %c0_163 = arith.constant 0 : index
    %299 = vector.load %arg6[%c18, %c0_162, %c0_163] : memref<25x128x10xbf16, #tpu.memory_space<vmem>>, vector<1x128x10xbf16>
    %300 = vector.shape_cast %299 : vector<1x128x10xbf16> to vector<128x10xbf16>
    %cst_164 = arith.constant dense<0.000000e+00> : vector<1x10xf32>
    %301 = tpu.matmul %298, %300, %cst_164 {dimension_numbers = #tpu.dot_dimension_numbers<[1], [0], [0], [1], [0, 0, 1, 1], [], []>} : vector<1x128xbf16>, vector<128x10xbf16>, vector<1x10xf32> -> vector<1x10xf32>
    %302 = arith.addf %291, %301 : vector<1x10xf32>
    %303 = vector.extract_strided_slice %258 {offsets = [8, 0], sizes = [1, 128], strides = [1, 1]} : vector<10x128xf32> to vector<1x128xf32>
    %304 = vector.extract_strided_slice %258 {offsets = [9, 0], sizes = [1, 128], strides = [1, 1]} : vector<10x128xf32> to vector<1x128xf32>
    %305 = arith.maximumf %303, %304 : vector<1x128xf32>
    %306 = arith.addf %305, %81 : vector<1x128xf32>
    %cst_165 = arith.constant 0.000000e+00 : f32
    %307 = vector.broadcast %cst_165 : f32 to vector<1x128xf32>
    %308 = arith.maximumf %306, %307 : vector<1x128xf32>
    %309 = arith.truncf %308 : vector<1x128xf32> to vector<1x128xbf16>
    %c19 = arith.constant 19 : index
    %c0_166 = arith.constant 0 : index
    %c0_167 = arith.constant 0 : index
    %310 = vector.load %arg6[%c19, %c0_166, %c0_167] : memref<25x128x10xbf16, #tpu.memory_space<vmem>>, vector<1x128x10xbf16>
    %311 = vector.shape_cast %310 : vector<1x128x10xbf16> to vector<128x10xbf16>
    %cst_168 = arith.constant dense<0.000000e+00> : vector<1x10xf32>
    %312 = tpu.matmul %309, %311, %cst_168 {dimension_numbers = #tpu.dot_dimension_numbers<[1], [0], [0], [1], [0, 0, 1, 1], [], []>} : vector<1x128xbf16>, vector<128x10xbf16>, vector<1x10xf32> -> vector<1x10xf32>
    %313 = arith.addf %302, %312 : vector<1x10xf32>
    %314 = vector.extract_strided_slice %79 {offsets = [104, 0], sizes = [10, 128], strides = [1, 1]} : vector<143x128xf32> to vector<10x128xf32>
    %315 = vector.extract_strided_slice %79 {offsets = [117, 0], sizes = [10, 128], strides = [1, 1]} : vector<143x128xf32> to vector<10x128xf32>
    %316 = arith.maximumf %314, %315 : vector<10x128xf32>
    %317 = vector.extract_strided_slice %316 {offsets = [0, 0], sizes = [1, 128], strides = [1, 1]} : vector<10x128xf32> to vector<1x128xf32>
    %318 = vector.extract_strided_slice %316 {offsets = [1, 0], sizes = [1, 128], strides = [1, 1]} : vector<10x128xf32> to vector<1x128xf32>
    %319 = arith.maximumf %317, %318 : vector<1x128xf32>
    %320 = arith.addf %319, %81 : vector<1x128xf32>
    %cst_169 = arith.constant 0.000000e+00 : f32
    %321 = vector.broadcast %cst_169 : f32 to vector<1x128xf32>
    %322 = arith.maximumf %320, %321 : vector<1x128xf32>
    %323 = arith.truncf %322 : vector<1x128xf32> to vector<1x128xbf16>
    %c20 = arith.constant 20 : index
    %c0_170 = arith.constant 0 : index
    %c0_171 = arith.constant 0 : index
    %324 = vector.load %arg6[%c20, %c0_170, %c0_171] : memref<25x128x10xbf16, #tpu.memory_space<vmem>>, vector<1x128x10xbf16>
    %325 = vector.shape_cast %324 : vector<1x128x10xbf16> to vector<128x10xbf16>
    %cst_172 = arith.constant dense<0.000000e+00> : vector<1x10xf32>
    %326 = tpu.matmul %323, %325, %cst_172 {dimension_numbers = #tpu.dot_dimension_numbers<[1], [0], [0], [1], [0, 0, 1, 1], [], []>} : vector<1x128xbf16>, vector<128x10xbf16>, vector<1x10xf32> -> vector<1x10xf32>
    %327 = arith.addf %313, %326 : vector<1x10xf32>
    %328 = vector.extract_strided_slice %316 {offsets = [2, 0], sizes = [1, 128], strides = [1, 1]} : vector<10x128xf32> to vector<1x128xf32>
    %329 = vector.extract_strided_slice %316 {offsets = [3, 0], sizes = [1, 128], strides = [1, 1]} : vector<10x128xf32> to vector<1x128xf32>
    %330 = arith.maximumf %328, %329 : vector<1x128xf32>
    %331 = arith.addf %330, %81 : vector<1x128xf32>
    %cst_173 = arith.constant 0.000000e+00 : f32
    %332 = vector.broadcast %cst_173 : f32 to vector<1x128xf32>
    %333 = arith.maximumf %331, %332 : vector<1x128xf32>
    %334 = arith.truncf %333 : vector<1x128xf32> to vector<1x128xbf16>
    %c21 = arith.constant 21 : index
    %c0_174 = arith.constant 0 : index
    %c0_175 = arith.constant 0 : index
    %335 = vector.load %arg6[%c21, %c0_174, %c0_175] : memref<25x128x10xbf16, #tpu.memory_space<vmem>>, vector<1x128x10xbf16>
    %336 = vector.shape_cast %335 : vector<1x128x10xbf16> to vector<128x10xbf16>
    %cst_176 = arith.constant dense<0.000000e+00> : vector<1x10xf32>
    %337 = tpu.matmul %334, %336, %cst_176 {dimension_numbers = #tpu.dot_dimension_numbers<[1], [0], [0], [1], [0, 0, 1, 1], [], []>} : vector<1x128xbf16>, vector<128x10xbf16>, vector<1x10xf32> -> vector<1x10xf32>
    %338 = arith.addf %327, %337 : vector<1x10xf32>
    %339 = vector.extract_strided_slice %316 {offsets = [4, 0], sizes = [1, 128], strides = [1, 1]} : vector<10x128xf32> to vector<1x128xf32>
    %340 = vector.extract_strided_slice %316 {offsets = [5, 0], sizes = [1, 128], strides = [1, 1]} : vector<10x128xf32> to vector<1x128xf32>
    %341 = arith.maximumf %339, %340 : vector<1x128xf32>
    %342 = arith.addf %341, %81 : vector<1x128xf32>
    %cst_177 = arith.constant 0.000000e+00 : f32
    %343 = vector.broadcast %cst_177 : f32 to vector<1x128xf32>
    %344 = arith.maximumf %342, %343 : vector<1x128xf32>
    %345 = arith.truncf %344 : vector<1x128xf32> to vector<1x128xbf16>
    %c22 = arith.constant 22 : index
    %c0_178 = arith.constant 0 : index
    %c0_179 = arith.constant 0 : index
    %346 = vector.load %arg6[%c22, %c0_178, %c0_179] : memref<25x128x10xbf16, #tpu.memory_space<vmem>>, vector<1x128x10xbf16>
    %347 = vector.shape_cast %346 : vector<1x128x10xbf16> to vector<128x10xbf16>
    %cst_180 = arith.constant dense<0.000000e+00> : vector<1x10xf32>
    %348 = tpu.matmul %345, %347, %cst_180 {dimension_numbers = #tpu.dot_dimension_numbers<[1], [0], [0], [1], [0, 0, 1, 1], [], []>} : vector<1x128xbf16>, vector<128x10xbf16>, vector<1x10xf32> -> vector<1x10xf32>
    %349 = arith.addf %338, %348 : vector<1x10xf32>
    %350 = vector.extract_strided_slice %316 {offsets = [6, 0], sizes = [1, 128], strides = [1, 1]} : vector<10x128xf32> to vector<1x128xf32>
    %351 = vector.extract_strided_slice %316 {offsets = [7, 0], sizes = [1, 128], strides = [1, 1]} : vector<10x128xf32> to vector<1x128xf32>
    %352 = arith.maximumf %350, %351 : vector<1x128xf32>
    %353 = arith.addf %352, %81 : vector<1x128xf32>
    %cst_181 = arith.constant 0.000000e+00 : f32
    %354 = vector.broadcast %cst_181 : f32 to vector<1x128xf32>
    %355 = arith.maximumf %353, %354 : vector<1x128xf32>
    %356 = arith.truncf %355 : vector<1x128xf32> to vector<1x128xbf16>
    %c23 = arith.constant 23 : index
    %c0_182 = arith.constant 0 : index
    %c0_183 = arith.constant 0 : index
    %357 = vector.load %arg6[%c23, %c0_182, %c0_183] : memref<25x128x10xbf16, #tpu.memory_space<vmem>>, vector<1x128x10xbf16>
    %358 = vector.shape_cast %357 : vector<1x128x10xbf16> to vector<128x10xbf16>
    %cst_184 = arith.constant dense<0.000000e+00> : vector<1x10xf32>
    %359 = tpu.matmul %356, %358, %cst_184 {dimension_numbers = #tpu.dot_dimension_numbers<[1], [0], [0], [1], [0, 0, 1, 1], [], []>} : vector<1x128xbf16>, vector<128x10xbf16>, vector<1x10xf32> -> vector<1x10xf32>
    %360 = arith.addf %349, %359 : vector<1x10xf32>
    %361 = vector.extract_strided_slice %316 {offsets = [8, 0], sizes = [1, 128], strides = [1, 1]} : vector<10x128xf32> to vector<1x128xf32>
    %362 = vector.extract_strided_slice %316 {offsets = [9, 0], sizes = [1, 128], strides = [1, 1]} : vector<10x128xf32> to vector<1x128xf32>
    %363 = arith.maximumf %361, %362 : vector<1x128xf32>
    %364 = arith.addf %363, %81 : vector<1x128xf32>
    %cst_185 = arith.constant 0.000000e+00 : f32
    %365 = vector.broadcast %cst_185 : f32 to vector<1x128xf32>
    %366 = arith.maximumf %364, %365 : vector<1x128xf32>
    %367 = arith.truncf %366 : vector<1x128xf32> to vector<1x128xbf16>
    %c24 = arith.constant 24 : index
    %c0_186 = arith.constant 0 : index
    %c0_187 = arith.constant 0 : index
    %368 = vector.load %arg6[%c24, %c0_186, %c0_187] : memref<25x128x10xbf16, #tpu.memory_space<vmem>>, vector<1x128x10xbf16>
    %369 = vector.shape_cast %368 : vector<1x128x10xbf16> to vector<128x10xbf16>
    %cst_188 = arith.constant dense<0.000000e+00> : vector<1x10xf32>
    %370 = tpu.matmul %367, %369, %cst_188 {dimension_numbers = #tpu.dot_dimension_numbers<[1], [0], [0], [1], [0, 0, 1, 1], [], []>} : vector<1x128xbf16>, vector<128x10xbf16>, vector<1x10xf32> -> vector<1x10xf32>
    %371 = arith.addf %360, %370 : vector<1x10xf32>
    %cst_189 = arith.constant dense<0xFF800000> : vector<1xf32>
    %372 = vector.multi_reduction <maximumf>, %371, %cst_189 [1] : vector<1x10xf32> to vector<1xf32>
    %373 = vector.shape_cast %372 : vector<1xf32> to vector<1x1xf32>
    %374 = vector.broadcast %373 : vector<1x1xf32> to vector<1x10xf32>
    %375 = arith.subf %371, %374 : vector<1x10xf32>
    %376 = math.exp %375 : vector<1x10xf32>
    %cst_190 = arith.constant dense<0.000000e+00> : vector<1xf32>
    %377 = vector.multi_reduction <add>, %376, %cst_190 [1] : vector<1x10xf32> to vector<1xf32>
    %378 = vector.shape_cast %377 : vector<1xf32> to vector<1x1xf32>
    %379 = tpu.reciprocal %378 {approx = true} : vector<1x1xf32> -> vector<1x1xf32>
    %380 = vector.broadcast %379 : vector<1x1xf32> to vector<1x10xf32>
    %381 = arith.mulf %376, %380 : vector<1x10xf32>
    %c0_191 = arith.constant 0 : index
    %c0_192 = arith.constant 0 : index
    %c0_193 = arith.constant 0 : index
    %382 = vector.load %arg8[%c0_191, %c0_192, %c0_193] : memref<1x1x10xf32, #tpu.memory_space<vmem>>, vector<1x1x10xf32>
    %383 = vector.shape_cast %382 : vector<1x1x10xf32> to vector<1x10xf32>
    %384 = vector.shape_cast %381 : vector<1x10xf32> to vector<1x1x10xf32>
    tpu.vector_store %arg8[%c0_191, %c0_192, %c0_193], %384 {strides = array<i32>} : memref<1x1x10xf32, #tpu.memory_space<vmem>>, vector<1x1x10xf32>,
    return
  }
  func.func @transform_0(%arg0: i32) -> (i32, i32, i32, i32) {
    %c0_i32 = arith.constant 0 : i32
    %c0_i32_0 = arith.constant 0 : i32
    %c0_i32_1 = arith.constant 0 : i32
    %c0_i32_2 = arith.constant 0 : i32
    return %arg0, %c0_i32, %c0_i32_0, %c0_i32_1 : i32, i32, i32, i32
  }
  func.func @transform_1(%arg0: i32) -> (i32, i32) {
    %c0_i32 = arith.constant 0 : i32
    %c0_i32_0 = arith.constant 0 : i32
    %c0_i32_1 = arith.constant 0 : i32
    return %c0_i32, %c0_i32_0 : i32, i32
  }
  func.func @transform_2(%arg0: i32) -> (i32, i32) {
    %c0_i32 = arith.constant 0 : i32
    %c0_i32_0 = arith.constant 0 : i32
    %c0_i32_1 = arith.constant 0 : i32
    return %c0_i32, %c0_i32_0 : i32, i32
  }
  func.func @transform_3(%arg0: i32) -> (i32, i32, i32) {
    %c0_i32 = arith.constant 0 : i32
    %c0_i32_0 = arith.constant 0 : i32
    %c0_i32_1 = arith.constant 0 : i32
    %c0_i32_2 = arith.constant 0 : i32
    return %c0_i32, %c0_i32_0, %c0_i32_1 : i32, i32, i32
  }
  func.func @transform_4(%arg0: i32) -> (i32, i32) {
    %c0_i32 = arith.constant 0 : i32
    %c0_i32_0 = arith.constant 0 : i32
    %c0_i32_1 = arith.constant 0 : i32
    return %c0_i32, %c0_i32_0 : i32, i32
  }
  func.func @transform_5(%arg0: i32) -> (i32, i32, i32) {
    %c0_i32 = arith.constant 0 : i32
    %c0_i32_0 = arith.constant 0 : i32
    %c0_i32_1 = arith.constant 0 : i32
    %c0_i32_2 = arith.constant 0 : i32
    return %c0_i32, %c0_i32_0, %c0_i32_1 : i32, i32, i32
  }
  func.func @transform_6(%arg0: i32) -> (i32, i32) {
    %c0_i32 = arith.constant 0 : i32
    %c0_i32_0 = arith.constant 0 : i32
    %c0_i32_1 = arith.constant 0 : i32
    return %c0_i32, %c0_i32_0 : i32, i32
  }
  func.func @transform_7(%arg0: i32) -> (i32, i32, i32) {
    %c0_i32 = arith.constant 0 : i32
    %c0_i32_0 = arith.constant 0 : i32
    %c0_i32_1 = arith.constant 0 : i32
    return %arg0, %c0_i32, %c0_i32_0 : i32, i32, i32
  }
}

</mosaic_0001>

<bundles_post_ra>
// kernel: cnn_forward.1
= control target key start
LH: loop header
LB: loop body
LE: loop exit
PB: predicated region body
PF: predicated region fallthrough
CT: control target
= control target key end

     0   :  { %12 = vsyncpa [#allocation4], 0  ;;  %s11135_s0 = inlined_call_operand.vmem [shape: bf16[2,4,169,9], index: 0, kind: input, shape index: {}]   ;;  %s11136_s1 = inlined_call_operand.vmem [shape: bf16[9,64], index: 1, kind: input, shape index: {}]   ;;  %s11137_s2 = inlined_call_operand.vmem [shape: f32[1,64], index: 2, kind: input, shape index: {}]   ;;  %s11138_s3 = inlined_call_operand.vmem [shape: bf16[9,64,128], index: 3, kind: input, shape index: {}]   ;;  %s11139_s4 = inlined_call_operand.vmem [shape: f32[1,128], index: 4, kind: input, shape index: {}]   ;;  %s11140_s5 = inlined_call_operand.vmem [shape: bf16[25,128,10], index: 5, kind: input, shape index: {}]   ;;  %s11141_s6 = inlined_call_operand.vmem [shape: f32[1,10], index: 6, kind: input, shape index: {}]   ;;  %s11142_s7 = inlined_call_operand.hbm [shape: f32[2,1,10], index: 7, kind: output, shape index: {}]  }
   0x1   :  { %14 = vsyncpa [#allocation4 + $0x1], 0  ;;  %s8935_s24 = smov 0   ;;  %s8937_s25 = smov 0  }
   0x2   :  { %s8939_s26 = smov 0   ;;  %s8941_s27 = smov 0  }
   0x3 LB: > { %s8956_s28 = sadd.s32 4294967295, %s8889_s27   ;;  %s6099_s29 = sadd.s32 4294967294, %s8889_s27   ;;  %s8889_s27 = sphi %s8941_s27, %s11169_s27   ;;  %s8885_s26 = sphi %s8939_s26, %s11168_s26   ;;  %s8881_s25 = sphi %s8937_s25, %s11167_s25   ;;  %s8877_s24 = sphi %s8935_s24, %s11166_s24  }
   0x4   : > { %s8960_s30 = sadd.s32 1, %s8889_s27   ;;  %s179_s8 = sadd.s32 1, %s8885_s26 }
   0x5   : > { %s176_s9 = ssub.s32 %s8889_s27, %s8960_s30  ;;  %p189_p0 = scmp.ne.s32.totalorder %s8885_s26, %s8881_s25 }
   0x6   : > { %p177_p1 = scmp.eq.s32.totalorder %s176_s9, 0  ;;  %p190_p2 = scmp.eq.s32.totalorder %s8956_s28, 1 }
   0x7   : > { %p195_p3 = scmp.ne.s32.totalorder %s8881_s25, %s8877_s24  ;;  %p196_p4 = scmp.eq.s32.totalorder %s6099_s29, 1 }
   0x8   : > { %s8971_s10 = scalar_select %p177_p1, %s8885_s26, %s179_s8  }
   0x9   : > { %p8973_p5 = por %p190_p2, %p189_p0  ;;  %p8977_p6 = por %p196_p4, %p195_p3 }
   0xa   : > { %p6102_p7 = scmp.ge.s32.totalorder %s8889_s27, 1  ;;  %p240_p8 = scmp.lt.s32.totalorder %s8889_s27, 3 }
   0xc   : > { %p241_p9 = pnand %p6102_p7, %p240_p8 }
   0xd   : > { %p271_p10 = scmp.lt.s32.totalorder (!%p241_p9), %s8956_s28, 1  ;;  %s269_s29 = sand.u32 (!%p241_p9), 1, %s8881_s25  }
   0xe   : > { %244 = sbr.rel (%p241_p9) target bundleno = 1784 (0x6f8), region = 48  ;;  %s7025_s8 = sshll.u32 (!%p241_p9), %s8956_s28, 4 }
   0xf   : > { %s270_s9 = scalar_lea.vmem (!%p241_p9), [#allocation3], %s269_s29  ;;  %s6032_s17 = scalar_lea.sflag (!%p241_p9), [#allocation4], %s269_s29 }
  0x10   : > { %s6044_s13 = sshll.u32 (!%p241_p9), %s270_s9, 4  ;;  %s8894_s20 = smov (!%p241_p9), [#allocation3]   ;;  %s6045_s13 = int_to_ptr.vmem [resolvable:$true] %s6044_s13 }
  0x11   : > { %s8829_s18 = scalar_lea.vmem (!%p241_p9), %s6045_s13, 16 }
  0x12   : > { %p8830_p11 = scmp.ne.s32.totalorder (!%p241_p9), %s6045_s13, %s8829_s18 }
  0x13   : > { %vm395_vm0 = vcmask 1043456   ;;  %v11143_v0 = vmov 0.0   ;;  %v8543_v1 = vld [vmem:[%s11136_s1] sm:$0x1f]   ;;  %vm396_vm1 = vcmask 1044480   ;;  %v8892_v2 = vmov 65535  }
  0x14   : > { %7418 = vmatprep.subr.bf16.mxu0 %v11143_v0  ;;  %8498 = vmatprep.subr.bf16.mxu1 %v11143_v0  ;;  %v397_v3 = vsel %vm395_vm0, 4294967295, %v8892_v2  ;;  %vm8893_vm2 = vmmov 0   ;;  %s272_s15 = scalar_select %p271_p10, %s8956_s28, 1  ;;  %vm361_vm3 = vcmask 72704   ;;  %v8588_v33 = vld [vmem:[%s11138_s3 + $0x38] sm:$0xff]   ;;  %v8589_v39 = vld [vmem:[%s11138_s3 + $0x30] sm:$0xff]  }
  0x15   : > { %7420 = vmatprep.mubr.msk.bf16.mxu0 %vm8893_vm2, %v11143_v0  ;;  %7470 = vmatprep.mubr.msk.bf16.mxu1 %vm8893_vm2, %v11143_v0  ;;  %v398_v4 = vsel %vm396_vm1, %v397_v3, 0  ;;  %v8590_v46 = vld [vmem:[%s11138_s3 + $0x28] sm:$0xff]   ;;  %v8592_v52 = vld [vmem:[%s11138_s3 + $0x18] sm:$0xff]   ;;  %v8593_v54 = vld [vmem:[%s11138_s3 + $0x10] sm:$0xff]   ;;  %vm1360_vm4 = vcmask 522240   ;;  %vm1336_vm5 = vcmask 523264   ;;  %p8831_p12 = pnand %p8830_p11, %p8973_p5 }
  0x16   : > { %v8994_v5 = vand.u32 %v8543_v1, %v398_v4  ;;  %s8500_s16 = smul.u32 352, %s272_s15  ;;  %v8591_v55 = vld [vmem:[%s11138_s3 + $0x20] sm:$0xff]   ;;  %v8594_v56 = vld [vmem:[%s11138_s3 + $0x8] sm:$0xff]   ;;  %1361 = vst.msk [vmem:[#allocation2 + $0xa9] sm:$0x7f] %vm1360_vm4, %v11143_v0  ;;  %vm1358_vm6 = vcmask 516096  }
  0x17   : > { %v8595_v57 = vld [vmem:[%s11138_s3] sm:$0xff]   ;;  %vm3187_vm7 = vcmask 1042432   ;;  %vm6018_vm8 = vcmask 73728   ;;  %p8832_p13 = pneg %p8831_p12 }
  0x18   : > { %7419 = vmatpush3.bf16.msra.mxu0 %v8994_v5  ;;  %8499 = vmatpush3.bf16.msra.mxu1 %v8994_v5  ;;  %s9002_s19 = scalar_lea.vmem %s11135_s0, %s8500_s16  ;;  %s6042_s16 = scalar_lea.hbm %s11142_s7, %s7025_s8 }
  0x19   : > { %7464 = vmatprep.subr.bf16.mxu0 %v11143_v0  ;;  %7556 = vmatprep.subr.bf16.mxu1 %v11143_v0  ;;  %v8544_v6 = vld [vmem:[%s9002_s19] sm:$0xff]   ;;  %v8545_v8 = vld [vmem:[%s9002_s19 + $0x8] sm:$0xff]   ;;  %v8547_v10 = vld [vmem:[%s9002_s19 + $0x10] sm:$0xff]  }
  0x1a   : > { %v8546_v7 = vld [vmem:[%s9002_s19 + $0x60] sm:$0xff]   ;;  %v8548_v9 = vld [vmem:[%s9002_s19 + $0x68] sm:$0xff]   ;;  %v8550_v11 = vld [vmem:[%s9002_s19 + $0x70] sm:$0xff]  }
  0x1b   : > { %7421 = vmatmul.mubr.msk.bf16.vlgmr.msra.gmra.mxu0 %vm361_vm3, %v8544_v6  ;;  %7471 = vmatmul.mubr.msk.bf16.vlgmr.msra.gmra.mxu1 %vm361_vm3, %v8546_v7  ;;  %v8549_v12 = vld [vmem:[%s9002_s19 + $0x18] sm:$0xff]   ;;  %v8551_v14 = vld [vmem:[%s9002_s19 + $0x20] sm:$0xff]   ;;  %v8553_v16 = vld [vmem:[%s9002_s19 + $0x28] sm:$0xff]  }
  0x1c   : > { %7465 = vmatpush3.bf16.msra.mxu0 %v8994_v5  ;;  %7424 = vmatprep.mubr.msk.bf16.mxu0 %vm8893_vm2, %v11143_v0  ;;  %v8552_v13 = vld [vmem:[%s9002_s19 + $0x78] sm:$0xff]   ;;  %v8554_v15 = vld [vmem:[%s9002_s19 + $0x80] sm:$0xff]   ;;  %v8556_v17 = vld [vmem:[%s9002_s19 + $0x88] sm:$0xff]  }
  0x1d   : > { %7510 = vmatprep.subr.bf16.mxu0 %v11143_v0  ;;  %7474 = vmatprep.mubr.msk.bf16.mxu1 %vm8893_vm2, %v11143_v0  ;;  %v8555_v18 = vld [vmem:[%s9002_s19 + $0x30] sm:$0xff]   ;;  %v8557_v20 = vld [vmem:[%s9002_s19 + $0x38] sm:$0xff]   ;;  %v8559_v22 = vld [vmem:[%s9002_s19 + $0x40] sm:$0xff]  }
  0x1e   : > { %7557 = vmatpush3.bf16.msra.mxu1 %v8994_v5  ;;  %v8558_v19 = vld [vmem:[%s9002_s19 + $0x90] sm:$0xff]   ;;  %v8560_v21 = vld [vmem:[%s9002_s19 + $0x98] sm:$0xff]   ;;  %v8562_v23 = vld [vmem:[%s9002_s19 + $0xa0] sm:$0xff]  }
  0x1f   : > { %7646 = vmatprep.subr.bf16.mxu1 %v11143_v0  ;;  %v8561_v24 = vld [vmem:[%s9002_s19 + $0x48] sm:$0xff]   ;;  %v8563_v26 = vld [vmem:[%s9002_s19 + $0x50] sm:$0x1f]   ;;  %v8565_v28 = vld [vmem:[%s9002_s19 + $0x58] sm:$0xff]  }
  0x20   : > { %v8564_v25 = vld [vmem:[%s9002_s19 + $0xa8] sm:$0x1f]   ;;  %v8568_v29 = vld [vmem:[%s9002_s19 + $0x110] sm:$0xff]   ;;  %v8570_v31 = vld [vmem:[%s9002_s19 + $0x118] sm:$0xff]  }
  0x21   : > { %v8566_v27 = vld [vmem:[%s9002_s19 + $0x108] sm:$0xff]   ;;  %v8567_v30 = vld [vmem:[%s9002_s19 + $0xb0] sm:$0xff]   ;;  %v8569_v32 = vld [vmem:[%s9002_s19 + $0xb8] sm:$0xff]  }
  0x22   : > { %v8572_v34 = vld [vmem:[%s9002_s19 + $0x120] sm:$0xff]   ;;  %v8574_v36 = vld [vmem:[%s9002_s19 + $0x128] sm:$0xff]   ;;  %v8576_v38 = vld [vmem:[%s9002_s19 + $0x130] sm:$0xff]  }
  0x23   : > { %7425 = vmatmul.mubr.msk.bf16.gmra.mxu0 %vm361_vm3, %v8545_v8  ;;  %7475 = vmatmul.mubr.msk.bf16.gmra.mxu1 %vm361_vm3, %v8548_v9  ;;  %v8571_v35 = vld [vmem:[%s9002_s19 + $0xc0] sm:$0xff]   ;;  %v8573_v37 = vld [vmem:[%s9002_s19 + $0xc8] sm:$0xff]   ;;  %v8575_v40 = vld [vmem:[%s9002_s19 + $0xd0] sm:$0xff]  }
  0x24   : > { %7428 = vmatprep.mubr.msk.bf16.mxu0 %vm8893_vm2, %v11143_v0  ;;  %7478 = vmatprep.mubr.msk.bf16.mxu1 %vm8893_vm2, %v11143_v0  ;;  %v8578_v41 = vld [vmem:[%s9002_s19 + $0x138] sm:$0xff]   ;;  %v8580_v43 = vld [vmem:[%s9002_s19 + $0x140] sm:$0xff]   ;;  %v8582_v45 = vld [vmem:[%s9002_s19 + $0x148] sm:$0xff]  }
  0x25   : > { %v8577_v42 = vld [vmem:[%s9002_s19 + $0xd8] sm:$0xff]   ;;  %v8579_v44 = vld [vmem:[%s9002_s19 + $0xe0] sm:$0xff]   ;;  %v8581_v47 = vld [vmem:[%s9002_s19 + $0xe8] sm:$0xff]  }
  0x26   : > { %v8585_v48 = vld [vmem:[%s9002_s19 + $0x150] sm:$0xff]   ;;  %v8587_v50 = vld [vmem:[%s9002_s19 + $0x158] sm:$0x1f]   ;;  %v8586_v53 = vld [vmem:[%s9002_s19 + $0x100] sm:$0x1f]  }
  0x27   : > { %v8583_v49 = vld [vmem:[%s9002_s19 + $0xf0] sm:$0xff]   ;;  %v8584_v51 = vld [vmem:[%s9002_s19 + $0xf8] sm:$0xff]   ;;  %s8833_s19 = sshll.u32 %s8894_s20, 4  ;;  %s8834_s19 = int_to_ptr.vmem [resolvable:$false] %s8833_s19 }
  0x28   : > { %s8835_s28 = scalar_lea.vmem %s8834_s19, 32  ;;  %p8836_p0 = scmp.lt.s32.totalorder %s6045_s13, %s8834_s19 }
  0x29   : > { %p8837_p1 = scmp.lt.s32.totalorder %s8835_s28, %s8829_s18 }
  0x2b   : > { %7429 = vmatmul.mubr.msk.bf16.gmra.mxu0 %vm361_vm3, %v8547_v10  ;;  %7479 = vmatmul.mubr.msk.bf16.gmra.mxu1 %vm361_vm3, %v8550_v11  ;;  %p8838_p2 = por %p8837_p1, %p8836_p0 }
  0x2c   : > { %7432 = vmatprep.mubr.msk.bf16.mxu0 %vm8893_vm2, %v11143_v0  ;;  %7482 = vmatprep.mubr.msk.bf16.mxu1 %vm8893_vm2, %v11143_v0 }
  0x2d   : > { %p8839_p3 = pnand %p8838_p2, %p8832_p13 }
  0x33   : > { %7433 = vmatmul.mubr.msk.bf16.gmra.mxu0 %vm361_vm3, %v8549_v12  ;;  %7483 = vmatmul.mubr.msk.bf16.gmra.mxu1 %vm361_vm3, %v8552_v13 }
  0x34   : > { %7436 = vmatprep.mubr.msk.bf16.mxu0 %vm8893_vm2, %v11143_v0  ;;  %7486 = vmatprep.mubr.msk.bf16.mxu1 %vm8893_vm2, %v11143_v0 }
  0x3b   : > { %7437 = vmatmul.mubr.msk.bf16.gmra.mxu0 %vm361_vm3, %v8551_v14  ;;  %7487 = vmatmul.mubr.msk.bf16.gmra.mxu1 %vm361_vm3, %v8554_v15 }
  0x3c   : > { %7440 = vmatprep.mubr.msk.bf16.mxu0 %vm8893_vm2, %v11143_v0  ;;  %7490 = vmatprep.mubr.msk.bf16.mxu1 %vm8893_vm2, %v11143_v0 }
  0x43   : > { %7441 = vmatmul.mubr.msk.bf16.gmra.mxu0 %vm361_vm3, %v8553_v16  ;;  %7491 = vmatmul.mubr.msk.bf16.gmra.mxu1 %vm361_vm3, %v8556_v17 }
  0x44   : > { %7444 = vmatprep.mubr.msk.bf16.mxu0 %vm8893_vm2, %v11143_v0  ;;  %7494 = vmatprep.mubr.msk.bf16.mxu1 %vm8893_vm2, %v11143_v0 }
  0x4b   : > { %7445 = vmatmul.mubr.msk.bf16.gmra.mxu0 %vm361_vm3, %v8555_v18  ;;  %7495 = vmatmul.mubr.msk.bf16.gmra.mxu1 %vm361_vm3, %v8558_v19 }
  0x4c   : > { %7448 = vmatprep.mubr.msk.bf16.mxu0 %vm8893_vm2, %v11143_v0  ;;  %7498 = vmatprep.mubr.msk.bf16.mxu1 %vm8893_vm2, %v11143_v0 }
  0x53   : > { %7449 = vmatmul.mubr.msk.bf16.gmra.mxu0 %vm361_vm3, %v8557_v20  ;;  %7499 = vmatmul.mubr.msk.bf16.gmra.mxu1 %vm361_vm3, %v8560_v21 }
  0x54   : > { %7452 = vmatprep.mubr.msk.bf16.mxu0 %vm8893_vm2, %v11143_v0  ;;  %7502 = vmatprep.mubr.msk.bf16.mxu1 %vm8893_vm2, %v11143_v0 }
  0x5b   : > { %7453 = vmatmul.mubr.msk.bf16.gmra.mxu0 %vm361_vm3, %v8559_v22  ;;  %7503 = vmatmul.mubr.msk.bf16.gmra.mxu1 %vm361_vm3, %v8562_v23 }
  0x5c   : > { %7456 = vmatprep.mubr.msk.bf16.mxu0 %vm8893_vm2, %v11143_v0  ;;  %7506 = vmatprep.mubr.msk.bf16.mxu1 %vm8893_vm2, %v11143_v0 }
  0x63   : > { %7457 = vmatmul.mubr.msk.bf16.gmra.mxu0 %vm361_vm3, %v8561_v24  ;;  %7507 = vmatmul.mubr.msk.bf16.gmra.mxu1 %vm361_vm3, %v8564_v25 }
  0x64   : > { %7460 = vmatprep.mubr.msk.bf16.mxu0 %vm8893_vm2, %v11143_v0  ;;  %7558 = vmatprep.mubr.msk.bf16.mxu1 %vm8893_vm2, %v11143_v0 }
  0x6b   : > { %7461 = vmatmul.mubr.msk.bf16.gmra.mxu0 %vm361_vm3, %v8563_v26  ;;  %7559 = vmatmul.mubr.msk.bf16.vlgmr.msra.gmra.mxu1 %vm361_vm3, %v8566_v27 }
  0x6c   : > { %7466 = vmatprep.mubr.msk.bf16.mxu0 %vm8893_vm2, %v11143_v0  ;;  %7562 = vmatprep.mubr.msk.bf16.mxu1 %vm8893_vm2, %v11143_v0 }
  0x6d   : > { %7647 = vmatpush3.bf16.msra.mxu1 %v8592_v52 }
  0x6e   : > { %7648 = vmatprep.subr.bf16.mxu1 %v11143_v0 }
  0x71   : > { %7649 = vmatpush3.bf16.msra.mxu1 %v8593_v54 }
  0x72   : > { %7650 = vmatprep.subr.bf16.mxu1 %v11143_v0 }
  0x73   : > { %7467 = vmatmul.mubr.msk.bf16.vlgmr.msra.gmra.mxu0 %vm361_vm3, %v8565_v28  ;;  %7563 = vmatmul.mubr.msk.bf16.gmra.mxu1 %vm361_vm3, %v8568_v29 }
  0x74   : > { %7511 = vmatpush3.bf16.msra.mxu0 %v8994_v5  ;;  %7512 = vmatprep.mubr.msk.bf16.mxu0 %vm8893_vm2, %v11143_v0 }
  0x75   : > { %7602 = vmatprep.subr.bf16.mxu0 %v11143_v0  ;;  %7566 = vmatprep.mubr.msk.bf16.mxu1 %vm8893_vm2, %v11143_v0 }
  0x76   : > { %7651 = vmatpush3.bf16.msra.mxu1 %v8594_v56 }
  0x77   : > { %7652 = vmatprep.subr.bf16.mxu1 %v11143_v0 }
  0x7a   : > { %7653 = vmatpush3.bf16.msra.mxu1 %v8595_v57 }
  0x7b   : > { %7513 = vmatmul.mubr.msk.bf16.vlgmr.msra.gmra.mxu0 %vm361_vm3, %v8567_v30  ;;  %7567 = vmatmul.mubr.msk.bf16.gmra.mxu1 %vm361_vm3, %v8570_v31 }
  0x7c   : > { %7516 = vmatprep.mubr.msk.bf16.mxu0 %vm8893_vm2, %v11143_v0  ;;  %7570 = vmatprep.mubr.msk.bf16.mxu1 %vm8893_vm2, %v11143_v0 }
  0x7d   : > { %7603 = vmatpush3.bf16.msra.mxu0 %v8588_v33  ;;  %7734 = vmatprep.subr.bf16.mxu1 %v11143_v0 }
  0x7e   : > { %7604 = vmatprep.subr.bf16.mxu0 %v11143_v0 }
  0x81   : > { %7605 = vmatpush3.bf16.msra.mxu0 %v8589_v39 }
  0x82   : > { %7606 = vmatprep.subr.bf16.mxu0 %v11143_v0 }
  0x83   : > { %7517 = vmatmul.mubr.msk.bf16.gmra.mxu0 %vm361_vm3, %v8569_v32  ;;  %7571 = vmatmul.mubr.msk.bf16.gmra.mxu1 %vm361_vm3, %v8572_v34 }
  0x84   : > { %7520 = vmatprep.mubr.msk.bf16.mxu0 %vm8893_vm2, %v11143_v0  ;;  %7574 = vmatprep.mubr.msk.bf16.mxu1 %vm8893_vm2, %v11143_v0 }
  0x85   : > { %7607 = vmatpush3.bf16.msra.mxu0 %v8590_v46 }
  0x86   : > { %7608 = vmatprep.subr.bf16.mxu0 %v11143_v0 }
  0x89   : > { %7609 = vmatpush3.bf16.msra.mxu0 %v8591_v55 }
  0x8a   : > { %7690 = vmatprep.subr.bf16.mxu0 %v11143_v0 }
  0x8b   : > { %7521 = vmatmul.mubr.msk.bf16.gmra.mxu0 %vm361_vm3, %v8571_v35  ;;  %7575 = vmatmul.mubr.msk.bf16.gmra.mxu1 %vm361_vm3, %v8574_v36 }
  0x8c   : > { %7524 = vmatprep.mubr.msk.bf16.mxu0 %vm8893_vm2, %v11143_v0  ;;  %7578 = vmatprep.mubr.msk.bf16.mxu1 %vm8893_vm2, %v11143_v0 }
  0x93   : > { %7525 = vmatmul.mubr.msk.bf16.gmra.mxu0 %vm361_vm3, %v8573_v37  ;;  %7579 = vmatmul.mubr.msk.bf16.gmra.mxu1 %vm361_vm3, %v8576_v38 }
  0x94   : > { %7528 = vmatprep.mubr.msk.bf16.mxu0 %vm8893_vm2, %v11143_v0  ;;  %7582 = vmatprep.mubr.msk.bf16.mxu1 %vm8893_vm2, %v11143_v0 }
  0x9b   : > { %7529 = vmatmul.mubr.msk.bf16.gmra.mxu0 %vm361_vm3, %v8575_v40  ;;  %7583 = vmatmul.mubr.msk.bf16.gmra.mxu1 %vm361_vm3, %v8578_v41 }
  0x9c   : > { %7532 = vmatprep.mubr.msk.bf16.mxu0 %vm8893_vm2, %v11143_v0  ;;  %7586 = vmatprep.mubr.msk.bf16.mxu1 %vm8893_vm2, %v11143_v0 }
  0xa3   : > { %7533 = vmatmul.mubr.msk.bf16.gmra.mxu0 %vm361_vm3, %v8577_v42  ;;  %7587 = vmatmul.mubr.msk.bf16.gmra.mxu1 %vm361_vm3, %v8580_v43 }
  0xa4   : > { %7536 = vmatprep.mubr.msk.bf16.mxu0 %vm8893_vm2, %v11143_v0  ;;  %7590 = vmatprep.mubr.msk.bf16.mxu1 %vm8893_vm2, %v11143_v0 }
  0xab   : > { %7537 = vmatmul.mubr.msk.bf16.gmra.mxu0 %vm361_vm3, %v8579_v44  ;;  %7591 = vmatmul.mubr.msk.bf16.gmra.mxu1 %vm361_vm3, %v8582_v45 }
  0xac   : > { %7540 = vmatprep.mubr.msk.bf16.mxu0 %vm8893_vm2, %v11143_v0  ;;  %7594 = vmatprep.mubr.msk.bf16.mxu1 %vm8893_vm2, %v11143_v0 }
  0xb3   : > { %7541 = vmatmul.mubr.msk.bf16.gmra.mxu0 %vm361_vm3, %v8581_v47  ;;  %7595 = vmatmul.mubr.msk.bf16.gmra.mxu1 %vm361_vm3, %v8585_v48 }
  0xb4   : > { %7544 = vmatprep.mubr.msk.bf16.mxu0 %vm8893_vm2, %v11143_v0  ;;  %7598 = vmatprep.mubr.msk.bf16.mxu1 %vm8893_vm2, %v11143_v0 }
  0xbb   : > { %7545 = vmatmul.mubr.msk.bf16.gmra.mxu0 %vm361_vm3, %v8583_v49  ;;  %7599 = vmatmul.mubr.msk.bf16.gmra.mxu1 %vm361_vm3, %v8587_v50 }
  0xbc   : > { %7548 = vmatprep.mubr.msk.bf16.mxu0 %vm8893_vm2, %v11143_v0  ;;  %7654 = vmatprep.mubr.msk.bf16.mxu1 %vm8893_vm2, %v11143_v0 }
  0xc3   : > { %7549 = vmatmul.mubr.msk.bf16.gmra.mxu0 %vm361_vm3, %v8584_v51 }
  0xc4   : > { %7552 = vmatprep.mubr.msk.bf16.mxu0 %vm8893_vm2, %v11143_v0 }
  0xcb   : > { %7553 = vmatmul.mubr.msk.bf16.gmra.mxu0 %vm361_vm3, %v8586_v53 }
  0xcc   : > { %7610 = vmatprep.mubr.msk.bf16.mxu0 %vm8893_vm2, %v11143_v0 }
  0xdb   : > { %v9219_v58 = vpop.f32.mrf.mxu0  ;;  %v9221_v60 = vpop.f32.mrf.mxu1 }
  0xdd   : > { %v7422_v59 = vpop.f32.mrf.mxu0  ;;  %v7472_v62 = vpop.f32.mrf.mxu1 }
  0xdf   : > { %v9223_v61 = vpop.f32.mrf.mxu0  ;;  %v9225_v1 = vpop.f32.mrf.mxu1 }
  0xe1   : > { %v7423_v63 = vpop.f32.mrf.mxu0  ;;  %v7473_v3 = vpop.f32.mrf.mxu1 }
  0xe3   : > { %v9227_v2 = vpop.f32.mrf.mxu0  ;;  %v9231_v6 = vpop.f32.mrf.mxu1 }
  0xe4   : > { %v757_v4 = vmax.f32 %v9227_v2, %v9221_v60 }
  0xe5   : > { %v7426_v5 = vpop.f32.mrf.mxu0  ;;  %v7476_v8 = vpop.f32.mrf.mxu1 }
  0xe7   : > { %v9233_v7 = vpop.f32.mrf.mxu0  ;;  %v9237_v11 = vpop.f32.mrf.mxu1 }
  0xe8   : > { %v758_v9 = vmax.f32 %v9233_v7, %v9225_v1 }
  0xe9   : > { %v7427_v10 = vpop.f32.mrf.mxu0  ;;  %v7477_v13 = vpop.f32.mrf.mxu1 }
  0xeb   : > { %v9239_v12 = vpop.f32.mrf.mxu0  ;;  %v9243_v16 = vpop.f32.mrf.mxu1 }
  0xed   : > { %v7430_v15 = vpop.f32.mrf.mxu0  ;;  %v7480_v18 = vpop.f32.mrf.mxu1 }
  0xef   : > { %v9245_v17 = vpop.f32.mrf.mxu0  ;;  %v9249_v21 = vpop.f32.mrf.mxu1 }
  0xf1   : > { %v7431_v20 = vpop.f32.mrf.mxu0  ;;  %v7481_v23 = vpop.f32.mrf.mxu1 }
  0xf3   : > { %v9251_v22 = vpop.f32.mrf.mxu0  ;;  %v9255_v26 = vpop.f32.mrf.mxu1 }
  0xf5   : > { %v7434_v25 = vpop.f32.mrf.mxu0  ;;  %v7484_v28 = vpop.f32.mrf.mxu1 }
  0xf7   : > { %v9257_v27 = vpop.f32.mrf.mxu0  ;;  %v9261_v31 = vpop.f32.mrf.mxu1 }
  0xf9   : > { %v7435_v30 = vpop.f32.mrf.mxu0  ;;  %v7485_v33 = vpop.f32.mrf.mxu1 }
  0xfb   : > { %v9263_v32 = vpop.f32.mrf.mxu0  ;;  %v9267_v36 = vpop.f32.mrf.mxu1 }
  0xfd   : > { %v7438_v35 = vpop.f32.mrf.mxu0  ;;  %v7488_v38 = vpop.f32.mrf.mxu1 }
  0xff   : > { %v9269_v37 = vpop.f32.mrf.mxu0  ;;  %v9273_v41 = vpop.f32.mrf.mxu1 }
 0x101   : > { %v7439_v40 = vpop.f32.mrf.mxu0  ;;  %v7489_v43 = vpop.f32.mrf.mxu1 }
 0x103   : > { %v9275_v42 = vpop.f32.mrf.mxu0  ;;  %v9279_v46 = vpop.f32.mrf.mxu1 }
 0x105   : > { %v7442_v45 = vpop.f32.mrf.mxu0  ;;  %v7492_v48 = vpop.f32.mrf.mxu1 }
 0x107   : > { %v9281_v47 = vpop.f32.mrf.mxu0  ;;  %v9285_v51 = vpop.f32.mrf.mxu1 }
 0x109   : > { %v7443_v50 = vpop.f32.mrf.mxu0  ;;  %v7493_v53 = vpop.f32.mrf.mxu1 }
 0x10b   : > { %v9287_v52 = vpop.f32.mrf.mxu0  ;;  %v9291_v56 = vpop.f32.mrf.mxu1 }
 0x10d   : > { %v7446_v55 = vpop.f32.mrf.mxu0  ;;  %v7496_v59 = vpop.f32.mrf.mxu1 }
 0x10f   : > { %v9293_v57 = vpop.f32.mrf.mxu0  ;;  %v9297_v3 = vpop.f32.mrf.mxu1 }
 0x111   : > { %v7447_v63 = vpop.f32.mrf.mxu0  ;;  %v7497_v8 = vpop.f32.mrf.mxu1 }
 0x113   : > { %v9299_v5 = vpop.f32.mrf.mxu0  ;;  %v9303_v15 = vpop.f32.mrf.mxu1 }
 0x115   : > { %v7450_v13 = vpop.f32.mrf.mxu0  ;;  %v7500_v20 = vpop.f32.mrf.mxu1 }
 0x117   : > { %v9305_v18 = vpop.f32.mrf.mxu0  ;;  %v9309_v28 = vpop.f32.mrf.mxu1 }
 0x119   : > { %v7451_v25 = vpop.f32.mrf.mxu0  ;;  %v7501_v33 = vpop.f32.mrf.mxu1 }
 0x11b   : > { %v9312_v30 = vpop.f32.mrf.mxu0  ;;  %v9316_v40 = vpop.f32.mrf.mxu1 }
 0x11d   : > { %v7454_v38 = vpop.f32.mrf.mxu0  ;;  %v7504_v45 = vpop.f32.mrf.mxu1 }
 0x11f   : > { %v9318_v43 = vpop.f32.mrf.mxu0  ;;  %v9322_v53 = vpop.f32.mrf.mxu1 }
 0x121   : > { %v7455_v50 = vpop.f32.mrf.mxu0  ;;  %v7505_v59 = vpop.f32.mrf.mxu1 }
 0x123   : > { %v9324_v55 = vpop.f32.mrf.mxu0  ;;  %v9328_v13 = vpop.f32.mrf.mxu1 }
 0x125   : > { %v7458_v8 = vpop.f32.mrf.mxu0  ;;  %v7508_v25 = vpop.f32.mrf.mxu1 }
 0x127   : > { %v9330_v20 = vpop.f32.mrf.mxu0  ;;  %v9334_v45 = vpop.f32.mrf.mxu1 }
 0x129   : > { %v7459_v38 = vpop.f32.mrf.mxu0  ;;  %v7509_v48 = vpop.f32.mrf.mxu1 }
 0x12b   : > { %v9336_v50 = vpop.f32.mrf.mxu0  ;;  %v1176_v63 = vpop.f32.mrf.mxu1 }
 0x12d   : > { %v7462_v35 = vpop.f32.mrf.mxu0  ;;  %v7560_v23 = vpop.f32.mrf.mxu1 }
 0x12e   : > { %v9348_v23 = vld [vmem:[%s11137_s2] ss:$0 sm:$0xff] }
 0x12f   : > { %v9340_v8 = vpop.f32.mrf.mxu0  ;;  %v1179_v62 = vpop.f32.mrf.mxu1 }
 0x131   : > { %v7463_v10 = vpop.f32.mrf.mxu0  ;;  %v7561_v38 = vpop.f32.mrf.mxu1 }
 0x133   : > { %v668_v33 = vpop.f32.mrf.mxu0  ;;  %v1184_v49 = vpop.f32.mrf.mxu1 }
 0x134   : > { %v755_v59 = vmax.f32 %v9219_v58, %v668_v33 }
 0x135   : > { %v7468_v54 = vpop.f32.mrf.mxu0  ;;  %v7564_v39 = vpop.f32.mrf.mxu1 }
 0x137   : > { %v671_v44 = vpop.f32.mrf.mxu0  ;;  %v1187_v34 = vpop.f32.mrf.mxu1 }
 0x138   : > { %v756_v38 = vmax.f32 %v9223_v61, %v671_v44 }
 0x139   : > { %v7469_v48 = vpop.f32.mrf.mxu0  ;;  %v7565_v29 = vpop.f32.mrf.mxu1 }
 0x13b   : > { %v922_v35 = vpop.f32.mrf.mxu0  ;;  %v1192_v25 = vpop.f32.mrf.mxu1 }
 0x13c   : > { %v1009_v24 = vmax.f32 %v755_v59, %v922_v35 }
 0x13d   : > { %v7514_v10 = vpop.f32.mrf.mxu0  ;;  %v7568_v19 = vpop.f32.mrf.mxu1 }
 0x13e   : > { %v1263_v54 = vmax.f32 %v1009_v24, %v1176_v63 }
 0x13f   : > { %v925_v0 = vpop.f32.mrf.mxu0  ;;  %v1195_v33 = vpop.f32.mrf.mxu1 }
 0x140   : > { %v1292_v39 = vadd.f32 %v9348_v23, %v1263_v54  ;;  %v1010_v48 = vmax.f32 %v756_v38, %v925_v0 }
 0x141   : > { %v7515_v58 = vpop.f32.mrf.mxu0  ;;  %v7569_v14 = vpop.f32.mrf.mxu1 }
 0x142   : > { %v1314_v29 = vmax.f32 %v1292_v39, 0.0  ;;  %v1264_v59 = vmax.f32 %v1010_v48, %v1179_v62  ;;  %v11147_v58 = vmax.f32 %v9239_v12, %v9231_v6  ;;  %v11148_v6 = vmax.f32 %v9245_v17, %v9237_v11 }
 0x143   : > { %v930_v35 = vpop.f32.mrf.mxu0  ;;  %v1200_v19 = vpop.f32.mrf.mxu1 }
 0x144   : > { %1337 = vst.msk [vmem:[#allocation2] sm:$0xff] %vm1336_vm5, %v1314_v29  ;;  %v1293_v10 = vadd.f32 %v9348_v23, %v1264_v59  ;;  %v1011_v61 = vmax.f32 %v757_v4, %v930_v35 }
 0x145   : > { %v7518_v24 = vpop.f32.mrf.mxu0  ;;  %v7572_v38 = vpop.f32.mrf.mxu1 }
 0x146   : > { %v1315_v44 = vmax.f32 %v1293_v10, 0.0  ;;  %v1265_v63 = vmax.f32 %v1011_v61, %v1184_v49 }
 0x147   : > { %v933_v0 = vpop.f32.mrf.mxu0  ;;  %v9362_v39 = vpop.f32.mrf.mxu1 }
 0x148   : > { %1338 = vst.msk [vmem:[#allocation2 + $0x8] sm:$0xff] %vm1336_vm5, %v1315_v44  ;;  %v1294_v62 = vadd.f32 %v9348_v23, %v1265_v63  ;;  %v1012_v14 = vmax.f32 %v758_v9, %v933_v0 }
 0x149   : > { %v7519_v54 = vpop.f32.mrf.mxu0  ;;  %v7573_v4 = vpop.f32.mrf.mxu1 }
 0x14a   : > { %v1316_v48 = vmax.f32 %v1294_v62, 0.0  ;;  %v1266_v60 = vmax.f32 %v1012_v14, %v1187_v34  ;;  %v8599_v34 = vld [vmem:[%s11138_s3 + $0x78] sm:$0xff]  }
 0x14b   : > { %v938_v2 = vpop.f32.mrf.mxu0  ;;  %v9369_v35 = vpop.f32.mrf.mxu1  ;;  %v1362_v10 = vld [vmem:[#allocation2] sm:$0xff] }
 0x14c   : > { %1339 = vst.msk [vmem:[#allocation2 + $0x10] sm:$0xff] %vm1336_vm5, %v1316_v48  ;;  %v1295_v49 = vadd.f32 %v9348_v23, %v1266_v60  ;;  %v1013_v29 = vmax.f32 %v11147_v58, %v938_v2  ;;  %v8596_v60 = vld [vmem:[%s11138_s3 + $0x58] sm:$0xff]   ;;  %v11149_v2 = vmov 0.0   ;;  %v8601_v58 = vld [vmem:[%s11138_s3 + $0x70] sm:$0xff]  }
 0x14d   : > { %v7522_v59 = vpop.f32.mrf.mxu0  ;;  %v7576_v24 = vpop.f32.mrf.mxu1 }
 0x14e   : > { %v1317_v1 = vmax.f32 %v1295_v49, 0.0  ;;  %v1267_v7 = vmax.f32 %v1013_v29, %v1192_v25 }
 0x14f   : > { %v941_v9 = vpop.f32.mrf.mxu0  ;;  %v1363_v61 = vld [vmem:[#allocation2 + $0x8] sm:$0xff]  ;;  %v9379_v38 = vpop.f32.mrf.mxu1 }
 0x150   : > { %1340 = vst.msk [vmem:[#allocation2 + $0x18] sm:$0xff] %vm1336_vm5, %v1317_v1  ;;  %v1296_v44 = vadd.f32 %v9348_v23, %v1267_v7  ;;  %v1014_v12 = vmax.f32 %v11148_v6, %v941_v9  ;;  %v1380_v63 = vpack.c.bf16 %v1363_v61, %v1362_v10  ;;  %v1397_v54 = vld [vmem:[#allocation2 + $0x1] sm:$0xff] }
 0x151   : > { %v7523_v0 = vpop.f32.mrf.mxu0  ;;  %v7577_v11 = vpop.f32.mrf.mxu1  ;;  %v8602_v6 = vld [vmem:[%s11138_s3 + $0x68] sm:$0xff]  }
 0x152   : > { %v1318_v25 = vmax.f32 %v1296_v44, 0.0  ;;  %v1268_v62 = vmax.f32 %v1014_v12, %v1195_v33  ;;  %7655 = vmatmul.mubr.msk.bf16.vlgmr.msra.gmra.mxu1 %vm1336_vm5, %v1380_v63  ;;  %v11150_v33 = vmax.f32 %v9251_v22, %v9243_v16  ;;  %v8597_v22 = vld [vmem:[%s11138_s3 + $0x50] sm:$0xff]  }
 0x153   : > { %v946_v14 = vpop.f32.mrf.mxu0  ;;  %v1398_v48 = vld [vmem:[#allocation2 + $0x9] sm:$0xff]  ;;  %7658 = vmatprep.mubr.msk.bf16.mxu1 %vm8893_vm2, %v11149_v2  ;;  %7735 = vmatpush3.bf16.msra.mxu1 %v8599_v34  ;;  %v9396_v59 = vpop.f32.mrf.mxu1 }
 0x154   : > { %1341 = vst.msk [vmem:[#allocation2 + $0x20] sm:$0xff] %vm1336_vm5, %v1318_v25  ;;  %v1297_v17 = vadd.f32 %v9348_v23, %v1268_v62  ;;  %v1015_v4 = vmax.f32 %v11150_v33, %v946_v14  ;;  %v1415_v49 = vpack.c.bf16 %v1398_v48, %v1397_v54  ;;  %7736 = vmatprep.subr.bf16.mxu1 %v11149_v2  ;;  %v1364_v10 = vld [vmem:[#allocation2 + $0x10] sm:$0xff]  ;;  %v8598_v54 = vld [vmem:[%s11138_s3 + $0x48] sm:$0xff]  }
 0x155   : > { %v7526_v29 = vpop.f32.mrf.mxu0  ;;  %v7580_v16 = vpop.f32.mrf.mxu1 }
 0x156   : > { %v1319_v1 = vmax.f32 %v1297_v17, 0.0  ;;  %v1269_v7 = vmax.f32 %v1015_v4, %v1200_v19  ;;  %7611 = vmatmul.mubr.msk.bf16.vlgmr.msra.gmra.mxu0 %vm1336_vm5, %v1415_v49  ;;  %v11151_v19 = vmax.f32 %v9257_v27, %v9249_v21  ;;  %v8603_v17 = vld [vmem:[%s11138_s3 + $0x60] sm:$0xff]  }
 0x157   : > { %7691 = vmatpush3.bf16.msra.mxu0 %v8596_v60  ;;  %v949_v9 = vpop.f32.mrf.mxu0  ;;  %v1365_v61 = vld [vmem:[#allocation2 + $0x18] sm:$0xff]  ;;  %7614 = vmatprep.mubr.msk.bf16.mxu0 %vm8893_vm2, %v11149_v2  ;;  %v9413_v63 = vpop.f32.mrf.mxu1 }
 0x158   : > { %1342 = vst.msk [vmem:[#allocation2 + $0x28] sm:$0xff] %vm1336_vm5, %v1319_v1  ;;  %v1298_v24 = vadd.f32 %v9348_v23, %v1269_v7  ;;  %v1016_v34 = vmax.f32 %v11151_v19, %v949_v9  ;;  %v1381_v44 = vpack.c.bf16 %v1365_v61, %v1364_v10  ;;  %7692 = vmatprep.subr.bf16.mxu0 %v11149_v2  ;;  %v1399_v27 = vld [vmem:[#allocation2 + $0x11] sm:$0xff]  ;;  %v8600_v7 = vld [vmem:[%s11138_s3 + $0x40] sm:$0xff]  }
 0x159   : > { %7737 = vmatpush3.bf16.msra.mxu1 %v8601_v58  ;;  %v7527_v12 = vpop.f32.mrf.mxu0  ;;  %v7581_v14 = vpop.f32.mrf.mxu1 }
 0x15a   : > { %7738 = vmatprep.subr.bf16.mxu1 %v11149_v2  ;;  %v1320_v0 = vmax.f32 %v1298_v24, 0.0  ;;  %v1270_v25 = vmax.f32 %v1016_v34, %v9362_v39  ;;  %7659 = vmatmul.mubr.msk.bf16.gmra.mxu1 %vm1336_vm5, %v1381_v44  ;;  %v11152_v39 = vmax.f32 %v9263_v32, %v9255_v26 }
 0x15b   : > { %v954_v21 = vpop.f32.mrf.mxu0  ;;  %v1400_v62 = vld [vmem:[#allocation2 + $0x19] sm:$0xff]  ;;  %7662 = vmatprep.mubr.msk.bf16.mxu1 %vm8893_vm2, %v11149_v2  ;;  %7693 = vmatpush3.bf16.msra.mxu0 %v8597_v22  ;;  %v9432_v4 = vpop.f32.mrf.mxu1 }
 0x15c   : > { %1343 = vst.msk [vmem:[#allocation2 + $0x30] sm:$0xff] %vm1336_vm5, %v1320_v0  ;;  %v1299_v48 = vadd.f32 %v9348_v23, %v1270_v25  ;;  %v1017_v60 = vmax.f32 %v11152_v39, %v954_v21  ;;  %v1416_v11 = vpack.c.bf16 %v1400_v62, %v1399_v27  ;;  %7694 = vmatprep.subr.bf16.mxu0 %v11149_v2  ;;  %v1366_v32 = vld [vmem:[#allocation2 + $0x20] sm:$0xff] }
 0x15d   : > { %7739 = vmatpush3.bf16.msra.mxu1 %v8602_v6  ;;  %v7530_v33 = vpop.f32.mrf.mxu0  ;;  %v7584_v1 = vpop.f32.mrf.mxu1  ;;  %v9448_v16 = vld [vmem:[#allocation2 + $0x1a] sm:$0xff]  ;;  %v11154_v21 = vmax.f32 %v9275_v42, %v9267_v36  ;;  %v11155_v42 = vmax.f32 %v9281_v47, %v9273_v41 }
 0x15e   : > { %7740 = vmatprep.subr.bf16.mxu1 %v11149_v2  ;;  %v1321_v49 = vmax.f32 %v1299_v48, 0.0  ;;  %v1271_v58 = vmax.f32 %v1017_v60, %v9369_v35  ;;  %7615 = vmatmul.mubr.msk.bf16.gmra.mxu0 %vm1336_vm5, %v1416_v11  ;;  %v11153_v35 = vmax.f32 %v9269_v37, %v9261_v31 }
 0x15f   : > { %v957_v26 = vpop.f32.mrf.mxu0  ;;  %v1367_v29 = vld [vmem:[#allocation2 + $0x28] sm:$0xff]  ;;  %7618 = vmatprep.mubr.msk.bf16.mxu0 %vm8893_vm2, %v11149_v2  ;;  %7695 = vmatpush3.bf16.msra.mxu0 %v8598_v54  ;;  %v9452_v19 = vpop.f32.mrf.mxu1 }
 0x160   : > { %1344 = vst.msk [vmem:[#allocation2 + $0x38] sm:$0xff] %vm1336_vm5, %v1321_v49  ;;  %v1300_v9 = vadd.f32 %v9348_v23, %v1271_v58  ;;  %v1018_v10 = vmax.f32 %v11153_v35, %v957_v26  ;;  %v1382_v61 = vpack.c.bf16 %v1367_v29, %v1366_v32  ;;  %7696 = vmatprep.subr.bf16.mxu0 %v11149_v2  ;;  %v9450_v22 = vld [vmem:[#allocation2 + $0x22] sm:$0xff] }
 0x161   : > { %7741 = vmatpush3.bf16.msra.mxu1 %v8603_v17  ;;  %v7531_v24 = vpop.f32.mrf.mxu0  ;;  %v2583_v34 = vpack.c.bf16 %v9450_v22, %v9448_v16  ;;  %v1401_v6 = vld [vmem:[#allocation2 + $0x21] sm:$0xff]  ;;  %v7585_v0 = vpop.f32.mrf.mxu1 }
 0x162   : > { %7822 = vmatprep.subr.bf16.mxu1 %v11149_v2  ;;  %v1322_v44 = vmax.f32 %v1300_v9, 0.0  ;;  %v1272_v31 = vmax.f32 %v1018_v10, %v9379_v38  ;;  %7663 = vmatmul.mubr.msk.bf16.gmra.mxu1 %vm1336_vm5, %v1382_v61  ;;  %v11156_v61 = vmax.f32 %v9287_v52, %v9279_v46  ;;  %v11157_v52 = vmax.f32 %v9293_v57, %v9285_v51 }
 0x163   : > { %v962_v37 = vpop.f32.mrf.mxu0  ;;  %v1402_v12 = vld [vmem:[#allocation2 + $0x29] sm:$0xff]  ;;  %7666 = vmatprep.mubr.msk.bf16.mxu1 %vm8893_vm2, %v11149_v2  ;;  %7697 = vmatpush3.bf16.msra.mxu0 %v8600_v7  ;;  %v9467_v14 = vpop.f32.mrf.mxu1 }
 0x164   : > { %1345 = vst.msk [vmem:[#allocation2 + $0x40] sm:$0xff] %vm1336_vm5, %v1322_v44  ;;  %v1301_v25 = vadd.f32 %v9348_v23, %v1272_v31  ;;  %v1019_v27 = vmax.f32 %v11154_v21, %v962_v37  ;;  %v1417_v62 = vpack.c.bf16 %v1402_v12, %v1401_v6  ;;  %7778 = vmatprep.subr.bf16.mxu0 %v11149_v2  ;;  %v1368_v60 = vld [vmem:[#allocation2 + $0x30] sm:$0xff] }
 0x165   : > { %v7534_v38 = vpop.f32.mrf.mxu0  ;;  %v7588_v17 = vpop.f32.mrf.mxu1  ;;  %v9478_v58 = vld [vmem:[#allocation2 + $0x2a] sm:$0xff] }
 0x166   : > { %v1323_v54 = vmax.f32 %v1301_v25, 0.0  ;;  %v1273_v48 = vmax.f32 %v1019_v27, %v9396_v59  ;;  %7619 = vmatmul.mubr.msk.bf16.gmra.mxu0 %vm1336_vm5, %v1417_v62 }
 0x167   : > { %v965_v39 = vpop.f32.mrf.mxu0  ;;  %v1369_v11 = vld [vmem:[#allocation2 + $0x38] sm:$0xff]  ;;  %7622 = vmatprep.mubr.msk.bf16.mxu0 %vm8893_vm2, %v11149_v2  ;;  %v9482_v32 = vpop.f32.mrf.mxu1 }
 0x168   : > { %1346 = vst.msk [vmem:[#allocation2 + $0x48] sm:$0xff] %vm1336_vm5, %v1323_v54  ;;  %v1302_v36 = vadd.f32 %v9348_v23, %v1273_v48  ;;  %v1020_v33 = vmax.f32 %v11155_v42, %v965_v39  ;;  %v1383_v49 = vpack.c.bf16 %v1369_v11, %v1368_v60  ;;  %v9480_v59 = vld [vmem:[#allocation2 + $0x32] sm:$0xff] }
 0x169   : > { %v7535_v26 = vpop.f32.mrf.mxu0  ;;  %v2584_v29 = vpack.c.bf16 %v9480_v59, %v9478_v58  ;;  %v1403_v35 = vld [vmem:[#allocation2 + $0x31] sm:$0xff]  ;;  %v7589_v47 = vpop.f32.mrf.mxu1 }
 0x16a   : > { %v1324_v1 = vmax.f32 %v1302_v36, 0.0  ;;  %v1274_v7 = vmax.f32 %v1020_v33, %v9413_v63  ;;  %7667 = vmatmul.mubr.msk.bf16.gmra.mxu1 %vm1336_vm5, %v1383_v49  ;;  %v11158_v33 = vmax.f32 %v9299_v5, %v9291_v56  ;;  %v11159_v5 = vmax.f32 %v9305_v18, %v9297_v3 }
 0x16b   : > { %v970_v9 = vpop.f32.mrf.mxu0  ;;  %v1404_v41 = vld [vmem:[#allocation2 + $0x39] sm:$0xff]  ;;  %7670 = vmatprep.mubr.msk.bf16.mxu1 %vm8893_vm2, %v11149_v2  ;;  %v9495_v63 = vpop.f32.mrf.mxu1 }
 0x16c   : > { %1347 = vst.msk [vmem:[#allocation2 + $0x50] sm:$0xff] %vm1336_vm5, %v1324_v1  ;;  %v1303_v10 = vadd.f32 %v9348_v23, %v1274_v7  ;;  %v1021_v24 = vmax.f32 %v11156_v61, %v970_v9  ;;  %v1418_v44 = vpack.c.bf16 %v1404_v41, %v1403_v35  ;;  %v1370_v0 = vld [vmem:[#allocation2 + $0x40] sm:$0xff] }
 0x16d   : > { %v7538_v31 = vpop.f32.mrf.mxu0  ;;  %v7592_v21 = vpop.f32.mrf.mxu1  ;;  %v9506_v38 = vld [vmem:[#allocation2 + $0x3a] sm:$0xff] }
 0x16e   : > { %v1325_v37 = vmax.f32 %v1303_v10, 0.0  ;;  %v1275_v6 = vmax.f32 %v1021_v24, %v9432_v4  ;;  %7623 = vmatmul.mubr.msk.bf16.gmra.mxu0 %vm1336_vm5, %v1418_v44 }
 0x16f   : > { %v973_v12 = vpop.f32.mrf.mxu0  ;;  %v1371_v25 = vld [vmem:[#allocation2 + $0x48] sm:$0xff]  ;;  %7626 = vmatprep.mubr.msk.bf16.mxu0 %vm8893_vm2, %v11149_v2  ;;  %v9510_v48 = vpop.f32.mrf.mxu1 }
 0x170   : > { %1348 = vst.msk [vmem:[#allocation2 + $0x58] sm:$0xff] %vm1336_vm5, %v1325_v37  ;;  %v1304_v46 = vadd.f32 %v9348_v23, %v1275_v6  ;;  %v1022_v27 = vmax.f32 %v11157_v52, %v973_v12  ;;  %v1384_v62 = vpack.c.bf16 %v1371_v25, %v1370_v0  ;;  %v9508_v4 = vld [vmem:[#allocation2 + $0x42] sm:$0xff]  ;;  %v11160_v52 = vmax.f32 %v9312_v30, %v9303_v15 }
 0x171   : > { %v7539_v54 = vpop.f32.mrf.mxu0  ;;  %v2585_v39 = vpack.c.bf16 %v9508_v4, %v9506_v38  ;;  %v1405_v36 = vld [vmem:[#allocation2 + $0x41] sm:$0xff]  ;;  %v7593_v57 = vpop.f32.mrf.mxu1  ;;  %v11161_v30 = vmax.f32 %v9318_v43, %v9309_v28 }
 0x172   : > { %v1326_v60 = vmax.f32 %v1304_v46, 0.0  ;;  %v1276_v11 = vmax.f32 %v1022_v27, %v9452_v19  ;;  %7671 = vmatmul.mubr.msk.bf16.gmra.mxu1 %vm1336_vm5, %v1384_v62 }
 0x173   : > { %v978_v17 = vpop.f32.mrf.mxu0  ;;  %v1406_v51 = vld [vmem:[#allocation2 + $0x49] sm:$0xff]  ;;  %7674 = vmatprep.mubr.msk.bf16.mxu1 %vm8893_vm2, %v11149_v2  ;;  %v9523_v19 = vpop.f32.mrf.mxu1 }
 0x174   : > { %1349 = vst.msk [vmem:[#allocation2 + $0x60] sm:$0xff] %vm1336_vm5, %v1326_v60  ;;  %v1305_v42 = vadd.f32 %v9348_v23, %v1276_v11  ;;  %v1023_v49 = vmax.f32 %v11158_v33, %v978_v17  ;;  %v1419_v26 = vpack.c.bf16 %v1406_v51, %v1405_v36  ;;  %v1372_v41 = vld [vmem:[#allocation2 + $0x50] sm:$0xff] }
 0x175   : > { %v7542_v1 = vpop.f32.mrf.mxu0  ;;  %v7596_v10 = vpop.f32.mrf.mxu1  ;;  %v9534_v44 = vld [vmem:[#allocation2 + $0x4a] sm:$0xff] }
 0x176   : > { %v1327_v7 = vmax.f32 %v1305_v42, 0.0  ;;  %v1277_v9 = vmax.f32 %v1023_v49, %v9467_v14  ;;  %7627 = vmatmul.mubr.msk.bf16.gmra.mxu0 %vm1336_vm5, %v1419_v26 }
 0x177   : > { %v981_v35 = vpop.f32.mrf.mxu0  ;;  %v1373_v47 = vld [vmem:[#allocation2 + $0x58] sm:$0xff]  ;;  %7630 = vmatprep.mubr.msk.bf16.mxu0 %vm8893_vm2, %v11149_v2  ;;  %v9538_v37 = vpop.f32.mrf.mxu1 }
 0x178   : > { %1350 = vst.msk [vmem:[#allocation2 + $0x68] sm:$0xff] %vm1336_vm5, %v1327_v7  ;;  %v1306_v56 = vadd.f32 %v9348_v23, %v1277_v9  ;;  %v1024_v61 = vmax.f32 %v11159_v5, %v981_v35  ;;  %v1385_v24 = vpack.c.bf16 %v1373_v47, %v1372_v41  ;;  %v9536_v14 = vld [vmem:[#allocation2 + $0x52] sm:$0xff] }
 0x179   : > { %v7543_v31 = vpop.f32.mrf.mxu0  ;;  %v2586_v6 = vpack.c.bf16 %v9536_v14, %v9534_v44  ;;  %v1407_v21 = vld [vmem:[#allocation2 + $0x51] sm:$0xff]  ;;  %v7597_v18 = vpop.f32.mrf.mxu1 }
 0x17a   : > { %v1328_v12 = vmax.f32 %v1306_v56, 0.0  ;;  %v1278_v0 = vmax.f32 %v1024_v61, %v9482_v32  ;;  %7675 = vmatmul.mubr.msk.bf16.gmra.mxu1 %vm1336_vm5, %v1385_v24  ;;  %v11162_v56 = vmax.f32 %v9324_v55, %v9316_v40  ;;  %v11163_v40 = vmax.f32 %v9330_v20, %v9322_v53 }
 0x17b   : > { %v986_v25 = vpop.f32.mrf.mxu0  ;;  %v1408_v3 = vld [vmem:[#allocation2 + $0x59] sm:$0xff]  ;;  %7678 = vmatprep.mubr.msk.bf16.mxu1 %vm8893_vm2, %v11149_v2  ;;  %v9551_v32 = vpop.f32.mrf.mxu1  ;;  %v11164_v20 = vmax.f32 %v9336_v50, %v9328_v13  ;;  %v11165_v13 = vmax.f32 %v9340_v8, %v9334_v45 }
 0x17c   : > { %1351 = vst.msk [vmem:[#allocation2 + $0x70] sm:$0xff] %vm1336_vm5, %v1328_v12  ;;  %v1307_v46 = vadd.f32 %v9348_v23, %v1278_v0  ;;  %v1025_v27 = vmax.f32 %v11160_v52, %v986_v25  ;;  %v1420_v62 = vpack.c.bf16 %v1408_v3, %v1407_v21  ;;  %v1374_v36 = vld [vmem:[#allocation2 + $0x60] sm:$0xff] }
 0x17d   : > { %v7546_v54 = vpop.f32.mrf.mxu0  ;;  %v7600_v57 = vpop.f32.mrf.mxu1  ;;  %v9562_v49 = vld [vmem:[#allocation2 + $0x5a] sm:$0xff] }
 0x17e   : > { %v1329_v60 = vmax.f32 %v1307_v46, 0.0  ;;  %v1279_v11 = vmax.f32 %v1025_v27, %v9495_v63  ;;  %7631 = vmatmul.mubr.msk.bf16.gmra.mxu0 %vm1336_vm5, %v1420_v62 }
 0x17f   : > { %v989_v17 = vpop.f32.mrf.mxu0  ;;  %v1375_v51 = vld [vmem:[#allocation2 + $0x68] sm:$0xff]  ;;  %7634 = vmatprep.mubr.msk.bf16.mxu0 %vm8893_vm2, %v11149_v2  ;;  %v9566_v1 = vpop.f32.mrf.mxu1 }
 0x180   : > { %1352 = vst.msk [vmem:[#allocation2 + $0x78] sm:$0xff] %vm1336_vm5, %v1329_v60  ;;  %v1308_v15 = vadd.f32 %v9348_v23, %v1279_v11  ;;  %v1026_v42 = vmax.f32 %v11161_v30, %v989_v17  ;;  %v1386_v33 = vpack.c.bf16 %v1375_v51, %v1374_v36  ;;  %v9564_v63 = vld [vmem:[#allocation2 + $0x62] sm:$0xff] }
 0x181   : > { %v7547_v26 = vpop.f32.mrf.mxu0  ;;  %v2587_v7 = vpack.c.bf16 %v9564_v63, %v9562_v49  ;;  %v1409_v47 = vld [vmem:[#allocation2 + $0x61] sm:$0xff]  ;;  %v7601_v43 = vpop.f32.mrf.mxu1 }
 0x182   : > { %v1330_v9 = vmax.f32 %v1308_v15, 0.0  ;;  %v1280_v35 = vmax.f32 %v1026_v42, %v9510_v48  ;;  %7679 = vmatmul.mubr.msk.bf16.gmra.mxu1 %vm1336_vm5, %v1386_v33 }
 0x183   : > { %v994_v41 = vpop.f32.mrf.mxu0  ;;  %v1410_v28 = vld [vmem:[#allocation2 + $0x69] sm:$0xff]  ;;  %7682 = vmatprep.mubr.msk.bf16.mxu1 %vm8893_vm2, %v11149_v2 }
 0x184   : > { %1353 = vst.msk [vmem:[#allocation2 + $0x80] sm:$0xff] %vm1336_vm5, %v1330_v9  ;;  %v1309_v10 = vadd.f32 %v9348_v23, %v1280_v35  ;;  %v1027_v5 = vmax.f32 %v11162_v56, %v994_v41  ;;  %v1421_v61 = vpack.c.bf16 %v1410_v28, %v1409_v47  ;;  %v1376_v0 = vld [vmem:[#allocation2 + $0x70] sm:$0xff] }
 0x185   : > { %v7550_v24 = vpop.f32.mrf.mxu0  ;;  %v9588_v18 = vld [vmem:[#allocation2 + $0x6a] sm:$0xff]  ;;  %v1948_v56 = vld [vmem:[#allocation2 + $0x15] sm:$0xff] }
 0x186   : > { %v1331_v48 = vmax.f32 %v1309_v10, 0.0  ;;  %v1281_v31 = vmax.f32 %v1027_v5, %v9523_v19  ;;  %7635 = vmatmul.mubr.msk.bf16.gmra.mxu0 %vm1336_vm5, %v1421_v61  ;;  %v1947_v61 = vld [vmem:[#allocation2 + $0xd] sm:$0xff] }
 0x187   : > { %v997_v12 = vpop.f32.mrf.mxu0  ;;  %v1377_v25 = vld [vmem:[#allocation2 + $0x78] sm:$0xff]  ;;  %7638 = vmatprep.mubr.msk.bf16.mxu0 %vm8893_vm2, %v11149_v2  ;;  %v1965_v24 = vpack.c.bf16 %v1948_v56, %v1947_v61 }
 0x188   : > { %1354 = vst.msk [vmem:[#allocation2 + $0x88] sm:$0xff] %vm1336_vm5, %v1331_v48  ;;  %v1310_v21 = vadd.f32 %v9348_v23, %v1281_v31  ;;  %v1028_v55 = vmax.f32 %v11163_v40, %v997_v12  ;;  %v1387_v3 = vpack.c.bf16 %v1377_v25, %v1376_v0  ;;  %v9590_v19 = vld [vmem:[#allocation2 + $0x72] sm:$0xff]  ;;  %v1742_v48 = vld [vmem:[#allocation2 + $0xa] sm:$0xff] }
 0x189   : > { %v7551_v46 = vpop.f32.mrf.mxu0  ;;  %v2588_v52 = vpack.c.bf16 %v9590_v19, %v9588_v18  ;;  %v1411_v60 = vld [vmem:[#allocation2 + $0x71] sm:$0xff]  ;;  %v1950_v25 = vld [vmem:[#allocation2 + $0x25] sm:$0xff] }
 0x18a   : > { %v1332_v27 = vmax.f32 %v1310_v21, 0.0  ;;  %v1282_v62 = vmax.f32 %v1028_v55, %v9538_v37  ;;  %7683 = vmatmul.mubr.msk.bf16.gmra.mxu1 %vm1336_vm5, %v1387_v3  ;;  %v8604_v31 = vld [vmem:[%s11138_s3 + $0x98] sm:$0xff]   ;;  %v8609_v0 = vld [vmem:[%s11138_s3 + $0xb0] sm:$0xff]   ;;  %v8610_v3 = vld [vmem:[%s11138_s3 + $0xa8] sm:$0xff]  }
 0x18b   : > { %v1002_v54 = vpop.f32.mrf.mxu0  ;;  %v1412_v11 = vld [vmem:[#allocation2 + $0x79] sm:$0xff]  ;;  %7686 = vmatprep.mubr.msk.bf16.mxu1 %vm8893_vm2, %v11149_v2  ;;  %v8605_v40 = vld [vmem:[%s11138_s3 + $0x90] sm:$0xff]  }
 0x18c   : > { %1355 = vst.msk [vmem:[#allocation2 + $0x90] sm:$0xff] %vm1336_vm5, %v1332_v27  ;;  %v1311_v53 = vadd.f32 %v9348_v23, %v1282_v62  ;;  %v1029_v17 = vmax.f32 %v11164_v20, %v1002_v54  ;;  %v1422_v36 = vpack.c.bf16 %v1412_v11, %v1411_v60  ;;  %v1378_v30 = vld [vmem:[#allocation2 + $0x80] sm:$0xff]  ;;  %v1743_v46 = vld [vmem:[#allocation2 + $0x12] sm:$0xff]  ;;  %v8606_v27 = vld [vmem:[%s11138_s3 + $0x88] sm:$0xff]  }
 0x18d   : > { %v7554_v51 = vpop.f32.mrf.mxu0  ;;  %v9612_v9 = vld [vmem:[#allocation2 + $0x7a] sm:$0xff]  ;;  %v1760_v62 = vpack.c.bf16 %v9448_v16, %v1743_v46  ;;  %v1951_v11 = vld [vmem:[#allocation2 + $0x2d] sm:$0xff] }
 0x18e   : > { %v1333_v57 = vmax.f32 %v1311_v53, 0.0  ;;  %v1283_v37 = vmax.f32 %v1029_v17, %v9551_v32  ;;  %7639 = vmatmul.mubr.msk.bf16.gmra.mxu0 %vm1336_vm5, %v1422_v36  ;;  %v1949_v21 = vld [vmem:[#allocation2 + $0x1d] sm:$0xff]  ;;  %v1952_v60 = vld [vmem:[#allocation2 + $0x35] sm:$0xff]  ;;  %v1761_v17 = vpack.c.bf16 %v9478_v58, %v9450_v22  ;;  %v1954_v36 = vld [vmem:[#allocation2 + $0x45] sm:$0xff] }
 0x18f   : > { %v1005_v15 = vpop.f32.mrf.mxu0  ;;  %v1379_v42 = vld [vmem:[#allocation2 + $0x88] sm:$0x7f]  ;;  %7642 = vmatprep.mubr.msk.bf16.mxu0 %vm8893_vm2, %v11149_v2  ;;  %v1966_v55 = vpack.c.bf16 %v1950_v25, %v1949_v21  ;;  %v8611_v54 = vld [vmem:[%s11138_s3 + $0xa0] sm:$0xff]   ;;  %v1967_v20 = vpack.c.bf16 %v1952_v60, %v1951_v11  ;;  %v2154_v21 = vld [vmem:[#allocation2 + $0x16] sm:$0xff] }
 0x190   : > { %1356 = vst.msk [vmem:[#allocation2 + $0x98] sm:$0xff] %vm1336_vm5, %v1333_v57  ;;  %v1312_v33 = vadd.f32 %v9348_v23, %v1283_v37  ;;  %v1030_v50 = vmax.f32 %v11165_v13, %v1005_v15  ;;  %v1388_v26 = vpack.c.bf16 %v1379_v42, %v1378_v30  ;;  %v9614_v32 = vld [vmem:[#allocation2 + $0x82] sm:$0xff]  ;;  %v1762_v37 = vpack.c.bf16 %v9506_v38, %v9480_v59  ;;  %v1956_v15 = vld [vmem:[#allocation2 + $0x55] sm:$0xff]  ;;  %v1955_v30 = vld [vmem:[#allocation2 + $0x4d] sm:$0xff] }
 0x191   : > { %v1413_v35 = vld [vmem:[#allocation2 + $0x81] sm:$0xff]  ;;  %v1414_v41 = vld [vmem:[#allocation2 + $0x89] sm:$0x7f]  ;;  %v7555_v47 = vpop.f32.mrf.mxu0  ;;  %v2589_v28 = vpack.c.bf16 %v9614_v32, %v9612_v9  ;;  %v1969_v42 = vpack.c.bf16 %v1956_v15, %v1955_v30  ;;  %v8617_v46 = vld [vmem:[%s11138_s3 + $0xf0] sm:$0xff]  }
 0x192   : > { %v1334_v43 = vmax.f32 %v1312_v33, 0.0  ;;  %v1284_v10 = vmax.f32 %v1030_v50, %v9566_v1  ;;  %7687 = vmatmul.mubr.msk.bf16.gmra.mxu1 %vm1336_vm5, %v1388_v26  ;;  %v1423_v8 = vpack.c.bf16 %v1414_v41, %v1413_v35  ;;  %v8607_v1 = vld [vmem:[%s11138_s3 + $0xb8] sm:$0xff]   ;;  %v8608_v53 = vld [vmem:[%s11138_s3 + $0x80] sm:$0xff]   ;;  %v1763_v33 = vpack.c.bf16 %v9534_v44, %v9508_v4  ;;  %v1959_v47 = vld [vmem:[#allocation2 + $0x6d] sm:$0xff] }
 0x193   : > { %7742 = vmatprep.mubr.msk.bf16.mxu1 %vm8893_vm2, %v11149_v2  ;;  %v1953_v51 = vld [vmem:[#allocation2 + $0x3d] sm:$0xff]  ;;  %v1958_v13 = vld [vmem:[#allocation2 + $0x65] sm:$0xff]  ;;  %v1764_v35 = vpack.c.bf16 %v9562_v49, %v9536_v14  ;;  %v1960_v41 = vld [vmem:[#allocation2 + $0x75] sm:$0xff] }
 0x194   : > { %1357 = vst.msk [vmem:[#allocation2 + $0xa0] sm:$0xff] %vm1336_vm5, %v1334_v43  ;;  %v1313_v45 = vadd.f32 %v9348_v23, %v1284_v10  ;;  %v1741_v23 = vld [vmem:[#allocation2 + $0x2] sm:$0xff]  ;;  %v1968_v57 = vpack.c.bf16 %v1954_v36, %v1953_v51  ;;  %v1971_v43 = vpack.c.bf16 %v1960_v41, %v1959_v47  ;;  %v1765_v10 = vpack.c.bf16 %v9588_v18, %v9564_v63 }
 0x195   : > { %v1759_v12 = vpack.c.bf16 %v1742_v48, %v1741_v23  ;;  %v1957_v50 = vld [vmem:[#allocation2 + $0x5d] sm:$0xff]  ;;  %v1758_v48 = vld [vmem:[#allocation2 + $0x8a] sm:$0x7f] }
 0x196   : > { %v1335_v5 = vmax.f32 %v1313_v45, 0.0  ;;  %7643 = vmatmul.mubr.msk.bf16.gmra.mxu0 %vm1336_vm5, %v1423_v8  ;;  %v1970_v26 = vpack.c.bf16 %v1958_v13, %v1957_v50  ;;  %v1962_v45 = vld [vmem:[#allocation2 + $0x85] sm:$0xff]  ;;  %v1961_v8 = vld [vmem:[#allocation2 + $0x7d] sm:$0xff]  ;;  %v1767_v23 = vpack.c.bf16 %v1758_v48, %v9614_v32 }
 0x197   : > { %7698 = vmatprep.mubr.msk.bf16.mxu0 %vm8893_vm2, %v11149_v2  ;;  %v1972_v56 = vpack.c.bf16 %v1962_v45, %v1961_v8  ;;  %v1964_v61 = vld [vmem:[#allocation2 + $0x95] sm:$0x7f]  ;;  %v8618_v11 = vld [vmem:[%s11138_s3 + $0xe8] sm:$0xff]   ;;  %v8619_v51 = vld [vmem:[%s11138_s3 + $0xe0] sm:$0xff]  }
 0x198   : > { %1359 = vst.msk [vmem:[#allocation2 + $0xa8] sm:$0x1] %vm1358_vm6, %v1335_v5  ;;  %v1766_v5 = vpack.c.bf16 %v9612_v9, %v9590_v19  ;;  %v8616_v15 = vld [vmem:[%s11138_s3 + $0xc0] sm:$0xff]   ;;  %v2367_v45 = vld [vmem:[#allocation2 + $0x4f] sm:$0xff] }
 0x199   : > { %v2366_v50 = vld [vmem:[#allocation2 + $0x47] sm:$0xff]  ;;  %v2159_v47 = vld [vmem:[#allocation2 + $0x3e] sm:$0xff] }
 0x19a   : > { %7743 = vmatmul.mubr.msk.bf16.vlgmr.msra.gmra.mxu1 %vm1336_vm5, %v1965_v24  ;;  %v2160_v41 = vld [vmem:[#allocation2 + $0x46] sm:$0xff] }
 0x19b   : > { %7746 = vmatprep.mubr.msk.bf16.mxu1 %vm8893_vm2, %v11149_v2  ;;  %7823 = vmatpush3.bf16.msra.mxu1 %v8607_v1  ;;  %v1963_v1 = vld [vmem:[#allocation2 + $0x8d] sm:$0xff] }
 0x19c   : > { %7824 = vmatprep.subr.bf16.mxu1 %v11149_v2  ;;  %v1973_v24 = vpack.c.bf16 %v1964_v61, %v1963_v1  ;;  %v2370_v1 = vld [vmem:[#allocation2 + $0x67] sm:$0xff] }
 0x19d   : > { %v2579_v32 = vld [vmem:[#allocation2 + $0x8a] sm:$0xff] }
 0x19e   : > { %7699 = vmatmul.mubr.msk.bf16.vlgmr.msra.gmra.mxu0 %vm1336_vm5, %v1759_v12  ;;  %v2359_v12 = vld [vmem:[#allocation2 + $0xf] sm:$0xff] }
 0x19f   : > { %7779 = vmatpush3.bf16.msra.mxu0 %v8604_v31  ;;  %7702 = vmatprep.mubr.msk.bf16.mxu0 %vm8893_vm2, %v11149_v2  ;;  %v2360_v31 = vld [vmem:[#allocation2 + $0x17] sm:$0xff] }
 0x1a0   : > { %7780 = vmatprep.subr.bf16.mxu0 %v11149_v2  ;;  %7825 = vmatpush3.bf16.msra.mxu1 %v8609_v0  ;;  %v8615_v0 = vld [vmem:[%s11138_s3 + $0xf8] sm:$0xff]   ;;  %v2377_v25 = vpack.c.bf16 %v2360_v31, %v2359_v12 }
 0x1a1   : > { %7826 = vmatprep.subr.bf16.mxu1 %v11149_v2  ;;  %v2163_v31 = vld [vmem:[#allocation2 + $0x5e] sm:$0xff] }
 0x1a2   : > { %7747 = vmatmul.mubr.msk.bf16.gmra.mxu1 %vm1336_vm5, %v1966_v55  ;;  %v8612_v55 = vld [vmem:[%s11138_s3 + $0xd8] sm:$0xff]  }
 0x1a3   : > { %7750 = vmatprep.mubr.msk.bf16.mxu1 %vm8893_vm2, %v11149_v2  ;;  %7781 = vmatpush3.bf16.msra.mxu0 %v8605_v40  ;;  %v2153_v40 = vld [vmem:[#allocation2 + $0xe] sm:$0xff] }
 0x1a4   : > { %7782 = vmatprep.subr.bf16.mxu0 %v11149_v2  ;;  %7827 = vmatpush3.bf16.msra.mxu1 %v8610_v3  ;;  %v2171_v3 = vpack.c.bf16 %v2154_v21, %v2153_v40  ;;  %v2166_v40 = vld [vmem:[#allocation2 + $0x76] sm:$0xff] }
 0x1a5   : > { %7828 = vmatprep.subr.bf16.mxu1 %v11149_v2 }
 0x1a6   : > { %7703 = vmatmul.mubr.msk.bf16.gmra.mxu0 %vm1336_vm5, %v1760_v62  ;;  %v2361_v62 = vld [vmem:[#allocation2 + $0x1f] sm:$0xff] }
 0x1a7   : > { %7706 = vmatprep.mubr.msk.bf16.mxu0 %vm8893_vm2, %v11149_v2  ;;  %7783 = vmatpush3.bf16.msra.mxu0 %v8606_v27  ;;  %v2362_v27 = vld [vmem:[#allocation2 + $0x27] sm:$0xff] }
 0x1a8   : > { %7784 = vmatprep.subr.bf16.mxu0 %v11149_v2  ;;  %7829 = vmatpush3.bf16.msra.mxu1 %v8611_v54  ;;  %v8613_v54 = vld [vmem:[%s11138_s3 + $0xd0] sm:$0xff]   ;;  %v2378_v60 = vpack.c.bf16 %v2362_v27, %v2361_v62  ;;  %v2374_v62 = vld [vmem:[#allocation2 + $0x87] sm:$0xff] }
 0x1a9   : > { %7910 = vmatprep.subr.bf16.mxu1 %v11149_v2 }
 0x1aa   : > { %7751 = vmatmul.mubr.msk.bf16.gmra.mxu1 %vm1336_vm5, %v1967_v20  ;;  %v2155_v20 = vld [vmem:[#allocation2 + $0x1e] sm:$0xff] }
 0x1ab   : > { %7754 = vmatprep.mubr.msk.bf16.mxu1 %vm8893_vm2, %v11149_v2  ;;  %7785 = vmatpush3.bf16.msra.mxu0 %v8608_v53  ;;  %v2156_v53 = vld [vmem:[#allocation2 + $0x26] sm:$0xff] }
 0x1ac   : > { %7866 = vmatprep.subr.bf16.mxu0 %v11149_v2  ;;  %v2172_v36 = vpack.c.bf16 %v2156_v53, %v2155_v20  ;;  %v2373_v53 = vld [vmem:[#allocation2 + $0x7f] sm:$0xff] }
 0x1ae   : > { %7707 = vmatmul.mubr.msk.bf16.gmra.mxu0 %vm1336_vm5, %v1761_v17  ;;  %v8614_v17 = vld [vmem:[%s11138_s3 + $0xc8] sm:$0xff]  }
 0x1af   : > { %7710 = vmatprep.mubr.msk.bf16.mxu0 %vm8893_vm2, %v11149_v2 }
 0x1b2   : > { %7755 = vmatmul.mubr.msk.bf16.gmra.mxu1 %vm1336_vm5, %v1968_v57  ;;  %v2364_v57 = vld [vmem:[#allocation2 + $0x37] sm:$0xff] }
 0x1b3   : > { %7758 = vmatprep.mubr.msk.bf16.mxu1 %vm8893_vm2, %v11149_v2 }
 0x1b6   : > { %7711 = vmatmul.mubr.msk.bf16.gmra.mxu0 %vm1336_vm5, %v1762_v37  ;;  %v2363_v37 = vld [vmem:[#allocation2 + $0x2f] sm:$0xff] }
 0x1b7   : > { %7714 = vmatprep.mubr.msk.bf16.mxu0 %vm8893_vm2, %v11149_v2  ;;  %v2379_v30 = vpack.c.bf16 %v2364_v57, %v2363_v37 }
 0x1ba   : > { %7759 = vmatmul.mubr.msk.bf16.gmra.mxu1 %vm1336_vm5, %v1969_v42  ;;  %v2158_v42 = vld [vmem:[#allocation2 + $0x36] sm:$0xff] }
 0x1bb   : > { %7762 = vmatprep.mubr.msk.bf16.mxu1 %vm8893_vm2, %v11149_v2 }
 0x1be   : > { %7715 = vmatmul.mubr.msk.bf16.gmra.mxu0 %vm1336_vm5, %v1763_v33  ;;  %v2157_v33 = vld [vmem:[#allocation2 + $0x2e] sm:$0xff] }
 0x1bf   : > { %7718 = vmatprep.mubr.msk.bf16.mxu0 %vm8893_vm2, %v11149_v2  ;;  %v2173_v13 = vpack.c.bf16 %v2158_v42, %v2157_v33 }
 0x1c2   : > { %7763 = vmatmul.mubr.msk.bf16.gmra.mxu1 %vm1336_vm5, %v1970_v26  ;;  %v2365_v26 = vld [vmem:[#allocation2 + $0x3f] sm:$0xff] }
 0x1c3   : > { %7766 = vmatprep.mubr.msk.bf16.mxu1 %vm8893_vm2, %v11149_v2 }
 0x1c6   : > { %7719 = vmatmul.mubr.msk.bf16.gmra.mxu0 %vm1336_vm5, %v1764_v35  ;;  %v2380_v35 = vpack.c.bf16 %v2366_v50, %v2365_v26  ;;  %v2376_v50 = vld [vmem:[#allocation2 + $0x97] sm:$0x7f] }
 0x1c7   : > { %7722 = vmatprep.mubr.msk.bf16.mxu0 %vm8893_vm2, %v11149_v2 }
 0x1ca   : > { %7767 = vmatmul.mubr.msk.bf16.gmra.mxu1 %vm1336_vm5, %v1971_v43  ;;  %v2174_v43 = vpack.c.bf16 %v2160_v41, %v2159_v47  ;;  %v2375_v47 = vld [vmem:[#allocation2 + $0x8f] sm:$0xff] }
 0x1cb   : > { %7770 = vmatprep.mubr.msk.bf16.mxu1 %vm8893_vm2, %v11149_v2 }
 0x1ce   : > { %7723 = vmatmul.mubr.msk.bf16.gmra.mxu0 %vm1336_vm5, %v1765_v10  ;;  %v2368_v10 = vld [vmem:[#allocation2 + $0x57] sm:$0xff] }
 0x1cf   : > { %7726 = vmatprep.mubr.msk.bf16.mxu0 %vm8893_vm2, %v11149_v2  ;;  %v2381_v8 = vpack.c.bf16 %v2368_v10, %v2367_v45  ;;  %v2385_v45 = vpack.c.bf16 %v2376_v50, %v2375_v47 }
 0x1d2   : > { %7771 = vmatmul.mubr.msk.bf16.gmra.mxu1 %vm1336_vm5, %v1972_v56  ;;  %v2162_v56 = vld [vmem:[#allocation2 + $0x56] sm:$0xff] }
 0x1d3   : > { %7774 = vmatprep.mubr.msk.bf16.mxu1 %vm8893_vm2, %v11149_v2 }
 0x1d6   : > { %7727 = vmatmul.mubr.msk.bf16.gmra.mxu0 %vm1336_vm5, %v1766_v5  ;;  %v2161_v5 = vld [vmem:[#allocation2 + $0x4e] sm:$0xff] }
 0x1d7   : > { %7730 = vmatprep.mubr.msk.bf16.mxu0 %vm8893_vm2, %v11149_v2  ;;  %v2175_v61 = vpack.c.bf16 %v2162_v56, %v2161_v5 }
 0x1da   : > { %7775 = vmatmul.mubr.msk.bf16.gmra.mxu1 %vm1336_vm5, %v1973_v24  ;;  %v2369_v24 = vld [vmem:[#allocation2 + $0x5f] sm:$0xff] }
 0x1db   : > { %7830 = vmatprep.mubr.msk.bf16.mxu1 %vm8893_vm2, %v11149_v2  ;;  %v2382_v48 = vpack.c.bf16 %v2370_v1, %v2369_v24  ;;  %v2169_v1 = vld [vmem:[#allocation2 + $0x8e] sm:$0xff] }
 0x1de   : > { %7731 = vmatmul.mubr.msk.bf16.gmra.mxu0 %vm1336_vm5, %v1767_v23  ;;  %v2164_v23 = vld [vmem:[#allocation2 + $0x66] sm:$0xff] }
 0x1df   : > { %7786 = vmatprep.mubr.msk.bf16.mxu0 %vm8893_vm2, %v11149_v2  ;;  %v2176_v12 = vpack.c.bf16 %v2164_v23, %v2163_v31  ;;  %v2772_v31 = vld [vmem:[#allocation2 + $0x23] sm:$0xff] }
 0x1e2   : > { %7831 = vmatmul.mubr.msk.bf16.vlgmr.msra.gmra.mxu1 %vm1336_vm5, %v2377_v25  ;;  %v2371_v25 = vld [vmem:[#allocation2 + $0x6f] sm:$0xff] }
 0x1e3   : > { %7834 = vmatprep.mubr.msk.bf16.mxu1 %vm8893_vm2, %v11149_v2  ;;  %7911 = vmatpush3.bf16.msra.mxu1 %v8615_v0  ;;  %v2372_v0 = vld [vmem:[#allocation2 + $0x77] sm:$0xff] }
 0x1e4   : > { %7912 = vmatprep.subr.bf16.mxu1 %v11149_v2  ;;  %v2383_v21 = vpack.c.bf16 %v2372_v0, %v2371_v25 }
 0x1e6   : > { %7787 = vmatmul.mubr.msk.bf16.vlgmr.msra.gmra.mxu0 %vm1336_vm5, %v2171_v3  ;;  %v2165_v3 = vld [vmem:[#allocation2 + $0x6e] sm:$0xff] }
 0x1e7   : > { %7867 = vmatpush3.bf16.msra.mxu0 %v8612_v55  ;;  %7790 = vmatprep.mubr.msk.bf16.mxu0 %vm8893_vm2, %v11149_v2  ;;  %v2177_v27 = vpack.c.bf16 %v2166_v40, %v2165_v3 }
 0x1e8   : > { %7868 = vmatprep.subr.bf16.mxu0 %v11149_v2  ;;  %7913 = vmatpush3.bf16.msra.mxu1 %v8617_v46 }
 0x1e9   : > { %7914 = vmatprep.subr.bf16.mxu1 %v11149_v2 }
 0x1ea   : > { %7835 = vmatmul.mubr.msk.bf16.gmra.mxu1 %vm1336_vm5, %v2378_v60 }
 0x1eb   : > { %7838 = vmatprep.mubr.msk.bf16.mxu1 %vm8893_vm2, %v11149_v2  ;;  %7869 = vmatpush3.bf16.msra.mxu0 %v8613_v54 }
 0x1ec   : > { %7870 = vmatprep.subr.bf16.mxu0 %v11149_v2  ;;  %7915 = vmatpush3.bf16.msra.mxu1 %v8618_v11 }
 0x1ed   : > { %7916 = vmatprep.subr.bf16.mxu1 %v11149_v2 }
 0x1ee   : > { %7791 = vmatmul.mubr.msk.bf16.gmra.mxu0 %vm1336_vm5, %v2172_v36  ;;  %v2384_v36 = vpack.c.bf16 %v2374_v62, %v2373_v53 }
 0x1ef   : > { %7794 = vmatprep.mubr.msk.bf16.mxu0 %vm8893_vm2, %v11149_v2  ;;  %7871 = vmatpush3.bf16.msra.mxu0 %v8614_v17 }
 0x1f0   : > { %7872 = vmatprep.subr.bf16.mxu0 %v11149_v2  ;;  %7917 = vmatpush3.bf16.msra.mxu1 %v8619_v51  ;;  %v2168_v51 = vld [vmem:[#allocation2 + $0x86] sm:$0xff] }
 0x1f1   : > { %7998 = vmatprep.subr.bf16.mxu1 %v11149_v2 }
 0x1f2   : > { %7839 = vmatmul.mubr.msk.bf16.gmra.mxu1 %vm1336_vm5, %v2379_v30  ;;  %v2167_v30 = vld [vmem:[#allocation2 + $0x7e] sm:$0xff] }
 0x1f3   : > { %7842 = vmatprep.mubr.msk.bf16.mxu1 %vm8893_vm2, %v11149_v2  ;;  %7873 = vmatpush3.bf16.msra.mxu0 %v8616_v15 }
 0x1f4   : > { %7954 = vmatprep.subr.bf16.mxu0 %v11149_v2 }
 0x1f6   : > { %7795 = vmatmul.mubr.msk.bf16.gmra.mxu0 %vm1336_vm5, %v2173_v13  ;;  %v2178_v13 = vpack.c.bf16 %v2168_v51, %v2167_v30 }
 0x1f7   : > { %7798 = vmatprep.mubr.msk.bf16.mxu0 %vm8893_vm2, %v11149_v2 }
 0x1fa   : > { %7843 = vmatmul.mubr.msk.bf16.gmra.mxu1 %vm1336_vm5, %v2380_v35 }
 0x1fb   : > { %7846 = vmatprep.mubr.msk.bf16.mxu1 %vm8893_vm2, %v11149_v2 }
 0x1fe   : > { %7799 = vmatmul.mubr.msk.bf16.gmra.mxu0 %vm1336_vm5, %v2174_v43 }
 0x1ff   : > { %7802 = vmatprep.mubr.msk.bf16.mxu0 %vm8893_vm2, %v11149_v2 }
 0x202   : > { %7847 = vmatmul.mubr.msk.bf16.gmra.mxu1 %vm1336_vm5, %v2381_v8  ;;  %v2170_v8 = vld [vmem:[#allocation2 + $0x96] sm:$0x7f] }
 0x203   : > { %7850 = vmatprep.mubr.msk.bf16.mxu1 %vm8893_vm2, %v11149_v2  ;;  %v2179_v23 = vpack.c.bf16 %v2170_v8, %v2169_v1  ;;  %v8623_v8 = vld [vmem:[%s11138_s3 + $0x100] sm:$0xff]  }
 0x206   : > { %7803 = vmatmul.mubr.msk.bf16.gmra.mxu0 %vm1336_vm5, %v2175_v61 }
 0x207   : > { %7806 = vmatprep.mubr.msk.bf16.mxu0 %vm8893_vm2, %v11149_v2 }
 0x20a   : > { %7851 = vmatmul.mubr.msk.bf16.gmra.mxu1 %vm1336_vm5, %v2382_v48 }
 0x20b   : > { %7854 = vmatprep.mubr.msk.bf16.mxu1 %vm8893_vm2, %v11149_v2 }
 0x20e   : > { %7807 = vmatmul.mubr.msk.bf16.gmra.mxu0 %vm1336_vm5, %v2176_v12 }
 0x20f   : > { %7810 = vmatprep.mubr.msk.bf16.mxu0 %vm8893_vm2, %v11149_v2 }
 0x212   : > { %v1672_v55 = vpop.f32.mrf.mxu1  ;;  %7855 = vmatmul.mubr.msk.bf16.gmra.mxu1 %vm1336_vm5, %v2383_v21  ;;  %v2771_v21 = vld [vmem:[#allocation2 + $0x1b] sm:$0xff] }
 0x213   : > { %7858 = vmatprep.mubr.msk.bf16.mxu1 %vm8893_vm2, %v11149_v2  ;;  %v2789_v3 = vpack.c.bf16 %v2772_v31, %v2771_v21  ;;  %v2777_v21 = vld [vmem:[#allocation2 + $0x4b] sm:$0xff] }
 0x214   : > { %v7656_v46 = vpop.f32.mrf.mxu1 }
 0x216   : > { %v1518_v54 = vpop.f32.mrf.mxu0  ;;  %v1675_v60 = vpop.f32.mrf.mxu1  ;;  %7811 = vmatmul.mubr.msk.bf16.gmra.mxu0 %vm1336_vm5, %v2177_v27 }
 0x217   : > { %v9799_v11 = vadd.f32 %v1672_v55, %v1518_v54  ;;  %7814 = vmatprep.mubr.msk.bf16.mxu0 %vm8893_vm2, %v11149_v2  ;;  %v8620_v54 = vld [vmem:[%s11138_s3 + $0x118] sm:$0xff]  }
 0x218   : > { %v7612_v20 = vpop.f32.mrf.mxu0  ;;  %v7657_v17 = vpop.f32.mrf.mxu1 }
 0x219   : > { %v2774_v20 = vld [vmem:[#allocation2 + $0x33] sm:$0xff] }
 0x21a   : > { %v1521_v57 = vpop.f32.mrf.mxu0  ;;  %v1680_v37 = vpop.f32.mrf.mxu1  ;;  %7859 = vmatmul.mubr.msk.bf16.gmra.mxu1 %vm1336_vm5, %v2384_v36 }
 0x21b   : > { %v9804_v15 = vadd.f32 %v1675_v60, %v1521_v57  ;;  %7862 = vmatprep.mubr.msk.bf16.mxu1 %vm8893_vm2, %v11149_v2  ;;  %v2773_v57 = vld [vmem:[#allocation2 + $0x2b] sm:$0xff] }
 0x21c   : > { %v7613_v42 = vpop.f32.mrf.mxu0  ;;  %v7660_v33 = vpop.f32.mrf.mxu1 }
 0x21d   : > { %v2790_v33 = vpack.c.bf16 %v2774_v20, %v2773_v57 }
 0x21e   : > { %v1526_v26 = vpop.f32.mrf.mxu0  ;;  %v1683_v35 = vpop.f32.mrf.mxu1  ;;  %7815 = vmatmul.mubr.msk.bf16.gmra.mxu0 %vm1336_vm5, %v2178_v13 }
 0x21f   : > { %v9809_v41 = vadd.f32 %v1680_v37, %v1526_v26  ;;  %7818 = vmatprep.mubr.msk.bf16.mxu0 %vm8893_vm2, %v11149_v2  ;;  %v8621_v37 = vld [vmem:[%s11138_s3 + $0x110] sm:$0xff]  }
 0x220   : > { %v7616_v43 = vpop.f32.mrf.mxu0  ;;  %v7661_v10 = vpop.f32.mrf.mxu1 }
 0x222   : > { %v1529_v56 = vpop.f32.mrf.mxu0  ;;  %v1688_v5 = vpop.f32.mrf.mxu1  ;;  %7863 = vmatmul.mubr.msk.bf16.gmra.mxu1 %vm1336_vm5, %v2385_v45  ;;  %v2775_v45 = vld [vmem:[#allocation2 + $0x3b] sm:$0xff] }
 0x223   : > { %v9814_v61 = vadd.f32 %v1683_v35, %v1529_v56  ;;  %7918 = vmatprep.mubr.msk.bf16.mxu1 %vm8893_vm2, %v11149_v2  ;;  %v2776_v35 = vld [vmem:[#allocation2 + $0x43] sm:$0xff] }
 0x224   : > { %v7617_v24 = vpop.f32.mrf.mxu0  ;;  %v7664_v48 = vpop.f32.mrf.mxu1  ;;  %v2791_v1 = vpack.c.bf16 %v2776_v35, %v2775_v45 }
 0x226   : > { %v1534_v12 = vpop.f32.mrf.mxu0  ;;  %v1691_v0 = vpop.f32.mrf.mxu1  ;;  %7819 = vmatmul.mubr.msk.bf16.gmra.mxu0 %vm1336_vm5, %v2179_v23  ;;  %v2778_v23 = vld [vmem:[#allocation2 + $0x53] sm:$0xff] }
 0x227   : > { %v9819_v25 = vadd.f32 %v1688_v5, %v1534_v12  ;;  %7874 = vmatprep.mubr.msk.bf16.mxu0 %vm8893_vm2, %v11149_v2 }
 0x228   : > { %v7620_v40 = vpop.f32.mrf.mxu0  ;;  %v7665_v55 = vpop.f32.mrf.mxu1 }
 0x22a   : > { %v1537_v46 = vpop.f32.mrf.mxu0  ;;  %v1696_v27 = vpop.f32.mrf.mxu1  ;;  %7919 = vmatmul.mubr.msk.bf16.vlgmr.msra.gmra.mxu1 %vm1336_vm5, %v2789_v3  ;;  %v2792_v3 = vpack.c.bf16 %v2778_v23, %v2777_v21  ;;  %v2786_v21 = vld [vmem:[#allocation2 + $0x93] sm:$0xff] }
 0x22b   : > { %v9824_v62 = vadd.f32 %v1691_v0, %v1537_v46  ;;  %7922 = vmatprep.mubr.msk.bf16.mxu1 %vm8893_vm2, %v11149_v2 }
 0x22c   : > { %v7621_v60 = vpop.f32.mrf.mxu0  ;;  %v7668_v53 = vpop.f32.mrf.mxu1 }
 0x22e   : > { %v1542_v17 = vpop.f32.mrf.mxu0  ;;  %v1699_v36 = vpop.f32.mrf.mxu1  ;;  %7875 = vmatmul.mubr.msk.bf16.vlgmr.msra.gmra.mxu0 %vm1336_vm5, %v2583_v34  ;;  %v8622_v34 = vld [vmem:[%s11138_s3 + $0x108] sm:$0xff]  }
 0x22f   : > { %v9835_v51 = vadd.f32 %v1696_v27, %v1542_v17  ;;  %7955 = vmatpush3.bf16.msra.mxu0 %v8620_v54  ;;  %7878 = vmatprep.mubr.msk.bf16.mxu0 %vm8893_vm2, %v11149_v2  ;;  %v2779_v17 = vld [vmem:[#allocation2 + $0x5b] sm:$0xff] }
 0x230   : > { %v7624_v30 = vpop.f32.mrf.mxu0  ;;  %v7669_v42 = vpop.f32.mrf.mxu1  ;;  %7956 = vmatprep.subr.bf16.mxu0 %v11149_v2 }
 0x232   : > { %v1545_v13 = vpop.f32.mrf.mxu0  ;;  %v1704_v16 = vpop.f32.mrf.mxu1  ;;  %7923 = vmatmul.mubr.msk.bf16.gmra.mxu1 %vm1336_vm5, %v2790_v33 }
 0x233   : > { %v9844_v22 = vadd.f32 %v1699_v36, %v1545_v13  ;;  %7926 = vmatprep.mubr.msk.bf16.mxu1 %vm8893_vm2, %v11149_v2  ;;  %7957 = vmatpush3.bf16.msra.mxu0 %v8621_v37 }
 0x234   : > { %v7625_v50 = vpop.f32.mrf.mxu0  ;;  %v7672_v26 = vpop.f32.mrf.mxu1  ;;  %7958 = vmatprep.subr.bf16.mxu0 %v11149_v2 }
 0x235   : > { %v2781_v50 = vld [vmem:[#allocation2 + $0x6b] sm:$0xff] }
 0x236   : > { %v1550_v47 = vpop.f32.mrf.mxu0  ;;  %v1707_v43 = vpop.f32.mrf.mxu1  ;;  %7879 = vmatmul.mubr.msk.bf16.gmra.mxu0 %vm1336_vm5, %v2584_v29 }
 0x237   : > { %v9856_v10 = vadd.f32 %v1704_v16, %v1550_v47  ;;  %7882 = vmatprep.mubr.msk.bf16.mxu0 %vm8893_vm2, %v11149_v2  ;;  %7959 = vmatpush3.bf16.msra.mxu0 %v8622_v34 }
 0x238   : > { %v7628_v56 = vpop.f32.mrf.mxu0  ;;  %v7673_v5 = vpop.f32.mrf.mxu1  ;;  %7960 = vmatprep.subr.bf16.mxu0 %v11149_v2 }
 0x23a   : > { %v1553_v24 = vpop.f32.mrf.mxu0  ;;  %v1712_v58 = vpop.f32.mrf.mxu1  ;;  %7927 = vmatmul.mubr.msk.bf16.gmra.mxu1 %vm1336_vm5, %v2791_v1  ;;  %v2783_v1 = vld [vmem:[#allocation2 + $0x7b] sm:$0xff] }
 0x23b   : > { %v9865_v59 = vadd.f32 %v1707_v43, %v1553_v24  ;;  %7930 = vmatprep.mubr.msk.bf16.mxu1 %vm8893_vm2, %v11149_v2  ;;  %7961 = vmatpush3.bf16.msra.mxu0 %v8623_v8 }
 0x23c   : > { %v7629_v29 = vpop.f32.mrf.mxu0  ;;  %v7676_v48 = vpop.f32.mrf.mxu1  ;;  %8058 = vmatprep.subr.bf16.mxu0 %v11149_v2 }
 0x23e   : > { %v1558_v31 = vpop.f32.mrf.mxu0  ;;  %v1715_v12 = vpop.f32.mrf.mxu1  ;;  %7883 = vmatmul.mubr.msk.bf16.gmra.mxu0 %vm1336_vm5, %v2585_v39  ;;  %v2780_v39 = vld [vmem:[#allocation2 + $0x63] sm:$0xff] }
 0x23f   : > { %v9874_v0 = vadd.f32 %v1712_v58, %v1558_v31  ;;  %7886 = vmatprep.mubr.msk.bf16.mxu0 %vm8893_vm2, %v11149_v2  ;;  %v2793_v37 = vpack.c.bf16 %v2780_v39, %v2779_v17 }
 0x240   : > { %v7632_v40 = vpop.f32.mrf.mxu0  ;;  %v7677_v55 = vpop.f32.mrf.mxu1 }
 0x241   : > { %v2785_v40 = vld [vmem:[#allocation2 + $0x8b] sm:$0xff] }
 0x242   : > { %v1561_v46 = vpop.f32.mrf.mxu0  ;;  %v1720_v27 = vpop.f32.mrf.mxu1  ;;  %7931 = vmatmul.mubr.msk.bf16.gmra.mxu1 %vm1336_vm5, %v2792_v3 }
 0x243   : > { %v9879_v54 = vadd.f32 %v1715_v12, %v1561_v46  ;;  %7934 = vmatprep.mubr.msk.bf16.mxu1 %vm8893_vm2, %v11149_v2  ;;  %v2796_v46 = vpack.c.bf16 %v2786_v21, %v2785_v40  ;;  %v2980_v40 = vld [vmem:[#allocation2 + $0x34] sm:$0xff] }
 0x244   : > { %v7633_v38 = vpop.f32.mrf.mxu0  ;;  %v7680_v4 = vpop.f32.mrf.mxu1 }
 0x246   : > { %v1566_v60 = vpop.f32.mrf.mxu0  ;;  %v1723_v53 = vpop.f32.mrf.mxu1  ;;  %7887 = vmatmul.mubr.msk.bf16.gmra.mxu0 %vm1336_vm5, %v2586_v6  ;;  %v2782_v6 = vld [vmem:[#allocation2 + $0x73] sm:$0xff] }
 0x247   : > { %v9887_v20 = vadd.f32 %v1720_v27, %v1566_v60  ;;  %7890 = vmatprep.mubr.msk.bf16.mxu0 %vm8893_vm2, %v11149_v2  ;;  %v2794_v47 = vpack.c.bf16 %v2782_v6, %v2781_v50  ;;  %v2580_v27 = vld [vmem:[#allocation2 + $0x92] sm:$0xff] }
 0x248   : > { %v7636_v36 = vpop.f32.mrf.mxu0  ;;  %v7681_v57 = vpop.f32.mrf.mxu1  ;;  %v2590_v60 = vpack.c.bf16 %v2580_v27, %v2579_v32  ;;  %v2979_v27 = vld [vmem:[#allocation2 + $0x2c] sm:$0xff] }
 0x24a   : > { %v1569_v30 = vpop.f32.mrf.mxu0  ;;  %v1728_v42 = vpop.f32.mrf.mxu1  ;;  %7935 = vmatmul.mubr.msk.bf16.gmra.mxu1 %vm1336_vm5, %v2793_v37 }
 0x24b   : > { %v9892_v33 = vadd.f32 %v1723_v53, %v1569_v30  ;;  %7938 = vmatprep.mubr.msk.bf16.mxu1 %vm8893_vm2, %v11149_v2  ;;  %v2788_v53 = vld [vmem:[#allocation2 + $0xa3] sm:$0x7f]  ;;  %v2787_v30 = vld [vmem:[#allocation2 + $0x9b] sm:$0xff] }
 0x24c   : > { %v7637_v44 = vpop.f32.mrf.mxu0  ;;  %v7684_v14 = vpop.f32.mrf.mxu1 }
 0x24d   : > { %v2797_v44 = vpack.c.bf16 %v2788_v53, %v2787_v30  ;;  %v2582_v14 = vld [vmem:[#allocation2 + $0xa2] sm:$0x7f] }
 0x24e   : > { %v1574_v13 = vpop.f32.mrf.mxu0  ;;  %v1731_v16 = vpop.f32.mrf.mxu1  ;;  %7891 = vmatmul.mubr.msk.bf16.gmra.mxu0 %vm1336_vm5, %v2587_v7  ;;  %v2784_v7 = vld [vmem:[#allocation2 + $0x83] sm:$0xff] }
 0x24f   : > { %v9900_v34 = vadd.f32 %v1728_v42, %v1574_v13  ;;  %7894 = vmatprep.mubr.msk.bf16.mxu0 %vm8893_vm2, %v11149_v2  ;;  %v2795_v29 = vpack.c.bf16 %v2784_v7, %v2783_v1 }
 0x250   : > { %v7640_v26 = vpop.f32.mrf.mxu0  ;;  %v7685_v35 = vpop.f32.mrf.mxu1 }
 0x251   : > { %v2581_v26 = vld [vmem:[#allocation2 + $0x9a] sm:$0xff] }
 0x252   : > { %v1577_v43 = vpop.f32.mrf.mxu0  ;;  %v1736_v45 = vpop.f32.mrf.mxu1  ;;  %7939 = vmatmul.mubr.msk.bf16.gmra.mxu1 %vm1336_vm5, %v2794_v47  ;;  %v2591_v47 = vpack.c.bf16 %v2582_v14, %v2581_v26 }
 0x253   : > { %v9905_v8 = vadd.f32 %v1731_v16, %v1577_v43  ;;  %7942 = vmatprep.mubr.msk.bf16.mxu1 %vm8893_vm2, %v11149_v2 }
 0x254   : > { %v7641_v49 = vpop.f32.mrf.mxu0  ;;  %v7688_v63 = vpop.f32.mrf.mxu1 }
 0x256   : > { %v1582_v56 = vpop.f32.mrf.mxu0  ;;  %v1738_v5 = vpop.f32.mrf.mxu1  ;;  %7895 = vmatmul.mubr.msk.bf16.gmra.mxu0 %vm1336_vm5, %v2588_v52 }
 0x257   : > { %7898 = vmatprep.mubr.msk.bf16.mxu0 %vm8893_vm2, %v11149_v2  ;;  %v2978_v56 = vld [vmem:[#allocation2 + $0x24] sm:$0xff] }
 0x258   : > { %v7644_v24 = vpop.f32.mrf.mxu0  ;;  %v7689_v58 = vpop.f32.mrf.mxu1 }
 0x25a   : > { %v1584_v48 = vpop.f32.mrf.mxu0  ;;  %v2068_v23 = vpop.f32.mrf.mxu1  ;;  %7943 = vmatmul.mubr.msk.bf16.gmra.mxu1 %vm1336_vm5, %v2795_v29  ;;  %v2977_v29 = vld [vmem:[#allocation2 + $0x1c] sm:$0xff] }
 0x25b   : > { %7946 = vmatprep.mubr.msk.bf16.mxu1 %vm8893_vm2, %v11149_v2 }
 0x25c   : > { %v7645_v31 = vpop.f32.mrf.mxu0  ;;  %v7744_v12 = vpop.f32.mrf.mxu1 }
 0x25d   : > { %v2995_v31 = vpack.c.bf16 %v2978_v56, %v2977_v29 }
 0x25e   : > { %v1862_v18 = vpop.f32.mrf.mxu0  ;;  %v2071_v19 = vpop.f32.mrf.mxu1  ;;  %7899 = vmatmul.mubr.msk.bf16.gmra.mxu0 %vm1336_vm5, %v2589_v28 }
 0x25f   : > { %v1931_v52 = vadd.f32 %v1862_v18, %v9799_v11  ;;  %7902 = vmatprep.mubr.msk.bf16.mxu0 %vm8893_vm2, %v11149_v2 }
 0x260   : > { %v7700_v55 = vpop.f32.mrf.mxu0  ;;  %v7745_v3 = vpop.f32.mrf.mxu1 }
 0x261   : > { %v9925_v38 = vadd.f32 %v2068_v23, %v1931_v52 }
 0x262   : > { %v1865_v4 = vpop.f32.mrf.mxu0  ;;  %v2076_v39 = vpop.f32.mrf.mxu1  ;;  %7947 = vmatmul.mubr.msk.bf16.gmra.mxu1 %vm1336_vm5, %v2796_v46 }
 0x263   : > { %v1932_v9 = vadd.f32 %v1865_v4, %v9804_v15  ;;  %7950 = vmatprep.mubr.msk.bf16.mxu1 %vm8893_vm2, %v11149_v2 }
 0x264   : > { %v7701_v28 = vpop.f32.mrf.mxu0  ;;  %v7748_v11 = vpop.f32.mrf.mxu1 }
 0x265   : > { %v9931_v17 = vadd.f32 %v2071_v19, %v1932_v9  ;;  %v2996_v9 = vpack.c.bf16 %v2980_v40, %v2979_v27 }
 0x266   : > { %v1870_v36 = vpop.f32.mrf.mxu0  ;;  %v2079_v57 = vpop.f32.mrf.mxu1  ;;  %7903 = vmatmul.mubr.msk.bf16.gmra.mxu0 %vm1336_vm5, %v2590_v60 }
 0x267   : > { %v1933_v37 = vadd.f32 %v1870_v36, %v9809_v41  ;;  %7906 = vmatprep.mubr.msk.bf16.mxu0 %vm8893_vm2, %v11149_v2  ;;  %v2982_v36 = vld [vmem:[#allocation2 + $0x44] sm:$0xff] }
 0x268   : > { %v7704_v15 = vpop.f32.mrf.mxu0  ;;  %v7749_v42 = vpop.f32.mrf.mxu1 }
 0x269   : > { %v9937_v6 = vadd.f32 %v2076_v39, %v1933_v37  ;;  %v2981_v15 = vld [vmem:[#allocation2 + $0x3c] sm:$0xff] }
 0x26a   : > { %v1873_v13 = vpop.f32.mrf.mxu0  ;;  %v2084_v16 = vpop.f32.mrf.mxu1  ;;  %7951 = vmatmul.mubr.msk.bf16.gmra.mxu1 %vm1336_vm5, %v2797_v44  ;;  %v2997_v14 = vpack.c.bf16 %v2982_v36, %v2981_v15  ;;  %v8626_v36 = vld [vmem:[%s11140_s5 + $0x28] sm:$0xff]  }
 0x26b   : > { %v1934_v50 = vadd.f32 %v1873_v13, %v9814_v61  ;;  %8014 = vmatprep.mubr.msk.bf16.mxu1 %vm8893_vm2, %v11149_v2 }
 0x26c   : > { %v7705_v41 = vpop.f32.mrf.mxu0  ;;  %v7752_v35 = vpop.f32.mrf.mxu1 }
 0x26d   : > { %v9943_v43 = vadd.f32 %v2079_v57, %v1934_v50  ;;  %v2984_v35 = vld [vmem:[#allocation2 + $0x54] sm:$0xff] }
 0x26e   : > { %v1878_v45 = vpop.f32.mrf.mxu0  ;;  %v2087_v49 = vpop.f32.mrf.mxu1  ;;  %7907 = vmatmul.mubr.msk.bf16.gmra.mxu0 %vm1336_vm5, %v2591_v47 }
 0x26f   : > { %v1935_v63 = vadd.f32 %v1878_v45, %v9819_v25  ;;  %7962 = vmatprep.mubr.msk.bf16.mxu0 %vm8893_vm2, %v11149_v2 }
 0x270   : > { %v7708_v7 = vpop.f32.mrf.mxu0  ;;  %v7753_v61 = vpop.f32.mrf.mxu1 }
 0x271   : > { %v9949_v5 = vadd.f32 %v2084_v16, %v1935_v63  ;;  %v2983_v7 = vld [vmem:[#allocation2 + $0x4c] sm:$0xff] }
 0x272   : > { %v1881_v1 = vpop.f32.mrf.mxu0  ;;  %v2092_v24 = vpop.f32.mrf.mxu1  ;;  %v2998_v56 = vpack.c.bf16 %v2984_v35, %v2983_v7 }
 0x273   : > { %v1936_v58 = vadd.f32 %v1881_v1, %v9824_v62 }
 0x274   : > { %v7709_v48 = vpop.f32.mrf.mxu0  ;;  %v7756_v23 = vpop.f32.mrf.mxu1 }
 0x275   : > { %v9952_v12 = vadd.f32 %v2087_v49, %v1936_v58 }
 0x276   : > { %v1886_v21 = vpop.f32.mrf.mxu0  ;;  %v2095_v25 = vpop.f32.mrf.mxu1  ;;  %7963 = vmatmul.mubr.msk.bf16.vlgmr.msra.gmra.mxu0 %vm1336_vm5, %v2995_v31  ;;  %v2986_v31 = vld [vmem:[#allocation2 + $0x64] sm:$0xff] }
 0x277   : > { %v1937_v18 = vadd.f32 %v1886_v21, %v9835_v51  ;;  %7966 = vmatprep.mubr.msk.bf16.mxu0 %vm8893_vm2, %v11149_v2 }
 0x278   : > { %v7712_v19 = vpop.f32.mrf.mxu0  ;;  %v7757_v52 = vpop.f32.mrf.mxu1 }
 0x279   : > { %v9958_v55 = vadd.f32 %v2092_v24, %v1937_v18  ;;  %v2985_v52 = vld [vmem:[#allocation2 + $0x5c] sm:$0xff] }
 0x27a   : > { %v1889_v62 = vpop.f32.mrf.mxu0  ;;  %v2100_v3 = vpop.f32.mrf.mxu1 }
 0x27b   : > { %v1938_v46 = vadd.f32 %v1889_v62, %v9844_v22  ;;  %v2999_v62 = vpack.c.bf16 %v2986_v31, %v2985_v52 }
 0x27c   : > { %v7713_v4 = vpop.f32.mrf.mxu0  ;;  %v7760_v39 = vpop.f32.mrf.mxu1 }
 0x27d   : > { %v9961_v32 = vadd.f32 %v2095_v25, %v1938_v46 }
 0x27e   : > { %v1894_v28 = vpop.f32.mrf.mxu0  ;;  %v2103_v51 = vpop.f32.mrf.mxu1  ;;  %7967 = vmatmul.mubr.msk.bf16.gmra.mxu0 %vm1336_vm5, %v2996_v9 }
 0x27f   : > { %v1939_v11 = vadd.f32 %v1894_v28, %v9856_v10  ;;  %7970 = vmatprep.mubr.msk.bf16.mxu0 %vm8893_vm2, %v11149_v2 }
 0x280   : > { %v7716_v60 = vpop.f32.mrf.mxu0  ;;  %v7761_v53 = vpop.f32.mrf.mxu1 }
 0x281   : > { %v9967_v57 = vadd.f32 %v2100_v3, %v1939_v11  ;;  %v2987_v53 = vld [vmem:[#allocation2 + $0x6c] sm:$0xff] }
 0x282   : > { %v1897_v22 = vpop.f32.mrf.mxu0  ;;  %v2108_v37 = vpop.f32.mrf.mxu1 }
 0x283   : > { %v1940_v30 = vadd.f32 %v1897_v22, %v9865_v59  ;;  %v8624_v59 = vld [vmem:[%s11140_s5 + $0x38] sm:$0xff]  }
 0x284   : > { %v7717_v42 = vpop.f32.mrf.mxu0  ;;  %v7764_v44 = vpop.f32.mrf.mxu1  ;;  %7999 = vmatpush3.bf16.msra.mxu1 %v8624_v59 }
 0x285   : > { %v9970_v13 = vadd.f32 %v2103_v51, %v1940_v30  ;;  %8000 = vmatprep.subr.bf16.mxu1 %v11149_v2 }
 0x286   : > { %v1902_v16 = vpop.f32.mrf.mxu0  ;;  %v2111_v10 = vpop.f32.mrf.mxu1  ;;  %7971 = vmatmul.mubr.msk.bf16.gmra.mxu0 %vm1336_vm5, %v2997_v14  ;;  %v2990_v14 = vld [vmem:[#allocation2 + $0x84] sm:$0xff] }
 0x287   : > { %v1941_v50 = vadd.f32 %v1902_v16, %v9874_v0  ;;  %7974 = vmatprep.mubr.msk.bf16.mxu0 %vm8893_vm2, %v11149_v2 }
 0x288   : > { %v7720_v26 = vpop.f32.mrf.mxu0  ;;  %v7765_v41 = vpop.f32.mrf.mxu1 }
 0x289   : > { %v9979_v47 = vadd.f32 %v2108_v37, %v1941_v50  ;;  %v2989_v50 = vld [vmem:[#allocation2 + $0x7c] sm:$0xff] }
 0x28a   : > { %v1905_v45 = vpop.f32.mrf.mxu0  ;;  %v2116_v49 = vpop.f32.mrf.mxu1  ;;  %v8627_v26 = vld [vmem:[%s11140_s5 + $0x20] sm:$0xff]   ;;  %v3001_v35 = vpack.c.bf16 %v2990_v14, %v2989_v50 }
 0x28b   : > { %v1942_v63 = vadd.f32 %v1905_v45, %v9879_v54  ;;  %v8625_v54 = vld [vmem:[%s11140_s5 + $0x30] sm:$0xff]  }
 0x28c   : > { %v7721_v0 = vpop.f32.mrf.mxu0  ;;  %v7768_v61 = vpop.f32.mrf.mxu1  ;;  %8001 = vmatpush3.bf16.msra.mxu1 %v8625_v54 }
 0x28d   : > { %v9983_v1 = vadd.f32 %v2111_v10, %v1942_v63  ;;  %8002 = vmatprep.subr.bf16.mxu1 %v11149_v2  ;;  %v2992_v61 = vld [vmem:[#allocation2 + $0x94] sm:$0xff] }
 0x28e   : > { %v1910_v24 = vpop.f32.mrf.mxu0  ;;  %v2119_v58 = vpop.f32.mrf.mxu1  ;;  %7975 = vmatmul.mubr.msk.bf16.gmra.mxu0 %vm1336_vm5, %v2998_v56 }
 0x28f   : > { %v1943_v29 = vadd.f32 %v1910_v24, %v9887_v20  ;;  %7978 = vmatprep.mubr.msk.bf16.mxu0 %vm8893_vm2, %v11149_v2 }
 0x290   : > { %v7724_v48 = vpop.f32.mrf.mxu0  ;;  %v7769_v23 = vpop.f32.mrf.mxu1  ;;  %8003 = vmatpush3.bf16.msra.mxu1 %v8626_v36 }
 0x291   : > { %v9992_v21 = vadd.f32 %v2116_v49, %v1943_v29  ;;  %8004 = vmatprep.subr.bf16.mxu1 %v11149_v2  ;;  %v2991_v48 = vld [vmem:[#allocation2 + $0x8c] sm:$0xff] }
 0x292   : > { %v1913_v25 = vpop.f32.mrf.mxu0  ;;  %v2124_v18 = vpop.f32.mrf.mxu1  ;;  %v3002_v31 = vpack.c.bf16 %v2992_v61, %v2991_v48 }
 0x293   : > { %v1944_v19 = vadd.f32 %v1913_v25, %v9892_v33  ;;  %v2988_v33 = vld [vmem:[#allocation2 + $0x74] sm:$0xff] }
 0x294   : > { %v7725_v20 = vpop.f32.mrf.mxu0  ;;  %v7772_v40 = vpop.f32.mrf.mxu1  ;;  %8005 = vmatpush3.bf16.msra.mxu1 %v8627_v26 }
 0x295   : > { %v9996_v3 = vadd.f32 %v2119_v58, %v1944_v19  ;;  %8006 = vmatprep.subr.bf16.mxu1 %v11149_v2  ;;  %v2994_v40 = vld [vmem:[#allocation2 + $0xa4] sm:$0x7f] }
 0x296   : > { %v1918_v46 = vpop.f32.mrf.mxu0  ;;  %v2127_v27 = vpop.f32.mrf.mxu1  ;;  %7979 = vmatmul.mubr.msk.bf16.gmra.mxu0 %vm1336_vm5, %v2999_v62 }
 0x297   : > { %v1945_v4 = vadd.f32 %v1918_v46, %v9900_v34  ;;  %7982 = vmatprep.mubr.msk.bf16.mxu0 %vm8893_vm2, %v11149_v2  ;;  %v3000_v34 = vpack.c.bf16 %v2988_v33, %v2987_v53 }
 0x298   : > { %v7728_v39 = vpop.f32.mrf.mxu0  ;;  %v7773_v9 = vpop.f32.mrf.mxu1 }
 0x299   : > { %v10002_v28 = vadd.f32 %v2124_v18, %v1945_v4  ;;  %v8629_v4 = vld [vmem:[%s11140_s5 + $0xf8] sm:$0xff]  }
 0x29a   : > { %v1921_v51 = vpop.f32.mrf.mxu0  ;;  %v2132_v11 = vpop.f32.mrf.mxu1  ;;  %v2993_v9 = vld [vmem:[#allocation2 + $0x9c] sm:$0xff]  ;;  %8059 = vmatpush3.bf16.msra.mxu0 %v8629_v4 }
 0x29b   : > { %v1946_v60 = vadd.f32 %v1921_v51, %v9905_v8  ;;  %v3003_v51 = vpack.c.bf16 %v2994_v40, %v2993_v9  ;;  %v8630_v11 = vld [vmem:[%s11140_s5 + $0x10] sm:$0xff]   ;;  %8060 = vmatprep.subr.bf16.mxu0 %v11149_v2 }
 0x29c   : > { %v7729_v22 = vpop.f32.mrf.mxu0  ;;  %v7776_v37 = vpop.f32.mrf.mxu1 }
 0x29d   : > { %v10008_v30 = vadd.f32 %v2127_v27, %v1946_v60  ;;  %v8631_v22 = vld [vmem:[%s11140_s5 + $0xf0] sm:$0xff]  }
 0x29e   : > { %v1926_v15 = vpop.f32.mrf.mxu0  ;;  %v2134_v42 = vpop.f32.mrf.mxu1  ;;  %7983 = vmatmul.mubr.msk.bf16.gmra.mxu0 %vm1336_vm5, %v3000_v34 }
 0x29f   : > { %7986 = vmatprep.mubr.msk.bf16.mxu0 %vm8893_vm2, %v11149_v2  ;;  %8061 = vmatpush3.bf16.msra.mxu0 %v8631_v22 }
 0x2a0   : > { %v7732_v8 = vpop.f32.mrf.mxu0  ;;  %v7777_v44 = vpop.f32.mrf.mxu1  ;;  %8062 = vmatprep.subr.bf16.mxu0 %v11149_v2 }
 0x2a1   : > { %v8632_v44 = vld [vmem:[%s11140_s5 + $0xe8] sm:$0xff]  }
 0x2a2   : > { %v1928_v16 = vpop.f32.mrf.mxu0  ;;  %v2480_v10 = vpop.f32.mrf.mxu1 }
 0x2a3   : > { %8063 = vmatpush3.bf16.msra.mxu0 %v8632_v44 }
 0x2a4   : > { %v7733_v41 = vpop.f32.mrf.mxu0  ;;  %v7832_v59 = vpop.f32.mrf.mxu1  ;;  %8064 = vmatprep.subr.bf16.mxu0 %v11149_v2 }
 0x2a5   : > { %v8634_v59 = vld [vmem:[%s11140_s5 + $0xe0] sm:$0xff]  }
 0x2a6   : > { %v2274_v45 = vpop.f32.mrf.mxu0  ;;  %v2483_v49 = vpop.f32.mrf.mxu1  ;;  %7987 = vmatmul.mubr.msk.bf16.gmra.mxu0 %vm1336_vm5, %v3001_v35 }
 0x2a7   : > { %v2343_v63 = vadd.f32 %v2274_v45, %v9925_v38  ;;  %7990 = vmatprep.mubr.msk.bf16.mxu0 %vm8893_vm2, %v11149_v2  ;;  %v8628_v38 = vld [vmem:[%s11140_s5 + $0x18] sm:$0xff]   ;;  %8065 = vmatpush3.bf16.msra.mxu0 %v8634_v59 }
 0x2a8   : > { %v7788_v7 = vpop.f32.mrf.mxu0  ;;  %v7833_v0 = vpop.f32.mrf.mxu1  ;;  %8007 = vmatpush3.bf16.msra.mxu1 %v8628_v38  ;;  %8066 = vmatprep.subr.bf16.mxu0 %v11149_v2  ;;  %v8633_v38 = vld [vmem:[%s11140_s5 + $0x8] sm:$0xff]  }
 0x2a9   : > { %v10022_v56 = vadd.f32 %v2480_v10, %v2343_v63  ;;  %8008 = vmatprep.subr.bf16.mxu1 %v11149_v2  ;;  %v8635_v0 = vld [vmem:[%s11140_s5 + $0xd8] sm:$0xff]  }
 0x2aa   : > { %v2277_v24 = vpop.f32.mrf.mxu0  ;;  %v2488_v58 = vpop.f32.mrf.mxu1 }
 0x2ab   : > { %v2344_v29 = vadd.f32 %v2277_v24, %v9931_v17  ;;  %8067 = vmatpush3.bf16.msra.mxu0 %v8635_v0 }
 0x2ac   : > { %v7789_v23 = vpop.f32.mrf.mxu0  ;;  %v7836_v54 = vpop.f32.mrf.mxu1  ;;  %8009 = vmatpush3.bf16.msra.mxu1 %v8630_v11  ;;  %8068 = vmatprep.subr.bf16.mxu0 %v11149_v2 }
 0x2ad   : > { %v10028_v25 = vadd.f32 %v2483_v49, %v2344_v29  ;;  %8010 = vmatprep.subr.bf16.mxu1 %v11149_v2  ;;  %v8636_v23 = vld [vmem:[%s11140_s5 + $0xd0] sm:$0xff]  }
 0x2ae   : > { %v2282_v18 = vpop.f32.mrf.mxu0  ;;  %v2491_v19 = vpop.f32.mrf.mxu1  ;;  %7991 = vmatmul.mubr.msk.bf16.gmra.mxu0 %vm1336_vm5, %v3002_v31 }
 0x2af   : > { %v2345_v52 = vadd.f32 %v2282_v18, %v9937_v6  ;;  %7994 = vmatprep.mubr.msk.bf16.mxu0 %vm8893_vm2, %v11149_v2  ;;  %8069 = vmatpush3.bf16.msra.mxu0 %v8636_v23 }
 0x2b0   : > { %v7792_v17 = vpop.f32.mrf.mxu0  ;;  %v7837_v20 = vpop.f32.mrf.mxu1  ;;  %8070 = vmatprep.subr.bf16.mxu0 %v11149_v2  ;;  %8011 = vmatpush3.bf16.msra.mxu1 %v8633_v38 }
 0x2b1   : > { %v10035_v62 = vadd.f32 %v2488_v58, %v2345_v52  ;;  %8012 = vmatprep.subr.bf16.mxu1 %v11149_v2 }
 0x2b2   : > { %v2285_v46 = vpop.f32.mrf.mxu0  ;;  %v2496_v27 = vpop.f32.mrf.mxu1 }
 0x2b3   : > { %v2346_v39 = vadd.f32 %v2285_v46, %v9943_v43  ;;  %v8637_v46 = vld [vmem:[%s11140_s5] sm:$0xff]  }
 0x2b4   : > { %v7793_v6 = vpop.f32.mrf.mxu0  ;;  %v7840_v33 = vpop.f32.mrf.mxu1  ;;  %8013 = vmatpush3.bf16.msra.mxu1 %v8637_v46 }
 0x2b5   : > { %v10044_v60 = vadd.f32 %v2491_v19, %v2346_v39  ;;  %v8639_v39 = vld [vmem:[%s11140_s5 + $0xc0] sm:$0xff]   ;;  %8018 = vmatprep.subr.bf16.mxu1 %v11149_v2 }
 0x2b6   : > { %v2290_v53 = vpop.f32.mrf.mxu0  ;;  %v2499_v36 = vpop.f32.mrf.mxu1  ;;  %7995 = vmatmul.mubr.msk.bf16.gmra.mxu0 %vm1336_vm5, %v3003_v51 }
 0x2b7   : > { %v2347_v43 = vadd.f32 %v2290_v53, %v9949_v5  ;;  %8074 = vmatprep.mubr.msk.bf16.mxu0 %vm8893_vm2, %v11149_v2 }
 0x2b8   : > { %v7796_v37 = vpop.f32.mrf.mxu0  ;;  %v7841_v34 = vpop.f32.mrf.mxu1 }
 0x2b9   : > { %v10055_v15 = vadd.f32 %v2496_v27, %v2347_v43 }
 0x2ba   : > { %v2293_v42 = vpop.f32.mrf.mxu0  ;;  %v2504_v8 = vpop.f32.mrf.mxu1 }
 0x2bb   : > { %v2348_v5 = vadd.f32 %v2293_v42, %v9952_v12 }
 0x2bc   : > { %v7797_v14 = vpop.f32.mrf.mxu0  ;;  %v7844_v16 = vpop.f32.mrf.mxu1 }
 0x2bd   : > { %v10062_v10 = vadd.f32 %v2499_v36, %v2348_v5 }
 0x2be   : > { %v2298_v50 = vpop.f32.mrf.mxu0  ;;  %v2507_v26 = vpop.f32.mrf.mxu1 }
 0x2bf   : > { %v2349_v41 = vadd.f32 %v2298_v50, %v9958_v55 }
 0x2c0   : > { %v7800_v12 = vpop.f32.mrf.mxu0  ;;  %v7845_v35 = vpop.f32.mrf.mxu1 }
 0x2c1   : > { %v10069_v45 = vadd.f32 %v2504_v8, %v2349_v41 }
 0x2c2   : > { %v2301_v49 = vpop.f32.mrf.mxu0  ;;  %v2512_v63 = vpop.f32.mrf.mxu1 }
 0x2c3   : > { %v2350_v7 = vadd.f32 %v2301_v49, %v9961_v32 }
 0x2c4   : > { %v7801_v55 = vpop.f32.mrf.mxu0  ;;  %v7848_v61 = vpop.f32.mrf.mxu1 }
 0x2c5   : > { %v10076_v24 = vadd.f32 %v2507_v26, %v2350_v7 }
 0x2c6   : > { %v2306_v58 = vpop.f32.mrf.mxu0  ;;  %v2515_v29 = vpop.f32.mrf.mxu1 }
 0x2c7   : > { %v2351_v48 = vadd.f32 %v2306_v58, %v9967_v57  ;;  %v8638_v57 = vld [vmem:[%s11140_s5 + $0xc8] sm:$0xff]  }
 0x2c8   : > { %v7804_v32 = vpop.f32.mrf.mxu0  ;;  %v7849_v54 = vpop.f32.mrf.mxu1  ;;  %8071 = vmatpush3.bf16.msra.mxu0 %v8638_v57 }
 0x2c9   : > { %v10083_v31 = vadd.f32 %v2512_v63, %v2351_v48  ;;  %8072 = vmatprep.subr.bf16.mxu0 %v11149_v2 }
 0x2ca   : > { %v2309_v18 = vpop.f32.mrf.mxu0  ;;  %v2520_v19 = vpop.f32.mrf.mxu1 }
 0x2cb   : > { %v2352_v52 = vadd.f32 %v2309_v18, %v9970_v13 }
 0x2cc   : > { %v7805_v17 = vpop.f32.mrf.mxu0  ;;  %v7852_v20 = vpop.f32.mrf.mxu1  ;;  %8073 = vmatpush3.bf16.msra.mxu0 %v8639_v39 }
 0x2cd   : > { %v10094_v40 = vadd.f32 %v2515_v29, %v2352_v52  ;;  %8098 = vmatprep.subr.bf16.mxu0 %v11149_v2 }
 0x2ce   : > { %v2314_v27 = vpop.f32.mrf.mxu0  ;;  %v2523_v4 = vpop.f32.mrf.mxu1 }
 0x2cf   : > { %v2353_v13 = vadd.f32 %v2314_v27, %v9979_v47 }
 0x2d0   : > { %v7808_v9 = vpop.f32.mrf.mxu0  ;;  %v7853_v6 = vpop.f32.mrf.mxu1 }
 0x2d1   : > { %v10105_v33 = vadd.f32 %v2520_v19, %v2353_v13 }
 0x2d2   : > { %v2317_v51 = vpop.f32.mrf.mxu0  ;;  %v2528_v11 = vpop.f32.mrf.mxu1 }
 0x2d3   : > { %v2354_v53 = vadd.f32 %v2317_v51, %v9983_v1 }
 0x2d4   : > { %v7809_v36 = vpop.f32.mrf.mxu0  ;;  %v7856_v47 = vpop.f32.mrf.mxu1 }
 0x2d5   : > { %v10109_v43 = vadd.f32 %v2523_v4, %v2354_v53 }
 0x2d6   : > { %v2322_v22 = vpop.f32.mrf.mxu0  ;;  %v2531_v37 = vpop.f32.mrf.mxu1 }
 0x2d7   : > { %v2355_v34 = vadd.f32 %v2322_v22, %v9992_v21 }
 0x2d8   : > { %v7812_v42 = vpop.f32.mrf.mxu0  ;;  %v7857_v8 = vpop.f32.mrf.mxu1 }
 0x2d9   : > { %v10112_v5 = vadd.f32 %v2528_v11, %v2355_v34 }
 0x2da   : > { %v2325_v44 = vpop.f32.mrf.mxu0  ;;  %v2536_v14 = vpop.f32.mrf.mxu1 }
 0x2db   : > { %v2356_v16 = vadd.f32 %v2325_v44, %v9996_v3 }
 0x2dc   : > { %v7813_v50 = vpop.f32.mrf.mxu0  ;;  %v7860_v26 = vpop.f32.mrf.mxu1 }
 0x2dd   : > { %v10115_v41 = vadd.f32 %v2531_v37, %v2356_v16 }
 0x2de   : > { %v2330_v1 = vpop.f32.mrf.mxu0  ;;  %v2539_v59 = vpop.f32.mrf.mxu1 }
 0x2df   : > { %v2357_v12 = vadd.f32 %v2330_v1, %v10002_v28 }
 0x2e0   : > { %v7816_v35 = vpop.f32.mrf.mxu0  ;;  %v7861_v49 = vpop.f32.mrf.mxu1 }
 0x2e1   : > { %v10118_v63 = vadd.f32 %v2536_v14, %v2357_v12 }
 0x2e2   : > { %v2333_v21 = vpop.f32.mrf.mxu0  ;;  %v2544_v7 = vpop.f32.mrf.mxu1 }
 0x2e3   : > { %v2358_v0 = vadd.f32 %v2333_v21, %v10008_v30 }
 0x2e4   : > { %v7817_v55 = vpop.f32.mrf.mxu0  ;;  %v7864_v61 = vpop.f32.mrf.mxu1 }
 0x2e5   : > { %v10121_v58 = vadd.f32 %v2539_v59, %v2358_v0 }
 0x2e6   : > { %v2338_v3 = vpop.f32.mrf.mxu0  ;;  %v2546_v29 = vpop.f32.mrf.mxu1 }
 0x2e8   : > { %v7820_v48 = vpop.f32.mrf.mxu0  ;;  %v7865_v23 = vpop.f32.mrf.mxu1 }
 0x2ea   : > { %v2340_v32 = vpop.f32.mrf.mxu0  ;;  %v2892_v54 = vpop.f32.mrf.mxu1 }
 0x2ec   : > { %v7821_v38 = vpop.f32.mrf.mxu0  ;;  %v7920_v28 = vpop.f32.mrf.mxu1 }
 0x2ee   : > { %v2686_v18 = vpop.f32.mrf.mxu0  ;;  %v2895_v19 = vpop.f32.mrf.mxu1 }
 0x2ef   : > { %v2755_v52 = vadd.f32 %v2686_v18, %v10022_v56 }
 0x2f0   : > { %v7876_v57 = vpop.f32.mrf.mxu0  ;;  %v7921_v17 = vpop.f32.mrf.mxu1 }
 0x2f1   : > { %v10124_v20 = vadd.f32 %v2892_v54, %v2755_v52 }
 0x2f2   : > { %v2689_v30 = vpop.f32.mrf.mxu0  ;;  %v2900_v46 = vpop.f32.mrf.mxu1 }
 0x2f3   : > { %v2756_v27 = vadd.f32 %v2689_v30, %v10028_v25 }
 0x2f4   : > { %v7877_v4 = vpop.f32.mrf.mxu0  ;;  %v7924_v13 = vpop.f32.mrf.mxu1 }
 0x2f5   : > { %v10127_v39 = vadd.f32 %v2895_v19, %v2756_v27 }
 0x2f6   : > { %v2694_v9 = vpop.f32.mrf.mxu0  ;;  %v2903_v6 = vpop.f32.mrf.mxu1 }
 0x2f7   : > { %v2757_v51 = vadd.f32 %v2694_v9, %v10035_v62 }
 0x2f8   : > { %v7880_v11 = vpop.f32.mrf.mxu0  ;;  %v7925_v53 = vpop.f32.mrf.mxu1 }
 0x2f9   : > { %v10130_v36 = vadd.f32 %v2900_v46, %v2757_v51 }
 0x2fa   : > { %v2697_v56 = vpop.f32.mrf.mxu0  ;;  %v2908_v47 = vpop.f32.mrf.mxu1 }
 0x2fb   : > { %v2758_v22 = vadd.f32 %v2697_v56, %v10044_v60 }
 0x2fc   : > { %v7881_v37 = vpop.f32.mrf.mxu0  ;;  %v7928_v34 = vpop.f32.mrf.mxu1 }
 0x2fd   : > { %v10133_v42 = vadd.f32 %v2903_v6, %v2758_v22 }
 0x2fe   : > { %v2702_v25 = vpop.f32.mrf.mxu0  ;;  %v2911_v8 = vpop.f32.mrf.mxu1 }
 0x2ff   : > { %v2759_v44 = vadd.f32 %v2702_v25, %v10055_v15 }
 0x300   : > { %v7884_v14 = vpop.f32.mrf.mxu0  ;;  %v7929_v16 = vpop.f32.mrf.mxu1 }
 0x301   : > { %v10136_v50 = vadd.f32 %v2908_v47, %v2759_v44 }
 0x302   : > { %v2705_v62 = vpop.f32.mrf.mxu0  ;;  %v2916_v26 = vpop.f32.mrf.mxu1 }
 0x303   : > { %v2760_v1 = vadd.f32 %v2705_v62, %v10062_v10 }
 0x304   : > { %v7885_v59 = vpop.f32.mrf.mxu0  ;;  %v7932_v12 = vpop.f32.mrf.mxu1 }
 0x305   : > { %v10139_v35 = vadd.f32 %v2911_v8, %v2760_v1 }
 0x306   : > { %v2710_v60 = vpop.f32.mrf.mxu0  ;;  %v2919_v49 = vpop.f32.mrf.mxu1 }
 0x307   : > { %v2761_v21 = vadd.f32 %v2710_v60, %v10069_v45 }
 0x308   : > { %v7888_v7 = vpop.f32.mrf.mxu0  ;;  %v7933_v0 = vpop.f32.mrf.mxu1 }
 0x309   : > { %v10142_v55 = vadd.f32 %v2916_v26, %v2761_v21 }
 0x30a   : > { %v2713_v15 = vpop.f32.mrf.mxu0  ;;  %v2924_v61 = vpop.f32.mrf.mxu1 }
 0x30b   : > { %v2762_v3 = vadd.f32 %v2713_v15, %v10076_v24 }
 0x30c   : > { %v7889_v29 = vpop.f32.mrf.mxu0  ;;  %v7936_v48 = vpop.f32.mrf.mxu1 }
 0x30d   : > { %v10145_v23 = vadd.f32 %v2919_v49, %v2762_v3 }
 0x30e   : > { %v2718_v10 = vpop.f32.mrf.mxu0  ;;  %v2927_v32 = vpop.f32.mrf.mxu1 }
 0x30f   : > { %v2763_v54 = vadd.f32 %v2718_v10, %v10083_v31 }
 0x310   : > { %v7892_v38 = vpop.f32.mrf.mxu0  ;;  %v7937_v28 = vpop.f32.mrf.mxu1 }
 0x311   : > { %v10148_v18 = vadd.f32 %v2924_v61, %v2763_v54  ;;  %v3308_v38 = vlaneseq }
 0x312   : > { %v2721_v45 = vpop.f32.mrf.mxu0  ;;  %v2932_v19 = vpop.f32.mrf.mxu1 }
 0x313   : > { %v2764_v52 = vadd.f32 %v2721_v45, %v10094_v40 }
 0x314   : > { %v7893_v57 = vpop.f32.mrf.mxu0  ;;  %v7940_v17 = vpop.f32.mrf.mxu1 }
 0x315   : > { %v10151_v30 = vadd.f32 %v2927_v32, %v2764_v52  ;;  %v3309_v52 = vshrl.u32 %v3308_v38, 7  ;;  %v8645_v38 = vld [vmem:[%s11140_s5 + $0x168] sm:$0xff]  }
 0x316   : > { %v2726_v24 = vpop.f32.mrf.mxu0  ;;  %v2935_v46 = vpop.f32.mrf.mxu1 }
 0x317   : > { %v2765_v27 = vadd.f32 %v2726_v24, %v10105_v33 }
 0x318   : > { %v7896_v4 = vpop.f32.mrf.mxu0  ;;  %v7941_v13 = vpop.f32.mrf.mxu1 }
 0x319   : > { %v10154_v9 = vadd.f32 %v2932_v19, %v2765_v27  ;;  %v3310_v27 = vsub.s32 0, %v3309_v52  ;;  %v10177_v13 = vld [vmem:[%s11139_s4] sm:$0x1] }
 0x31a   : > { %v2729_v31 = vpop.f32.mrf.mxu0  ;;  %v2940_v6 = vpop.f32.mrf.mxu1  ;;  %v8646_v52 = vld [vmem:[%s11140_s5 + $0x60] sm:$0xff]  }
 0x31b   : > { %v2766_v51 = vadd.f32 %v2729_v31, %v10109_v43 }
 0x31c   : > { %v7897_v11 = vpop.f32.mrf.mxu0  ;;  %v7944_v53 = vpop.f32.mrf.mxu1 }
 0x31d   : > { %v10157_v56 = vadd.f32 %v2935_v46, %v2766_v51  ;;  %v10183_v11 = vrot.slane %v10177_v13, %v3310_v27 }
 0x31e   : > { %v2734_v40 = vpop.f32.mrf.mxu0  ;;  %v2943_v47 = vpop.f32.mrf.mxu1 }
 0x31f   : > { %v2767_v22 = vadd.f32 %v2734_v40, %v10112_v5 }
 0x320   : > { %v7900_v37 = vpop.f32.mrf.mxu0  ;;  %v7945_v34 = vpop.f32.mrf.mxu1 }
 0x321   : > { %v10160_v25 = vadd.f32 %v2940_v6, %v2767_v22 }
 0x322   : > { %v2737_v33 = vpop.f32.mrf.mxu0  ;;  %v2948_v8 = vpop.f32.mrf.mxu1 }
 0x323   : > { %v2768_v44 = vadd.f32 %v2737_v33, %v10115_v41 }
 0x324   : > { %v7901_v14 = vpop.f32.mrf.mxu0  ;;  %v7948_v16 = vpop.f32.mrf.mxu1 }
 0x325   : > { %v10163_v62 = vadd.f32 %v2943_v47, %v2768_v44 }
 0x326   : > { %v2742_v43 = vpop.f32.mrf.mxu0  ;;  %v2951_v26 = vpop.f32.mrf.mxu1 }
 0x327   : > { %v2769_v1 = vadd.f32 %v2742_v43, %v10118_v63 }
 0x328   : > { %v7904_v59 = vpop.f32.mrf.mxu0  ;;  %v7949_v12 = vpop.f32.mrf.mxu1 }
 0x329   : > { %v10166_v60 = vadd.f32 %v2948_v8, %v2769_v1 }
 0x32a   : > { %v2745_v5 = vpop.f32.mrf.mxu0  ;;  %v2956_v49 = vpop.f32.mrf.mxu1 }
 0x32b   : > { %v2770_v21 = vadd.f32 %v2745_v5, %v10121_v58 }
 0x32c   : > { %v7905_v7 = vpop.f32.mrf.mxu0  ;;  %v7952_v0 = vpop.f32.mrf.mxu1 }
 0x32d   : > { %v10169_v15 = vadd.f32 %v2951_v26, %v2770_v21  ;;  %v8640_v26 = vld [vmem:[%s11140_s5 + $0x78] sm:$0xff]  }
 0x32e   : > { %v2750_v41 = vpop.f32.mrf.mxu0  ;;  %v2958_v61 = vpop.f32.mrf.mxu1 }
 0x330   : > { %v7908_v3 = vpop.f32.mrf.mxu0  ;;  %v7953_v29 = vpop.f32.mrf.mxu1 }
 0x331   : > { %v8643_v29 = vld [vmem:[%s11140_s5 + $0x170] sm:$0xff]  }
 0x332   : > { %v2752_v48 = vpop.f32.mrf.mxu0 }
 0x334   : > { %v7909_v10 = vpop.f32.mrf.mxu0 }
 0x336   : > { %v3098_v32 = vpop.f32.mrf.mxu0 }
 0x337   : > { %v3167_v46 = vadd.f32 %v3098_v32, %v10124_v20  ;;  %v8644_v32 = vld [vmem:[%s11140_s5 + $0x68] sm:$0xff]  }
 0x338   : > { %v7964_v63 = vpop.f32.mrf.mxu0 }
 0x33a   : > { %v3101_v54 = vpop.f32.mrf.mxu0 }
 0x33b   : > { %v3168_v45 = vadd.f32 %v3101_v54, %v10127_v39 }
 0x33c   : > { %v7965_v28 = vpop.f32.mrf.mxu0 }
 0x33d   : > { %v3188_v17 = vrot.slane %v3168_v45, 5 }
 0x33e   : > { %v3106_v19 = vpop.f32.mrf.mxu0 }
 0x33f   : > { %v3169_v58 = vadd.f32 %v3106_v19, %v10130_v36 }
 0x340   : > { %v7968_v57 = vpop.f32.mrf.mxu0 }
 0x341   : > { %v3189_v24 = vrot.slane %v3169_v58, 5 }
 0x342   : > { %v3109_v4 = vpop.f32.mrf.mxu0 }
 0x343   : > { %v3190_v31 = vsel %vm3187_vm7, %v3188_v17, %v3189_v24  ;;  %v10180_v39 = vmax.f32 %v3168_v45, %v3189_v24  ;;  %v8647_v24 = vld [vmem:[%s11140_s5 + $0x160] sm:$0xff]  }
 0x344   : > { %v3193_v6 = vmax.f32 %v3167_v46, %v3190_v31  ;;  %v7969_v51 = vpop.f32.mrf.mxu0 }
 0x346   : > { %v3196_v36 = vrot.slane %v3193_v6, 1  ;;  %v3114_v53 = vpop.f32.mrf.mxu0 }
 0x347   : > { %v3171_v47 = vadd.f32 %v3114_v53, %v10136_v50  ;;  %v3170_v50 = vadd.f32 %v3109_v4, %v10133_v42  ;;  %v8642_v42 = vld [vmem:[%s11140_s5 + $0x70] sm:$0xff]  }
 0x348   : > { %v3198_v40 = vmax.f32 %v3193_v6, %v3196_v36  ;;  %v7972_v20 = vpop.f32.mrf.mxu0  ;;  %v8648_v6 = vld [vmem:[%s11140_s5 + $0x58] sm:$0xff]  }
 0x349   : > { %v3757_v16 = vrot.slane %v3171_v47, 5 }
 0x34a   : > { %v3199_v22 = vadd.f32 %v3198_v40, %v10177_v13  ;;  %v3313_v37 = vadd.f32 %v10183_v11, %v3198_v40  ;;  %v3117_v34 = vpop.f32.mrf.mxu0  ;;  %v8649_v40 = vld [vmem:[%s11140_s5 + $0x158] sm:$0xff]  }
 0x34b   : > { %v3172_v33 = vadd.f32 %v3117_v34, %v10139_v35  ;;  %v8641_v35 = vld [vmem:[%s11140_s5 + $0x178] sm:$0xff]   ;;  %v8650_v34 = vld [vmem:[%s11140_s5 + $0x50] sm:$0xff]  }
 0x34c   : > { %v3200_v8 = vmax.f32 %v3199_v22, 0.0  ;;  %v3314_v44 = vmax.f32 %v3313_v37, 0.0  ;;  %v7973_v14 = vpop.f32.mrf.mxu0 }
 0x34d   : > { %v3758_v43 = vrot.slane %v3172_v33, 5 }
 0x34e   : > { %v3201_v1 = vpack.c.bf16 %v3200_v8, %v3200_v8  ;;  %v10192_v59 = vpack.c.bf16 %v3314_v44, %v3314_v44  ;;  %v3122_v12 = vpop.f32.mrf.mxu0  ;;  %v8651_v44 = vld [vmem:[%s11140_s5 + $0x150] sm:$0xff]  }
 0x34f   : > { %v3759_v5 = vsel %vm3187_vm7, %v3757_v16, %v3758_v43  ;;  %v3173_v49 = vadd.f32 %v3122_v12, %v10142_v55 }
 0x350   : > { %v3550_v21 = vrot.slane %v10192_v59, 3  ;;  %v3764_v7 = vmax.f32 %v3170_v50, %v3759_v5  ;;  %v7976_v0 = vpop.f32.mrf.mxu0  ;;  %8015 = vmatmul.mubr.bf16.vlgmr.msra.gmra.mxu1 %v3201_v1  ;;  %v8652_v1 = vld [vmem:[%s11140_s5 + $0x48] sm:$0xff]  }
 0x351   : > { %v3760_v41 = vrot.slane %v3173_v49, 5  ;;  %8019 = vmatpush3.bf16.msra.mxu1 %v8640_v26  ;;  %8034 = vmatprep.mubr.msk.bf16.mxu1 %vm8893_vm2, %v11149_v2 }
 0x352   : > { %v3125_v61 = vpop.f32.mrf.mxu0  ;;  %8075 = vmatmul.mubr.bf16.vlgmr.msra.gmra.mxu0 %v3550_v21  ;;  %8020 = vmatprep.subr.bf16.mxu1 %v11149_v2  ;;  %v3767_v46 = vrot.slane %v3764_v7, 1 }
 0x353   : > { %v3761_v55 = vsel %vm3187_vm7, %v3758_v43, %v3760_v41  ;;  %v3174_v3 = vadd.f32 %v3125_v61, %v10145_v23  ;;  %8099 = vmatpush3.bf16.msra.mxu0 %v8641_v35  ;;  %8114 = vmatprep.mubr.msk.bf16.mxu0 %vm8893_vm2, %v11149_v2  ;;  %v8654_v41 = vld [vmem:[%s11140_s5 + $0x40] sm:$0xff]  }
 0x354   : > { %v3765_v48 = vmax.f32 %v3171_v47, %v3761_v55  ;;  %v7977_v10 = vpop.f32.mrf.mxu0  ;;  %8100 = vmatprep.subr.bf16.mxu0 %v11149_v2  ;;  %v3769_v20 = vmax.f32 %v3764_v7, %v3767_v46  ;;  %v8659_v46 = vld [vmem:[%s11140_s5 + $0x1f0] sm:$0xff]  }
 0x355   : > { %8021 = vmatpush3.bf16.msra.mxu1 %v8642_v42 }
 0x356   : > { %v4099_v63 = vrot.slane %v3765_v48, 1  ;;  %v3130_v54 = vpop.f32.mrf.mxu0  ;;  %8022 = vmatprep.subr.bf16.mxu1 %v11149_v2  ;;  %v3770_v14 = vadd.f32 %v3769_v20, %v10183_v11  ;;  %v8662_v20 = vld [vmem:[%s11140_s5 + $0xa0] sm:$0xff]  }
 0x357   : > { %v3175_v23 = vadd.f32 %v3130_v54, %v10148_v18  ;;  %8101 = vmatpush3.bf16.msra.mxu0 %v8643_v29 }
 0x358   : > { %v10223_v28 = vmax.f32 %v3765_v48, %v4099_v63  ;;  %v7980_v45 = vpop.f32.mrf.mxu0  ;;  %8102 = vmatprep.subr.bf16.mxu0 %v11149_v2  ;;  %v3771_v35 = vmax.f32 %v3770_v14, 0.0  ;;  %v8656_v63 = vld [vmem:[%s11140_s5 + $0xb8] sm:$0xff]  }
 0x359   : > { %v4325_v19 = vrot.slane %v3175_v23, 5  ;;  %8023 = vmatpush3.bf16.msra.mxu1 %v8644_v32  ;;  %v3334_v23 = vrot.slane %v10192_v59, 1  ;;  %v8657_v45 = vld [vmem:[%s11140_s5 + $0x1f8] sm:$0xff]  }
 0x35a   : > { %v10231_v58 = vadd.f32 %v10223_v28, %v10183_v11  ;;  %v3133_v18 = vpop.f32.mrf.mxu0  ;;  %8024 = vmatprep.subr.bf16.mxu1 %v11149_v2  ;;  %v10286_v29 = vpack.c.bf16 %v3771_v35, %v3771_v35  ;;  %v8665_v14 = vld [vmem:[%s11140_s5 + $0x1d8] sm:$0xff]  }
 0x35b   : > { %v4330_v57 = vmax.f32 %v3173_v49, %v4325_v19  ;;  %v3176_v17 = vadd.f32 %v3133_v18, %v10151_v30  ;;  %8103 = vmatpush3.bf16.msra.mxu0 %v8645_v38  ;;  %v8653_v49 = vld [vmem:[%s11140_s5 + $0x148] sm:$0xff]   ;;  %v8673_v35 = vld [vmem:[%s11140_s5 + $0x278] sm:$0xff]  }
 0x35c   : > { %v7981_v27 = vpop.f32.mrf.mxu0  ;;  %8104 = vmatprep.subr.bf16.mxu0 %v11149_v2  ;;  %v3791_v18 = vrot.slane %v10286_v29, 1 }
 0x35d   : > { %v4333_v4 = vrot.slane %v4330_v57, 1  ;;  %v4326_v31 = vrot.slane %v3176_v17, 5  ;;  %8025 = vmatpush3.bf16.msra.mxu1 %v8646_v52 }
 0x35e   : > { %v3138_v51 = vpop.f32.mrf.mxu0  ;;  %8026 = vmatprep.subr.bf16.mxu1 %v11149_v2 }
 0x35f   : > { %v4335_v30 = vmax.f32 %v4330_v57, %v4333_v4  ;;  %v4327_v36 = vsel %vm3187_vm7, %v4325_v19, %v4326_v31  ;;  %v3177_v53 = vadd.f32 %v3138_v51, %v10154_v9  ;;  %8105 = vmatpush3.bf16.msra.mxu0 %v8647_v24  ;;  %v8658_v57 = vld [vmem:[%s11140_s5 + $0xb0] sm:$0xff]  }
 0x360   : > { %v4331_v47 = vmax.f32 %v3174_v3, %v4327_v36  ;;  %v7984_v22 = vpop.f32.mrf.mxu0  ;;  %8106 = vmatprep.subr.bf16.mxu0 %v11149_v2  ;;  %v8655_v3 = vld [vmem:[%s11140_s5 + $0x140] sm:$0xff]   ;;  %v8661_v36 = vld [vmem:[%s11140_s5 + $0x1e8] sm:$0xff]  }
 0x361   : > { %v10250_v37 = vadd.f32 %v4335_v30, %v10183_v11  ;;  %8027 = vmatpush3.bf16.msra.mxu1 %v8648_v6  ;;  %v8660_v6 = vld [vmem:[%s11140_s5 + $0xa8] sm:$0xff]  }
 0x362   : > { %v4557_v33 = vrot.slane %v4331_v47, 1  ;;  %v3141_v9 = vpop.f32.mrf.mxu0  ;;  %8028 = vmatprep.subr.bf16.mxu1 %v11149_v2 }
 0x363   : > { %v3178_v8 = vadd.f32 %v3141_v9, %v10157_v56  ;;  %8107 = vmatpush3.bf16.msra.mxu0 %v8649_v40 }
 0x364   : > { %v10261_v16 = vmax.f32 %v4331_v47, %v4557_v33  ;;  %v7985_v43 = vpop.f32.mrf.mxu0  ;;  %8108 = vmatprep.subr.bf16.mxu0 %v11149_v2 }
 0x365   : > { %v4891_v26 = vrot.slane %v3178_v8, 5  ;;  %8029 = vmatpush3.bf16.msra.mxu1 %v8650_v34  ;;  %v8663_v34 = vld [vmem:[%s11140_s5 + $0x1e0] sm:$0xff]   ;;  %v8664_v8 = vld [vmem:[%s11140_s5 + $0x98] sm:$0xff]   ;;  %v8666_v43 = vld [vmem:[%s11140_s5 + $0x90] sm:$0xff]  }
 0x366   : > { %v10269_v56 = vadd.f32 %v10261_v16, %v10183_v11  ;;  %v3146_v50 = vpop.f32.mrf.mxu0  ;;  %8030 = vmatprep.subr.bf16.mxu1 %v11149_v2 }
 0x367   : > { %v4896_v12 = vmax.f32 %v3176_v17, %v4891_v26  ;;  %v3179_v5 = vadd.f32 %v3146_v50, %v10160_v25  ;;  %8109 = vmatpush3.bf16.msra.mxu0 %v8651_v44  ;;  %v8670_v50 = vld [vmem:[%s11140_s5 + $0x80] sm:$0xff]  }
 0x368   : > { %v7988_v21 = vpop.f32.mrf.mxu0  ;;  %8110 = vmatprep.subr.bf16.mxu0 %v11149_v2 }
 0x369   : > { %v4899_v7 = vrot.slane %v4896_v12, 1  ;;  %v4892_v0 = vrot.slane %v3179_v5, 5  ;;  %8031 = vmatpush3.bf16.msra.mxu1 %v8652_v1  ;;  %v8669_v1 = vld [vmem:[%s11140_s5 + $0x1c8] sm:$0xff]   ;;  %v8672_v5 = vld [vmem:[%s11140_s5 + $0x138] sm:$0xff]   ;;  %v4007_v21 = vrot.slane %v10286_v29, 3 }
 0x36a   : > { %v3149_v42 = vpop.f32.mrf.mxu0  ;;  %8032 = vmatprep.subr.bf16.mxu1 %v11149_v2 }
 0x36b   : > { %v4901_v25 = vmax.f32 %v4896_v12, %v4899_v7  ;;  %v4893_v61 = vsel %vm3187_vm7, %v4891_v26, %v4892_v0  ;;  %v3180_v55 = vadd.f32 %v3149_v42, %v10163_v62  ;;  %8111 = vmatpush3.bf16.msra.mxu0 %v8653_v49  ;;  %v8668_v26 = vld [vmem:[%s11140_s5 + $0x88] sm:$0xff]   ;;  %v8671_v12 = vld [vmem:[%s11140_s5 + $0x1c0] sm:$0xff]   ;;  %v3442_v49 = vrot.slane %v10192_v59, 2  ;;  %v8674_v7 = vld [vmem:[%s11140_s5 + $0x130] sm:$0xff]  }
 0x36c   : > { %v4897_v48 = vmax.f32 %v3177_v53, %v4893_v61  ;;  %v7989_v10 = vpop.f32.mrf.mxu0  ;;  %8112 = vmatprep.subr.bf16.mxu0 %v11149_v2  ;;  %v8675_v59 = vld [vmem:[%s11140_s5 + $0x270] sm:$0xff]   ;;  %v8676_v0 = vld [vmem:[%s11140_s5 + $0x128] sm:$0xff]   ;;  %v8678_v42 = vld [vmem:[%s11140_s5 + $0x120] sm:$0xff]  }
 0x36d   : > { %v10290_v32 = vadd.f32 %v4901_v25, %v10183_v11  ;;  %8033 = vmatpush3.bf16.msra.mxu1 %v8654_v41  ;;  %v8677_v41 = vld [vmem:[%s11140_s5 + $0x268] sm:$0xff]   ;;  %v8679_v25 = vld [vmem:[%s11140_s5 + $0x260] sm:$0xff]   ;;  %v8680_v61 = vld [vmem:[%s11140_s5 + $0x118] sm:$0xff]  }
 0x36e   : > { %v5015_v62 = vrot.slane %v4897_v48, 1  ;;  %v3154_v54 = vpop.f32.mrf.mxu0  ;;  %8038 = vmatprep.subr.bf16.mxu1 %v11149_v2 }
 0x36f   : > { %v3181_v38 = vadd.f32 %v3154_v54, %v10166_v60  ;;  %8113 = vmatpush3.bf16.msra.mxu0 %v8655_v3  ;;  %v8681_v3 = vld [vmem:[%s11140_s5 + $0x258] sm:$0xff]  }
 0x370   : > { %v10301_v19 = vmax.f32 %v4897_v48, %v5015_v62  ;;  %8035 = vmatmul.mubr.bf16.vlgmr.msra.gmra.mxu1 %v3334_v23  ;;  %v7992_v52 = vpop.f32.mrf.mxu0  ;;  %8138 = vmatprep.subr.bf16.mxu0 %v11149_v2  ;;  %v8682_v48 = vld [vmem:[%s11140_s5 + $0x110] sm:$0xff]   ;;  %v8684_v62 = vld [vmem:[%s11140_s5 + $0x108] sm:$0xff]   ;;  %v4212_v23 = vmax.f32 %v10231_v58, 0.0  ;;  %v8688_v58 = vld [vmem:[%s11140_s5 + $0x1b8] sm:$0xff]  }
 0x371   : > { %8039 = vmatpush3.bf16.msra.mxu1 %v8656_v63  ;;  %8054 = vmatprep.mubr.msk.bf16.mxu1 %vm8893_vm2, %v11149_v2  ;;  %v5457_v4 = vrot.slane %v3181_v38, 5  ;;  %v8683_v63 = vld [vmem:[%s11140_s5 + $0x250] sm:$0xff]   ;;  %v8687_v52 = vld [vmem:[%s11140_s5 + $0x240] sm:$0xff]  }
 0x372   : > { %v10312_v60 = vadd.f32 %v10301_v19, %v10183_v11  ;;  %8115 = vmatmul.mubr.bf16.vlgmr.msra.gmra.mxu0 %v3791_v18  ;;  %v3157_v17 = vpop.f32.mrf.mxu0  ;;  %8040 = vmatprep.subr.bf16.mxu1 %v11149_v2  ;;  %v4213_v18 = vpack.c.bf16 %v4212_v23, %v4212_v23  ;;  %v8726_v23 = vld [vmem:[%s11140_s5 + $0x2a0] sm:$0xff]  }
 0x373   : > { %v3182_v24 = vadd.f32 %v3157_v17, %v10169_v15  ;;  %8139 = vmatpush3.bf16.msra.mxu0 %v8657_v45  ;;  %8154 = vmatprep.mubr.msk.bf16.mxu0 %vm8893_vm2, %v11149_v2  ;;  %v8689_v17 = vld [vmem:[%s11140_s5 + $0x2f8] sm:$0xff]  }
 0x374   : > { %v7993_v27 = vpop.f32.mrf.mxu0  ;;  %8140 = vmatprep.subr.bf16.mxu0 %v11149_v2 }
 0x375   : > { %v5458_v31 = vrot.slane %v3182_v24, 5  ;;  %8041 = vmatpush3.bf16.msra.mxu1 %v8658_v57  ;;  %v4232_v24 = vrot.slane %v4213_v18, 1  ;;  %v8691_v27 = vld [vmem:[%s11140_s5 + $0x2f0] sm:$0xff]  }
 0x376   : > { %v3162_v51 = vpop.f32.mrf.mxu0  ;;  %8042 = vmatprep.subr.bf16.mxu1 %v11149_v2  ;;  %v8730_v18 = vld [vmem:[%s11140_s5 + $0x290] sm:$0xff]  }
 0x377   : > { %v5459_v15 = vsel %vm3187_vm7, %v5457_v4, %v5458_v31  ;;  %v10327_v30 = vmax.f32 %v3181_v38, %v5458_v31  ;;  %8141 = vmatpush3.bf16.msra.mxu0 %v8659_v46  ;;  %v8686_v38 = vld [vmem:[%s11140_s5 + $0x100] sm:$0xff]   ;;  %v8690_v46 = vld [vmem:[%s11140_s5 + $0x1b0] sm:$0xff]   ;;  %v8692_v4 = vld [vmem:[%s11140_s5 + $0x1a8] sm:$0xff]  }
 0x378   : > { %v5462_v53 = vmax.f32 %v3180_v55, %v5459_v15  ;;  %v7996_v40 = vpop.f32.mrf.mxu0  ;;  %8142 = vmatprep.subr.bf16.mxu0 %v11149_v2  ;;  %v3642_v55 = vrot.slane %v10180_v39, 1  ;;  %v8693_v31 = vld [vmem:[%s11140_s5 + $0x2e8] sm:$0xff]   ;;  %v8695_v51 = vld [vmem:[%s11140_s5 + $0x2e0] sm:$0xff]   ;;  %v8696_v15 = vld [vmem:[%s11140_s5 + $0x198] sm:$0xff]  }
 0x379   : > { %8043 = vmatpush3.bf16.msra.mxu1 %v8660_v6  ;;  %v8694_v6 = vld [vmem:[%s11140_s5 + $0x1a0] sm:$0xff]   ;;  %v8699_v40 = vld [vmem:[%s11140_s5 + $0x2d0] sm:$0xff]  }
 0x37a   : > { %v5465_v47 = vrot.slane %v5462_v53, 1  ;;  %v3164_v22 = vpop.f32.mrf.mxu0  ;;  %8044 = vmatprep.subr.bf16.mxu1 %v11149_v2  ;;  %v3644_v10 = vmax.f32 %v10180_v39, %v3642_v55  ;;  %v8685_v39 = vld [vmem:[%s11140_s5 + $0x248] sm:$0xff]  }
 0x37b   : > { %8143 = vmatpush3.bf16.msra.mxu0 %v8661_v36  ;;  %v8697_v36 = vld [vmem:[%s11140_s5 + $0x2d8] sm:$0xff]   ;;  %v4337_v22 = vmax.f32 %v10250_v37, 0.0 }
 0x37c   : > { %v10340_v33 = vmax.f32 %v5462_v53, %v5465_v47  ;;  %v7997_v9 = vpop.f32.mrf.mxu0  ;;  %8144 = vmatprep.subr.bf16.mxu0 %v11149_v2  ;;  %v3645_v54 = vadd.f32 %v3644_v10, %v10177_v13  ;;  %v8698_v53 = vld [vmem:[%s11140_s5 + $0x190] sm:$0xff]   ;;  %v8701_v47 = vld [vmem:[%s11140_s5 + $0x2c8] sm:$0xff]   ;;  %v8704_v37 = vld [vmem:[%s11140_s5 + $0x238] sm:$0xff]  }
 0x37d   : > { %8045 = vmatpush3.bf16.msra.mxu1 %v8662_v20  ;;  %v8700_v20 = vld [vmem:[%s11140_s5 + $0x188] sm:$0xff]   ;;  %v8703_v9 = vld [vmem:[%s11140_s5 + $0x2c0] sm:$0xff]  }
 0x37e   : > { %v10348_v44 = vadd.f32 %v10340_v33, %v10183_v11  ;;  %8046 = vmatprep.subr.bf16.mxu1 %v11149_v2  ;;  %v8667_v11 = vld [vmem:[%s11140_s5 + $0x1d0] sm:$0xff]   ;;  %v3646_v45 = vmax.f32 %v3645_v54, 0.0  ;;  %v8724_v54 = vld [vmem:[%s11140_s5 + $0x2a8] sm:$0xff]  }
 0x37f   : > { %8145 = vmatpush3.bf16.msra.mxu0 %v8663_v34  ;;  %v8702_v34 = vld [vmem:[%s11140_s5 + $0x180] sm:$0xff]  }
 0x380   : > { %8146 = vmatprep.subr.bf16.mxu0 %v11149_v2  ;;  %v3647_v57 = vpack.c.bf16 %v3646_v45, %v3646_v45  ;;  %v8728_v45 = vld [vmem:[%s11140_s5 + $0x298] sm:$0xff]  }
 0x381   : > { %8047 = vmatpush3.bf16.msra.mxu1 %v8664_v8  ;;  %v10521_v8 = vpack.c.bf16 %v4337_v22, %v4337_v22 }
 0x382   : > { %8048 = vmatprep.subr.bf16.mxu1 %v11149_v2 }
 0x383   : > { %8147 = vmatpush3.bf16.msra.mxu0 %v8665_v14  ;;  %v3899_v14 = vrot.slane %v10286_v29, 2  ;;  %v8707_v29 = vld [vmem:[%s11140_s5 + $0x370] sm:$0xff]  }
 0x384   : > { %8148 = vmatprep.subr.bf16.mxu0 %v11149_v2 }
 0x385   : > { %8049 = vmatpush3.bf16.msra.mxu1 %v8666_v43  ;;  %v8705_v43 = vld [vmem:[%s11140_s5 + $0x378] sm:$0xff]  }
 0x386   : > { %8050 = vmatprep.subr.bf16.mxu1 %v11149_v2 }
 0x387   : > { %8149 = vmatpush3.bf16.msra.mxu0 %v8667_v11  ;;  %v4465_v11 = vrot.slane %v10521_v8, 3 }
 0x388   : > { %8150 = vmatprep.subr.bf16.mxu0 %v11149_v2 }
 0x389   : > { %8051 = vmatpush3.bf16.msra.mxu1 %v8668_v26  ;;  %v8706_v26 = vld [vmem:[%s11140_s5 + $0x230] sm:$0xff]  }
 0x38a   : > { %8052 = vmatprep.subr.bf16.mxu1 %v11149_v2 }
 0x38b   : > { %8151 = vmatpush3.bf16.msra.mxu0 %v8669_v1  ;;  %v8708_v1 = vld [vmem:[%s11140_s5 + $0x228] sm:$0xff]  }
 0x38c   : > { %8152 = vmatprep.subr.bf16.mxu0 %v11149_v2 }
 0x38d   : > { %8053 = vmatpush3.bf16.msra.mxu1 %v8670_v50  ;;  %v8709_v50 = vld [vmem:[%s11140_s5 + $0x368] sm:$0xff]  }
 0x38e   : > { %8078 = vmatprep.subr.bf16.mxu1 %v11149_v2 }
 0x38f   : > { %8153 = vmatpush3.bf16.msra.mxu0 %v8671_v12  ;;  %v8710_v12 = vld [vmem:[%s11140_s5 + $0x220] sm:$0xff]  }
 0x390   : > { %8055 = vmatmul.mubr.bf16.vlgmr.msra.gmra.mxu1 %v3442_v49  ;;  %8178 = vmatprep.subr.bf16.mxu0 %v11149_v2  ;;  %v8712_v49 = vld [vmem:[%s11140_s5 + $0x218] sm:$0xff]  }
 0x391   : > { %8079 = vmatpush3.bf16.msra.mxu1 %v8672_v5  ;;  %8094 = vmatprep.mubr.msk.bf16.mxu1 %vm8893_vm2, %v11149_v2  ;;  %v8711_v5 = vld [vmem:[%s11140_s5 + $0x360] sm:$0xff]  }
 0x392   : > { %8155 = vmatmul.mubr.bf16.vlgmr.msra.gmra.mxu0 %v4007_v21  ;;  %8080 = vmatprep.subr.bf16.mxu1 %v11149_v2  ;;  %v8714_v21 = vld [vmem:[%s11140_s5 + $0x210] sm:$0xff]  }
 0x393   : > { %8179 = vmatpush3.bf16.msra.mxu0 %v8673_v35  ;;  %8194 = vmatprep.mubr.msk.bf16.mxu0 %vm8893_vm2, %v11149_v2  ;;  %v8713_v35 = vld [vmem:[%s11140_s5 + $0x358] sm:$0xff]  }
 0x394   : > { %8180 = vmatprep.subr.bf16.mxu0 %v11149_v2 }
 0x395   : > { %8081 = vmatpush3.bf16.msra.mxu1 %v8674_v7  ;;  %v8715_v7 = vld [vmem:[%s11140_s5 + $0x350] sm:$0xff]  }
 0x396   : > { %8082 = vmatprep.subr.bf16.mxu1 %v11149_v2 }
 0x397   : > { %8181 = vmatpush3.bf16.msra.mxu0 %v8675_v59  ;;  %v8716_v59 = vld [vmem:[%s11140_s5 + $0x208] sm:$0xff]  }
 0x398   : > { %8182 = vmatprep.subr.bf16.mxu0 %v11149_v2 }
 0x399   : > { %8083 = vmatpush3.bf16.msra.mxu1 %v8676_v0  ;;  %v4102_v0 = vadd.f32 %v10223_v28, %v10177_v13  ;;  %v8719_v28 = vld [vmem:[%s11140_s5 + $0x340] sm:$0xff]  }
 0x39a   : > { %8084 = vmatprep.subr.bf16.mxu1 %v11149_v2 }
 0x39b   : > { %8183 = vmatpush3.bf16.msra.mxu0 %v8677_v41  ;;  %v8717_v41 = vld [vmem:[%s11140_s5 + $0x348] sm:$0xff]  }
 0x39c   : > { %8184 = vmatprep.subr.bf16.mxu0 %v11149_v2 }
 0x39d   : > { %8085 = vmatpush3.bf16.msra.mxu1 %v8678_v42  ;;  %v4670_v42 = vmax.f32 %v10269_v56, 0.0  ;;  %v8720_v56 = vld [vmem:[%s11140_s5 + $0x2b8] sm:$0xff]  }
 0x39e   : > { %8086 = vmatprep.subr.bf16.mxu1 %v11149_v2 }
 0x39f   : > { %8185 = vmatpush3.bf16.msra.mxu0 %v8679_v25  ;;  %v8718_v25 = vld [vmem:[%s11140_s5 + $0x200] sm:$0xff]   ;;  %v10596_v55 = vpack.c.bf16 %v4670_v42, %v4670_v42  ;;  %v8753_v42 = vld [vmem:[%s11140_s5 + $0x4f8] sm:$0xff]  }
 0x3a0   : > { %8186 = vmatprep.subr.bf16.mxu0 %v11149_v2 }
 0x3a1   : > { %8087 = vmatpush3.bf16.msra.mxu1 %v8680_v61  ;;  %v4103_v61 = vmax.f32 %v4102_v0, 0.0  ;;  %v4690_v10 = vrot.slane %v10596_v55, 1 }
 0x3a2   : > { %8088 = vmatprep.subr.bf16.mxu1 %v11149_v2 }
 0x3a3   : > { %8187 = vmatpush3.bf16.msra.mxu0 %v8681_v3  ;;  %v4104_v3 = vpack.c.bf16 %v4103_v61, %v4103_v61 }
 0x3a4   : > { %8188 = vmatprep.subr.bf16.mxu0 %v11149_v2 }
 0x3a5   : > { %8089 = vmatpush3.bf16.msra.mxu1 %v8682_v48  ;;  %v8721_v48 = vld [vmem:[%s11140_s5 + $0x3f8] sm:$0xff]  }
 0x3a6   : > { %8090 = vmatprep.subr.bf16.mxu1 %v11149_v2 }
 0x3a7   : > { %8189 = vmatpush3.bf16.msra.mxu0 %v8683_v63  ;;  %v8722_v63 = vld [vmem:[%s11140_s5 + $0x2b0] sm:$0xff]  }
 0x3a8   : > { %8190 = vmatprep.subr.bf16.mxu0 %v11149_v2 }
 0x3a9   : > { %8091 = vmatpush3.bf16.msra.mxu1 %v8684_v62  ;;  %v8723_v62 = vld [vmem:[%s11140_s5 + $0x3f0] sm:$0xff]  }
 0x3aa   : > { %8092 = vmatprep.subr.bf16.mxu1 %v11149_v2 }
 0x3ab   : > { %8191 = vmatpush3.bf16.msra.mxu0 %v8685_v39  ;;  %v8725_v39 = vld [vmem:[%s11140_s5 + $0x3e8] sm:$0xff]  }
 0x3ac   : > { %8192 = vmatprep.subr.bf16.mxu0 %v11149_v2 }
 0x3ad   : > { %8093 = vmatpush3.bf16.msra.mxu1 %v8686_v38  ;;  %v8727_v38 = vld [vmem:[%s11140_s5 + $0x3e0] sm:$0xff]  }
 0x3ae   : > { %8118 = vmatprep.subr.bf16.mxu1 %v11149_v2 }
 0x3af   : > { %8193 = vmatpush3.bf16.msra.mxu0 %v8687_v52  ;;  %v8729_v52 = vld [vmem:[%s11140_s5 + $0x3d8] sm:$0xff]  }
 0x3b0   : > { %8095 = vmatmul.mubr.bf16.vlgmr.msra.gmra.mxu1 %v3647_v57  ;;  %8218 = vmatprep.subr.bf16.mxu0 %v11149_v2  ;;  %v8732_v57 = vld [vmem:[%s11140_s5 + $0x288] sm:$0xff]  }
 0x3b1   : > { %8119 = vmatpush3.bf16.msra.mxu1 %v8688_v58  ;;  %8134 = vmatprep.mubr.msk.bf16.mxu1 %vm8893_vm2, %v11149_v2  ;;  %v8731_v58 = vld [vmem:[%s11140_s5 + $0x3d0] sm:$0xff]  }
 0x3b2   : > { %8195 = vmatmul.mubr.bf16.vlgmr.msra.gmra.mxu0 %v4232_v24  ;;  %8120 = vmatprep.subr.bf16.mxu1 %v11149_v2  ;;  %v4903_v24 = vmax.f32 %v10290_v32, 0.0  ;;  %v8736_v32 = vld [vmem:[%s11140_s5 + $0x338] sm:$0xff]  }
 0x3b3   : > { %8219 = vmatpush3.bf16.msra.mxu0 %v8689_v17  ;;  %8234 = vmatprep.mubr.msk.bf16.mxu0 %vm8893_vm2, %v11149_v2  ;;  %v8733_v17 = vld [vmem:[%s11140_s5 + $0x3c8] sm:$0xff]  }
 0x3b4   : > { %8220 = vmatprep.subr.bf16.mxu0 %v11149_v2 }
 0x3b5   : > { %8121 = vmatpush3.bf16.msra.mxu1 %v8690_v46  ;;  %v8734_v46 = vld [vmem:[%s11140_s5 + $0x280] sm:$0xff]  }
 0x3b6   : > { %8122 = vmatprep.subr.bf16.mxu1 %v11149_v2 }
 0x3b7   : > { %8221 = vmatpush3.bf16.msra.mxu0 %v8691_v27  ;;  %v8735_v27 = vld [vmem:[%s11140_s5 + $0x3c0] sm:$0xff]  }
 0x3b8   : > { %8222 = vmatprep.subr.bf16.mxu0 %v11149_v2 }
 0x3b9   : > { %8123 = vmatpush3.bf16.msra.mxu1 %v8692_v4  ;;  %v4904_v4 = vpack.c.bf16 %v4903_v24, %v4903_v24  ;;  %v8763_v24 = vld [vmem:[%s11140_s5 + $0x4d0] sm:$0xff]  }
 0x3ba   : > { %8124 = vmatprep.subr.bf16.mxu1 %v11149_v2 }
 0x3bb   : > { %8223 = vmatpush3.bf16.msra.mxu0 %v8693_v31  ;;  %v4357_v31 = vrot.slane %v10521_v8, 2 }
 0x3bc   : > { %8224 = vmatprep.subr.bf16.mxu0 %v11149_v2 }
 0x3bd   : > { %8125 = vmatpush3.bf16.msra.mxu1 %v8694_v6  ;;  %v8737_v6 = vld [vmem:[%s11140_s5 + $0x478] sm:$0xff]  }
 0x3be   : > { %8126 = vmatprep.subr.bf16.mxu1 %v11149_v2 }
 0x3bf   : > { %8225 = vmatpush3.bf16.msra.mxu0 %v8695_v51  ;;  %v4923_v51 = vrot.slane %v4904_v4, 3  ;;  %v8766_v4 = vld [vmem:[%s11140_s5 + $0x380] sm:$0xff]  }
 0x3c0   : > { %8226 = vmatprep.subr.bf16.mxu0 %v11149_v2 }
 0x3c1   : > { %8127 = vmatpush3.bf16.msra.mxu1 %v8696_v15 }
 0x3c2   : > { %8128 = vmatprep.subr.bf16.mxu1 %v11149_v2 }
 0x3c3   : > { %8227 = vmatpush3.bf16.msra.mxu0 %v8697_v36  ;;  %v8738_v36 = vld [vmem:[%s11140_s5 + $0x330] sm:$0xff]  }
 0x3c4   : > { %8228 = vmatprep.subr.bf16.mxu0 %v11149_v2 }
 0x3c5   : > { %8129 = vmatpush3.bf16.msra.mxu1 %v8698_v53 }
 0x3c6   : > { %8130 = vmatprep.subr.bf16.mxu1 %v11149_v2 }
 0x3c7   : > { %8229 = vmatpush3.bf16.msra.mxu0 %v8699_v40 }
 0x3c8   : > { %8230 = vmatprep.subr.bf16.mxu0 %v11149_v2 }
 0x3c9   : > { %8131 = vmatpush3.bf16.msra.mxu1 %v8700_v20  ;;  %v8739_v20 = vld [vmem:[%s11140_s5 + $0x470] sm:$0xff]  }
 0x3ca   : > { %8132 = vmatprep.subr.bf16.mxu1 %v11149_v2 }
 0x3cb   : > { %8231 = vmatpush3.bf16.msra.mxu0 %v8701_v47 }
 0x3cc   : > { %8232 = vmatprep.subr.bf16.mxu0 %v11149_v2 }
 0x3cd   : > { %8133 = vmatpush3.bf16.msra.mxu1 %v8702_v34  ;;  %v8740_v34 = vld [vmem:[%s11140_s5 + $0x328] sm:$0xff]  }
 0x3ce   : > { %8158 = vmatprep.subr.bf16.mxu1 %v11149_v2 }
 0x3cf   : > { %8233 = vmatpush3.bf16.msra.mxu0 %v8703_v9 }
 0x3d0   : > { %8135 = vmatmul.mubr.bf16.vlgmr.msra.gmra.mxu1 %v3899_v14  ;;  %8258 = vmatprep.subr.bf16.mxu0 %v11149_v2 }
 0x3d1   : > { %8159 = vmatpush3.bf16.msra.mxu1 %v8704_v37  ;;  %8174 = vmatprep.mubr.msk.bf16.mxu1 %vm8893_vm2, %v11149_v2  ;;  %v8741_v37 = vld [vmem:[%s11140_s5 + $0x468] sm:$0xff]  }
 0x3d2   : > { %8235 = vmatmul.mubr.bf16.vlgmr.msra.gmra.mxu0 %v4465_v11  ;;  %8160 = vmatprep.subr.bf16.mxu1 %v11149_v2  ;;  %v8743_v11 = vld [vmem:[%s11140_s5 + $0x460] sm:$0xff]  }
 0x3d3   : > { %8259 = vmatpush3.bf16.msra.mxu0 %v8705_v43  ;;  %8274 = vmatprep.mubr.msk.bf16.mxu0 %vm8893_vm2, %v11149_v2  ;;  %v8742_v43 = vld [vmem:[%s11140_s5 + $0x320] sm:$0xff]  }
 0x3d4   : > { %8260 = vmatprep.subr.bf16.mxu0 %v11149_v2 }
 0x3d5   : > { %8161 = vmatpush3.bf16.msra.mxu1 %v8706_v26  ;;  %v8744_v26 = vld [vmem:[%s11140_s5 + $0x318] sm:$0xff]  }
 0x3d6   : > { %8162 = vmatprep.subr.bf16.mxu1 %v11149_v2 }
 0x3d7   : > { %8261 = vmatpush3.bf16.msra.mxu0 %v8707_v29  ;;  %v8745_v29 = vld [vmem:[%s11140_s5 + $0x458] sm:$0xff]  }
 0x3d8   : > { %8262 = vmatprep.subr.bf16.mxu0 %v11149_v2 }
 0x3d9   : > { %8163 = vmatpush3.bf16.msra.mxu1 %v8708_v1  ;;  %v8746_v1 = vld [vmem:[%s11140_s5 + $0x310] sm:$0xff]  }
 0x3da   : > { %8164 = vmatprep.subr.bf16.mxu1 %v11149_v2 }
 0x3db   : > { %8263 = vmatpush3.bf16.msra.mxu0 %v8709_v50  ;;  %v8747_v50 = vld [vmem:[%s11140_s5 + $0x450] sm:$0xff]  }
 0x3dc   : > { %8264 = vmatprep.subr.bf16.mxu0 %v11149_v2 }
 0x3dd   : > { %8165 = vmatpush3.bf16.msra.mxu1 %v8710_v12  ;;  %v8748_v12 = vld [vmem:[%s11140_s5 + $0x308] sm:$0xff]  }
 0x3de   : > { %8166 = vmatprep.subr.bf16.mxu1 %v11149_v2 }
 0x3df   : > { %8265 = vmatpush3.bf16.msra.mxu0 %v8711_v5  ;;  %v4560_v5 = vadd.f32 %v10261_v16, %v10177_v13  ;;  %v8751_v13 = vld [vmem:[%s11140_s5 + $0x440] sm:$0xff]  }
 0x3e0   : > { %8266 = vmatprep.subr.bf16.mxu0 %v11149_v2 }
 0x3e1   : > { %8167 = vmatpush3.bf16.msra.mxu1 %v8712_v49  ;;  %v8749_v49 = vld [vmem:[%s11140_s5 + $0x448] sm:$0xff]  }
 0x3e2   : > { %8168 = vmatprep.subr.bf16.mxu1 %v11149_v2 }
 0x3e3   : > { %8267 = vmatpush3.bf16.msra.mxu0 %v8713_v35  ;;  %v5128_v35 = vmax.f32 %v10312_v60, 0.0  ;;  %v3183_v60 = vld [vmem:[%s11141_s6] sm:$0x1] }
 0x3e4   : > { %8268 = vmatprep.subr.bf16.mxu0 %v11149_v2 }
 0x3e5   : > { %8169 = vmatpush3.bf16.msra.mxu1 %v8714_v21  ;;  %v8750_v21 = vld [vmem:[%s11140_s5 + $0x300] sm:$0xff]   ;;  %v10744_v16 = vpack.c.bf16 %v5128_v35, %v5128_v35 }
 0x3e6   : > { %8170 = vmatprep.subr.bf16.mxu1 %v11149_v2  ;;  %v10888_v35 = vld [vmem:[%s11139_s4] sm:$0x1] }
 0x3e7   : > { %8269 = vmatpush3.bf16.msra.mxu0 %v8715_v7  ;;  %v4561_v7 = vmax.f32 %v4560_v5, 0.0  ;;  %v5148_v61 = vrot.slane %v10744_v16, 1  ;;  %v8779_v5 = vld [vmem:[%s11140_s5 + $0x550] sm:$0xff]  }
 0x3e8   : > { %8270 = vmatprep.subr.bf16.mxu0 %v11149_v2 }
 0x3e9   : > { %8171 = vmatpush3.bf16.msra.mxu1 %v8716_v59  ;;  %v8752_v59 = vld [vmem:[%s11140_s5 + $0x3b8] sm:$0xff]   ;;  %v4562_v0 = vpack.c.bf16 %v4561_v7, %v4561_v7  ;;  %v8781_v7 = vld [vmem:[%s11140_s5 + $0x548] sm:$0xff]  }
 0x3ea   : > { %8172 = vmatprep.subr.bf16.mxu1 %v11149_v2 }
 0x3eb   : > { %8271 = vmatpush3.bf16.msra.mxu0 %v8717_v41 }
 0x3ec   : > { %8272 = vmatprep.subr.bf16.mxu0 %v11149_v2 }
 0x3ed   : > { %8173 = vmatpush3.bf16.msra.mxu1 %v8718_v25 }
 0x3ee   : > { %8198 = vmatprep.subr.bf16.mxu1 %v11149_v2 }
 0x3ef   : > { %8273 = vmatpush3.bf16.msra.mxu0 %v8719_v28 }
 0x3f0   : > { %8175 = vmatmul.mubr.bf16.vlgmr.msra.gmra.mxu1 %v4104_v3  ;;  %8298 = vmatprep.subr.bf16.mxu0 %v11149_v2 }
 0x3f1   : > { %8199 = vmatpush3.bf16.msra.mxu1 %v8720_v56  ;;  %8214 = vmatprep.mubr.msk.bf16.mxu1 %vm8893_vm2, %v11149_v2  ;;  %v8754_v56 = vld [vmem:[%s11140_s5 + $0x3b0] sm:$0xff]  }
 0x3f2   : > { %8275 = vmatmul.mubr.bf16.vlgmr.msra.gmra.mxu0 %v4690_v10  ;;  %8200 = vmatprep.subr.bf16.mxu1 %v11149_v2  ;;  %v8755_v10 = vld [vmem:[%s11140_s5 + $0x4f0] sm:$0xff]  }
 0x3f3   : > { %8299 = vmatpush3.bf16.msra.mxu0 %v8721_v48  ;;  %8314 = vmatprep.mubr.msk.bf16.mxu0 %vm8893_vm2, %v11149_v2 }
 0x3f4   : > { %8300 = vmatprep.subr.bf16.mxu0 %v11149_v2 }
 0x3f5   : > { %8201 = vmatpush3.bf16.msra.mxu1 %v8722_v63 }
 0x3f6   : > { %8202 = vmatprep.subr.bf16.mxu1 %v11149_v2 }
 0x3f7   : > { %8301 = vmatpush3.bf16.msra.mxu0 %v8723_v62 }
 0x3f8   : > { %8302 = vmatprep.subr.bf16.mxu0 %v11149_v2 }
 0x3f9   : > { %8203 = vmatpush3.bf16.msra.mxu1 %v8724_v54  ;;  %v8756_v54 = vld [vmem:[%s11140_s5 + $0x3a8] sm:$0xff]  }
 0x3fa   : > { %8204 = vmatprep.subr.bf16.mxu1 %v11149_v2 }
 0x3fb   : > { %8303 = vmatpush3.bf16.msra.mxu0 %v8725_v39 }
 0x3fc   : > { %8304 = vmatprep.subr.bf16.mxu0 %v11149_v2 }
 0x3fd   : > { %8205 = vmatpush3.bf16.msra.mxu1 %v8726_v23 }
 0x3fe   : > { %8206 = vmatprep.subr.bf16.mxu1 %v11149_v2 }
 0x3ff   : > { %8305 = vmatpush3.bf16.msra.mxu0 %v8727_v38  ;;  %v8757_v38 = vld [vmem:[%s11140_s5 + $0x4e8] sm:$0xff]  }
 0x400   : > { %8306 = vmatprep.subr.bf16.mxu0 %v11149_v2 }
 0x401   : > { %8207 = vmatpush3.bf16.msra.mxu1 %v8728_v45 }
 0x402   : > { %8208 = vmatprep.subr.bf16.mxu1 %v11149_v2 }
 0x403   : > { %8307 = vmatpush3.bf16.msra.mxu0 %v8729_v52  ;;  %v8758_v52 = vld [vmem:[%s11140_s5 + $0x3a0] sm:$0xff]  }
 0x404   : > { %8308 = vmatprep.subr.bf16.mxu0 %v11149_v2 }
 0x405   : > { %8209 = vmatpush3.bf16.msra.mxu1 %v8730_v18  ;;  %v8759_v18 = vld [vmem:[%s11140_s5 + $0x4e0] sm:$0xff]  }
 0x406   : > { %8210 = vmatprep.subr.bf16.mxu1 %v11149_v2 }
 0x407   : > { %8309 = vmatpush3.bf16.msra.mxu0 %v8731_v58  ;;  %v8760_v58 = vld [vmem:[%s11140_s5 + $0x398] sm:$0xff]  }
 0x408   : > { %8310 = vmatprep.subr.bf16.mxu0 %v11149_v2 }
 0x409   : > { %8211 = vmatpush3.bf16.msra.mxu1 %v8732_v57  ;;  %v8761_v57 = vld [vmem:[%s11140_s5 + $0x4d8] sm:$0xff]  }
 0x40a   : > { %8212 = vmatprep.subr.bf16.mxu1 %v11149_v2 }
 0x40b   : > { %8311 = vmatpush3.bf16.msra.mxu0 %v8733_v17  ;;  %v8762_v17 = vld [vmem:[%s11140_s5 + $0x390] sm:$0xff]  }
 0x40c   : > { %8312 = vmatprep.subr.bf16.mxu0 %v11149_v2 }
 0x40d   : > { %8213 = vmatpush3.bf16.msra.mxu1 %v8734_v46  ;;  %v8764_v46 = vld [vmem:[%s11140_s5 + $0x388] sm:$0xff]  }
 0x40e   : > { %8238 = vmatprep.subr.bf16.mxu1 %v11149_v2 }
 0x40f   : > { %8313 = vmatpush3.bf16.msra.mxu0 %v8735_v27  ;;  %v8765_v27 = vld [vmem:[%s11140_s5 + $0x4c8] sm:$0xff]  }
 0x410   : > { %8215 = vmatmul.mubr.bf16.vlgmr.msra.gmra.mxu1 %v4357_v31  ;;  %v10677_v15 = vpop.f32.mrf.mxu1  ;;  %8338 = vmatprep.subr.bf16.mxu0 %v11149_v2  ;;  %v8768_v31 = vld [vmem:[%s11140_s5 + $0x438] sm:$0xff]  }
 0x411   : > { %8239 = vmatpush3.bf16.msra.mxu1 %v8736_v32  ;;  %8254 = vmatprep.mubr.msk.bf16.mxu1 %vm8893_vm2, %v11149_v2  ;;  %v3306_v41 = vadd.f32 %v10677_v15, %v3183_v60  ;;  %v8767_v32 = vld [vmem:[%s11140_s5 + $0x4c0] sm:$0xff]  }
 0x412   : > { %8315 = vmatmul.mubr.bf16.vlgmr.msra.gmra.mxu0 %v4923_v51  ;;  %v8016_v53 = vpop.f32.mrf.mxu1  ;;  %v10685_v40 = vpop.f32.mrf.mxu0  ;;  %8240 = vmatprep.subr.bf16.mxu1 %v11149_v2  ;;  %v8769_v51 = vld [vmem:[%s11140_s5 + $0x578] sm:$0xff]   ;;  %v8782_v60 = vld [vmem:[%s11140_s5 + $0x400] sm:$0xff]  }
 0x413   : > { %8339 = vmatpush3.bf16.msra.mxu0 %v8737_v6  ;;  %8354 = vmatprep.mubr.msk.bf16.mxu0 %vm8893_vm2, %v11149_v2  ;;  %v4798_v6 = vrot.slane %v10596_v55, 2  ;;  %v8770_v55 = vld [vmem:[%s11140_s5 + $0x430] sm:$0xff]  }
 0x414   : > { %v3303_v47 = vpop.f32.mrf.mxu1  ;;  %v8076_v22 = vpop.f32.mrf.mxu0  ;;  %8340 = vmatprep.subr.bf16.mxu0 %v11149_v2 }
 0x415   : > { %8241 = vmatpush3.bf16.msra.mxu1 %v8738_v36  ;;  %v5364_v36 = vrot.slane %v10744_v16, 3  ;;  %v8771_v22 = vld [vmem:[%s11140_s5 + $0x570] sm:$0xff]  }
 0x416   : > { %v8017_v9 = vpop.f32.mrf.mxu1  ;;  %v3637_v8 = vpop.f32.mrf.mxu0  ;;  %8242 = vmatprep.subr.bf16.mxu1 %v11149_v2 }
 0x417   : > { %8341 = vmatpush3.bf16.msra.mxu0 %v8739_v20 }
 0x418   : > { %v8077_v14 = vpop.f32.mrf.mxu0  ;;  %8342 = vmatprep.subr.bf16.mxu0 %v11149_v2 }
 0x419   : > { %8243 = vmatpush3.bf16.msra.mxu1 %v8740_v34 }
 0x41a   : > { %8244 = vmatprep.subr.bf16.mxu1 %v11149_v2 }
 0x41b   : > { %8343 = vmatpush3.bf16.msra.mxu0 %v8741_v37  ;;  %v8772_v37 = vld [vmem:[%s11140_s5 + $0x428] sm:$0xff]  }
 0x41c   : > { %8344 = vmatprep.subr.bf16.mxu0 %v11149_v2 }
 0x41d   : > { %8245 = vmatpush3.bf16.msra.mxu1 %v8742_v43 }
 0x41e   : > { %8246 = vmatprep.subr.bf16.mxu1 %v11149_v2 }
 0x41f   : > { %8345 = vmatpush3.bf16.msra.mxu0 %v8743_v11 }
 0x420   : > { %8346 = vmatprep.subr.bf16.mxu0 %v11149_v2 }
 0x421   : > { %8247 = vmatpush3.bf16.msra.mxu1 %v8744_v26  ;;  %v8774_v26 = vld [vmem:[%s11140_s5 + $0x420] sm:$0xff]  }
 0x422   : > { %8248 = vmatprep.subr.bf16.mxu1 %v11149_v2 }
 0x423   : > { %8347 = vmatpush3.bf16.msra.mxu0 %v8745_v29  ;;  %v8775_v29 = vld [vmem:[%s11140_s5 + $0x560] sm:$0xff]  }
 0x424   : > { %8348 = vmatprep.subr.bf16.mxu0 %v11149_v2 }
 0x425   : > { %8249 = vmatpush3.bf16.msra.mxu1 %v8746_v1  ;;  %v8776_v1 = vld [vmem:[%s11140_s5 + $0x418] sm:$0xff]  }
 0x426   : > { %8250 = vmatprep.subr.bf16.mxu1 %v11149_v2 }
 0x427   : > { %8349 = vmatpush3.bf16.msra.mxu0 %v8747_v50  ;;  %v8777_v50 = vld [vmem:[%s11140_s5 + $0x558] sm:$0xff]  }
 0x428   : > { %8350 = vmatprep.subr.bf16.mxu0 %v11149_v2 }
 0x429   : > { %8251 = vmatpush3.bf16.msra.mxu1 %v8748_v12  ;;  %v8778_v12 = vld [vmem:[%s11140_s5 + $0x410] sm:$0xff]  }
 0x42a   : > { %8252 = vmatprep.subr.bf16.mxu1 %v11149_v2 }
 0x42b   : > { %8351 = vmatpush3.bf16.msra.mxu0 %v8749_v49  ;;  %v8780_v49 = vld [vmem:[%s11140_s5 + $0x408] sm:$0xff]  }
 0x42c   : > { %8352 = vmatprep.subr.bf16.mxu0 %v11149_v2 }
 0x42d   : > { %8253 = vmatpush3.bf16.msra.mxu1 %v8750_v21  ;;  %v5018_v21 = vadd.f32 %v10888_v35, %v10301_v19  ;;  %v8783_v19 = vld [vmem:[%s11140_s5 + $0x540] sm:$0xff]  }
 0x42e   : > { %8278 = vmatprep.subr.bf16.mxu1 %v11149_v2 }
 0x42f   : > { %8353 = vmatpush3.bf16.msra.mxu0 %v8751_v13  ;;  %v5578_v13 = vmax.f32 %v10348_v44, 0.0  ;;  %v8784_v44 = vld [vmem:[%s11140_s5 + $0x4b8] sm:$0xff]  }
 0x430   : > { %v3418_v25 = vpop.f32.mrf.mxu1  ;;  %8255 = vmatmul.mubr.bf16.vlgmr.msra.gmra.mxu1 %v4562_v0  ;;  %8378 = vmatprep.subr.bf16.mxu0 %v11149_v2 }
 0x431   : > { %v10760_v28 = vadd.f32 %v3418_v25, %v3306_v41  ;;  %8279 = vmatpush3.bf16.msra.mxu1 %v8752_v59  ;;  %8294 = vmatprep.mubr.msk.bf16.mxu1 %vm8893_vm2, %v11149_v2  ;;  %v5019_v59 = vmax.f32 %v5018_v21, 0.0  ;;  %v10905_v0 = vpack.c.bf16 %v5578_v13, %v5578_v13  ;;  %v8809_v21 = vld [vmem:[%s11140_s5 + $0x5b0] sm:$0xff]  }
 0x432   : > { %v8036_v3 = vpop.f32.mrf.mxu1  ;;  %v10767_v48 = vpop.f32.mrf.mxu0  ;;  %8355 = vmatmul.mubr.bf16.vlgmr.msra.gmra.mxu0 %v5148_v61  ;;  %8280 = vmatprep.subr.bf16.mxu1 %v11149_v2 }
 0x433   : > { %8379 = vmatpush3.bf16.msra.mxu0 %v8753_v42  ;;  %8394 = vmatprep.mubr.msk.bf16.mxu0 %vm8893_vm2, %v11149_v2  ;;  %v5020_v41 = vpack.c.bf16 %v5019_v59, %v5019_v59  ;;  %v8785_v42 = vld [vmem:[%s11140_s5 + $0x5f8] sm:$0xff]   ;;  %v5598_v61 = vrot.slane %v10905_v0, 1 }
 0x434   : > { %v3421_v63 = vpop.f32.mrf.mxu1  ;;  %v8116_v62 = vpop.f32.mrf.mxu0  ;;  %8380 = vmatprep.subr.bf16.mxu0 %v11149_v2 }
 0x435   : > { %8281 = vmatpush3.bf16.msra.mxu1 %v8754_v56  ;;  %v8786_v56 = vld [vmem:[%s11140_s5 + $0x4b0] sm:$0xff]  }
 0x436   : > { %v8037_v39 = vpop.f32.mrf.mxu1  ;;  %v3878_v23 = vpop.f32.mrf.mxu0  ;;  %8282 = vmatprep.subr.bf16.mxu1 %v11149_v2  ;;  %v8787_v63 = vld [vmem:[%s11140_s5 + $0x5f0] sm:$0xff]  }
 0x437   : > { %8381 = vmatpush3.bf16.msra.mxu0 %v8755_v10  ;;  %v8788_v23 = vld [vmem:[%s11140_s5 + $0x4a8] sm:$0xff]  }
 0x438   : > { %v8117_v45 = vpop.f32.mrf.mxu0  ;;  %8382 = vmatprep.subr.bf16.mxu0 %v11149_v2 }
 0x439   : > { %8283 = vmatpush3.bf16.msra.mxu1 %v8756_v54 }
 0x43a   : > { %8284 = vmatprep.subr.bf16.mxu1 %v11149_v2 }
 0x43b   : > { %8383 = vmatpush3.bf16.msra.mxu0 %v8757_v38 }
 0x43c   : > { %8384 = vmatprep.subr.bf16.mxu0 %v11149_v2 }
 0x43d   : > { %8285 = vmatpush3.bf16.msra.mxu1 %v8758_v52 }
 0x43e   : > { %8286 = vmatprep.subr.bf16.mxu1 %v11149_v2 }
 0x43f   : > { %8385 = vmatpush3.bf16.msra.mxu0 %v8759_v18  ;;  %v8790_v18 = vld [vmem:[%s11140_s5 + $0x4a0] sm:$0xff]  }
 0x440   : > { %8386 = vmatprep.subr.bf16.mxu0 %v11149_v2 }
 0x441   : > { %8287 = vmatpush3.bf16.msra.mxu1 %v8760_v58  ;;  %v8791_v58 = vld [vmem:[%s11140_s5 + $0x5e0] sm:$0xff]  }
 0x442   : > { %8288 = vmatprep.subr.bf16.mxu1 %v11149_v2 }
 0x443   : > { %8387 = vmatpush3.bf16.msra.mxu0 %v8761_v57  ;;  %v8792_v57 = vld [vmem:[%s11140_s5 + $0x498] sm:$0xff]  }
 0x444   : > { %8388 = vmatprep.subr.bf16.mxu0 %v11149_v2 }
 0x445   : > { %8289 = vmatpush3.bf16.msra.mxu1 %v8762_v17  ;;  %v8793_v17 = vld [vmem:[%s11140_s5 + $0x5d8] sm:$0xff]  }
 0x446   : > { %8290 = vmatprep.subr.bf16.mxu1 %v11149_v2 }
 0x447   : > { %8389 = vmatpush3.bf16.msra.mxu0 %v8763_v24  ;;  %v8794_v24 = vld [vmem:[%s11140_s5 + $0x490] sm:$0xff]  }
 0x448   : > { %8390 = vmatprep.subr.bf16.mxu0 %v11149_v2 }
 0x449   : > { %8291 = vmatpush3.bf16.msra.mxu1 %v8764_v46  ;;  %v8795_v46 = vld [vmem:[%s11140_s5 + $0x5d0] sm:$0xff]  }
 0x44a   : > { %8292 = vmatprep.subr.bf16.mxu1 %v11149_v2 }
 0x44b   : > { %8391 = vmatpush3.bf16.msra.mxu0 %v8765_v27  ;;  %v8796_v27 = vld [vmem:[%s11140_s5 + $0x488] sm:$0xff]  }
 0x44c   : > { %8392 = vmatprep.subr.bf16.mxu0 %v11149_v2 }
 0x44d   : > { %8293 = vmatpush3.bf16.msra.mxu1 %v8766_v4  ;;  %v8797_v4 = vld [vmem:[%s11140_s5 + $0x5c8] sm:$0xff]  }
 0x44e   : > { %8318 = vmatprep.subr.bf16.mxu1 %v11149_v2 }
 0x44f   : > { %8393 = vmatpush3.bf16.msra.mxu0 %v8767_v32  ;;  %v8798_v32 = vld [vmem:[%s11140_s5 + $0x480] sm:$0xff]  }
 0x450   : > { %v3526_v15 = vpop.f32.mrf.mxu1  ;;  %8295 = vmatmul.mubr.bf16.vlgmr.msra.gmra.mxu1 %v4798_v6  ;;  %8418 = vmatprep.subr.bf16.mxu0 %v11149_v2  ;;  %v8800_v6 = vld [vmem:[%s11140_s5 + $0x538] sm:$0xff]  }
 0x451   : > { %v3532_v53 = vadd.f32 %v3526_v15, %v10760_v28  ;;  %8319 = vmatpush3.bf16.msra.mxu1 %v8768_v31  ;;  %8334 = vmatprep.mubr.msk.bf16.mxu1 %vm8893_vm2, %v11149_v2  ;;  %v8799_v31 = vld [vmem:[%s11140_s5 + $0x5c0] sm:$0xff]  }
 0x452   : > { %v8056_v20 = vpop.f32.mrf.mxu1  ;;  %v10840_v47 = vpop.f32.mrf.mxu0  ;;  %8395 = vmatmul.mubr.bf16.vlgmr.msra.gmra.mxu0 %v5364_v36  ;;  %8320 = vmatprep.subr.bf16.mxu1 %v11149_v2  ;;  %v5814_v36 = vrot.slane %v10905_v0, 3 }
 0x453   : > { %8419 = vmatpush3.bf16.msra.mxu0 %v8769_v51  ;;  %v3640_v34 = vadd.f32 %v10685_v40, %v3532_v53  ;;  %8434 = vmatprep.mubr.msk.bf16.mxu0 %vm8893_vm2, %v11149_v2  ;;  %v8773_v40 = vld [vmem:[%s11140_s5 + $0x568] sm:$0xff]   ;;  %v5256_v51 = vrot.slane %v10744_v16, 2 }
 0x454   : > { %v3529_v9 = vpop.f32.mrf.mxu1  ;;  %v8156_v8 = vpop.f32.mrf.mxu0  ;;  %8420 = vmatprep.subr.bf16.mxu0 %v11149_v2 }
 0x455   : > { %8321 = vmatpush3.bf16.msra.mxu1 %v8770_v55  ;;  %v8801_v55 = vld [vmem:[%s11140_s5 + $0x530] sm:$0xff]   ;;  %v8802_v8 = vld [vmem:[%s11140_s5 + $0x528] sm:$0xff]  }
 0x456   : > { %v8057_v14 = vpop.f32.mrf.mxu1  ;;  %v4094_v43 = vpop.f32.mrf.mxu0  ;;  %8322 = vmatprep.subr.bf16.mxu1 %v11149_v2 }
 0x457   : > { %8421 = vmatpush3.bf16.msra.mxu0 %v8771_v22 }
 0x458   : > { %v8157_v11 = vpop.f32.mrf.mxu0  ;;  %8422 = vmatprep.subr.bf16.mxu0 %v11149_v2 }
 0x459   : > { %8323 = vmatpush3.bf16.msra.mxu1 %v8772_v37  ;;  %v8805_v11 = vld [vmem:[%s11140_s5 + $0x510] sm:$0xff]  }
 0x45a   : > { %8324 = vmatprep.subr.bf16.mxu1 %v11149_v2 }
 0x45b   : > { %8423 = vmatpush3.bf16.msra.mxu0 %v8773_v40  ;;  %v8803_v40 = vld [vmem:[%s11140_s5 + $0x520] sm:$0xff]  }
 0x45c   : > { %8424 = vmatprep.subr.bf16.mxu0 %v11149_v2 }
 0x45d   : > { %8325 = vmatpush3.bf16.msra.mxu1 %v8774_v26  ;;  %v8806_v26 = vld [vmem:[%s11140_s5 + $0x508] sm:$0xff]  }
 0x45e   : > { %8326 = vmatprep.subr.bf16.mxu1 %v11149_v2 }
 0x45f   : > { %8425 = vmatpush3.bf16.msra.mxu0 %v8775_v29  ;;  %v5468_v29 = vadd.f32 %v10888_v35, %v10340_v33 }
 0x460   : > { %8426 = vmatprep.subr.bf16.mxu0 %v11149_v2 }
 0x461   : > { %8327 = vmatpush3.bf16.msra.mxu1 %v8776_v1  ;;  %v8807_v1 = vld [vmem:[%s11140_s5 + $0x500] sm:$0xff]  }
 0x462   : > { %8328 = vmatprep.subr.bf16.mxu1 %v11149_v2 }
 0x463   : > { %8427 = vmatpush3.bf16.msra.mxu0 %v8777_v50  ;;  %v5469_v50 = vmax.f32 %v5468_v29, 0.0 }
 0x464   : > { %8428 = vmatprep.subr.bf16.mxu0 %v11149_v2 }
 0x465   : > { %8329 = vmatpush3.bf16.msra.mxu1 %v8778_v12  ;;  %v8808_v12 = vld [vmem:[%s11140_s5 + $0x5b8] sm:$0xff]  }
 0x466   : > { %8330 = vmatprep.subr.bf16.mxu1 %v11149_v2 }
 0x467   : > { %8429 = vmatpush3.bf16.msra.mxu0 %v8779_v5  ;;  %v5470_v5 = vpack.c.bf16 %v5469_v50, %v5469_v50 }
 0x468   : > { %8430 = vmatprep.subr.bf16.mxu0 %v11149_v2 }
 0x469   : > { %8331 = vmatpush3.bf16.msra.mxu1 %v8780_v49 }
 0x46a   : > { %8332 = vmatprep.subr.bf16.mxu1 %v11149_v2 }
 0x46b   : > { %8431 = vmatpush3.bf16.msra.mxu0 %v8781_v7 }
 0x46c   : > { %8432 = vmatprep.subr.bf16.mxu0 %v11149_v2 }
 0x46d   : > { %8333 = vmatpush3.bf16.msra.mxu1 %v8782_v60 }
 0x46e   : > { %8358 = vmatprep.subr.bf16.mxu1 %v11149_v2 }
 0x46f   : > { %8433 = vmatpush3.bf16.msra.mxu0 %v8783_v19 }
 0x470   : > { %v3747_v25 = vpop.f32.mrf.mxu1  ;;  %8335 = vmatmul.mubr.bf16.vlgmr.msra.gmra.mxu1 %v5020_v41  ;;  %8458 = vmatprep.subr.bf16.mxu0 %v11149_v2 }
 0x471   : > { %v3753_v28 = vadd.f32 %v3747_v25, %v3640_v34  ;;  %8359 = vmatpush3.bf16.msra.mxu1 %v8784_v44  ;;  %8374 = vmatprep.mubr.msk.bf16.mxu1 %vm8893_vm2, %v11149_v2  ;;  %v8810_v44 = vld [vmem:[%s11140_s5 + $0x5a8] sm:$0xff]  }
 0x472   : > { %v8096_v3 = vpop.f32.mrf.mxu1  ;;  %v10922_v10 = vpop.f32.mrf.mxu0  ;;  %8435 = vmatmul.mubr.bf16.vlgmr.msra.gmra.mxu0 %v5598_v61  ;;  %8360 = vmatprep.subr.bf16.mxu1 %v11149_v2  ;;  %v8811_v61 = vld [vmem:[%s11140_s5 + $0x5a0] sm:$0xff]  }
 0x473   : > { %8459 = vmatpush3.bf16.msra.mxu0 %v8785_v42  ;;  %v3881_v62 = vadd.f32 %v10767_v48, %v3753_v28  ;;  %8474 = vmatprep.mubr.msk.bf16.mxu0 %vm8893_vm2, %v11149_v2  ;;  %v8789_v48 = vld [vmem:[%s11140_s5 + $0x5e8] sm:$0xff]   ;;  %v8812_v28 = vld [vmem:[%s11140_s5 + $0x598] sm:$0xff]  }
 0x474   : > { %v3750_v54 = vpop.f32.mrf.mxu1  ;;  %v8196_v39 = vpop.f32.mrf.mxu0  ;;  %8460 = vmatprep.subr.bf16.mxu0 %v11149_v2  ;;  %v8814_v3 = vld [vmem:[%s11140_s5 + $0x588] sm:$0xff]  }
 0x475   : > { %8361 = vmatpush3.bf16.msra.mxu1 %v8786_v56  ;;  %v8813_v56 = vld [vmem:[%s11140_s5 + $0x590] sm:$0xff]  }
 0x476   : > { %v8097_v38 = vpop.f32.mrf.mxu1  ;;  %v4319_v45 = vpop.f32.mrf.mxu0  ;;  %8362 = vmatprep.subr.bf16.mxu1 %v11149_v2 }
 0x477   : > { %8461 = vmatpush3.bf16.msra.mxu0 %v8787_v63  ;;  %v8816_v63 = vld [vmem:[%s11140_s5 + $0x638] sm:$0xff]  }
 0x478   : > { %v8197_v52 = vpop.f32.mrf.mxu0  ;;  %8462 = vmatprep.subr.bf16.mxu0 %v11149_v2 }
 0x479   : > { %8363 = vmatpush3.bf16.msra.mxu1 %v8788_v23  ;;  %v8817_v23 = vld [vmem:[%s11140_s5 + $0x630] sm:$0xff]  }
 0x47a   : > { %8364 = vmatprep.subr.bf16.mxu1 %v11149_v2 }
 0x47b   : > { %8463 = vmatpush3.bf16.msra.mxu0 %v8789_v48 }
 0x47c   : > { %8464 = vmatprep.subr.bf16.mxu0 %v11149_v2 }
 0x47d   : > { %8365 = vmatpush3.bf16.msra.mxu1 %v8790_v18  ;;  %v8818_v18 = vld [vmem:[%s11140_s5 + $0x628] sm:$0xff]  }
 0x47e   : > { %8366 = vmatprep.subr.bf16.mxu1 %v11149_v2 }
 0x47f   : > { %8465 = vmatpush3.bf16.msra.mxu0 %v8791_v58 }
 0x480   : > { %8466 = vmatprep.subr.bf16.mxu0 %v11149_v2 }
 0x481   : > { %8367 = vmatpush3.bf16.msra.mxu1 %v8792_v57 }
 0x482   : > { %8368 = vmatprep.subr.bf16.mxu1 %v11149_v2 }
 0x483   : > { %8467 = vmatpush3.bf16.msra.mxu0 %v8793_v17 }
 0x484   : > { %8468 = vmatprep.subr.bf16.mxu0 %v11149_v2 }
 0x485   : > { %8369 = vmatpush3.bf16.msra.mxu1 %v8794_v24  ;;  %v8819_v24 = vld [vmem:[%s11140_s5 + $0x620] sm:$0xff]  }
 0x486   : > { %8370 = vmatprep.subr.bf16.mxu1 %v11149_v2 }
 0x487   : > { %8469 = vmatpush3.bf16.msra.mxu0 %v8795_v46  ;;  %v8820_v46 = vld [vmem:[%s11140_s5 + $0x618] sm:$0xff]  }
 0x488   : > { %8470 = vmatprep.subr.bf16.mxu0 %v11149_v2 }
 0x489   : > { %8371 = vmatpush3.bf16.msra.mxu1 %v8796_v27  ;;  %v5906_v27 = vrot.slane %v10327_v30, 1 }
 0x48a   : > { %8372 = vmatprep.subr.bf16.mxu1 %v11149_v2 }
 0x48b   : > { %8471 = vmatpush3.bf16.msra.mxu0 %v8797_v4  ;;  %v8821_v4 = vld [vmem:[%s11140_s5 + $0x610] sm:$0xff]  }
 0x48c   : > { %8472 = vmatprep.subr.bf16.mxu0 %v11149_v2 }
 0x48d   : > { %8373 = vmatpush3.bf16.msra.mxu1 %v8798_v32  ;;  %v5908_v32 = vmax.f32 %v10327_v30, %v5906_v27 }
 0x48e   : > { %8398 = vmatprep.subr.bf16.mxu1 %v11149_v2 }
 0x48f   : > { %8473 = vmatpush3.bf16.msra.mxu0 %v8799_v31  ;;  %v8822_v31 = vld [vmem:[%s11140_s5 + $0x608] sm:$0xff]  }
 0x490   : > { %v3983_v15 = vpop.f32.mrf.mxu1  ;;  %8375 = vmatmul.mubr.bf16.vlgmr.msra.gmra.mxu1 %v5256_v51  ;;  %v8823_v51 = vld [vmem:[%s11140_s5 + $0x600] sm:$0xff]  }
 0x491   : > { %v3989_v53 = vadd.f32 %v3983_v15, %v3881_v62  ;;  %8399 = vmatpush3.bf16.msra.mxu1 %v8800_v6  ;;  %8414 = vmatprep.mubr.msk.bf16.mxu1 %vm8893_vm2, %v11149_v2  ;;  %v5706_v62 = vrot.slane %v10905_v0, 2  ;;  %v5909_v6 = vadd.f32 %v10888_v35, %v5908_v32 }
 0x492   : > { %v8136_v20 = vpop.f32.mrf.mxu1  ;;  %v10991_v22 = vpop.f32.mrf.mxu0  ;;  %8475 = vmatmul.mubr.bf16.vlgmr.msra.gmra.mxu0 %v5814_v36  ;;  %8400 = vmatprep.subr.bf16.mxu1 %v11149_v2 }
 0x493   : > { %v4097_v16 = vadd.f32 %v10840_v47, %v3989_v53  ;;  %v8804_v47 = vld [vmem:[%s11140_s5 + $0x518] sm:$0xff]   ;;  %v5910_v15 = vmax.f32 %v5909_v6, 0.0 }
 0x494   : > { %v3986_v34 = vpop.f32.mrf.mxu1  ;;  %v8236_v9 = vpop.f32.mrf.mxu0 }
 0x495   : > { %8401 = vmatpush3.bf16.msra.mxu1 %v8801_v55  ;;  %v5911_v30 = vpack.c.bf16 %v5910_v15, %v5910_v15 }
 0x496   : > { %v8137_v37 = vpop.f32.mrf.mxu1  ;;  %v4552_v14 = vpop.f32.mrf.mxu0  ;;  %8402 = vmatprep.subr.bf16.mxu1 %v11149_v2 }
 0x498   : > { %v8237_v43 = vpop.f32.mrf.mxu0 }
 0x499   : > { %8403 = vmatpush3.bf16.msra.mxu1 %v8802_v8 }
 0x49a   : > { %8404 = vmatprep.subr.bf16.mxu1 %v11149_v2 }
 0x49d   : > { %8405 = vmatpush3.bf16.msra.mxu1 %v8803_v40 }
 0x49e   : > { %8406 = vmatprep.subr.bf16.mxu1 %v11149_v2 }
 0x4a1   : > { %8407 = vmatpush3.bf16.msra.mxu1 %v8804_v47 }
 0x4a2   : > { %8408 = vmatprep.subr.bf16.mxu1 %v11149_v2 }
 0x4a5   : > { %8409 = vmatpush3.bf16.msra.mxu1 %v8805_v11 }
 0x4a6   : > { %8410 = vmatprep.subr.bf16.mxu1 %v11149_v2 }
 0x4a9   : > { %8411 = vmatpush3.bf16.msra.mxu1 %v8806_v26 }
 0x4aa   : > { %8412 = vmatprep.subr.bf16.mxu1 %v11149_v2 }
 0x4ad   : > { %8413 = vmatpush3.bf16.msra.mxu1 %v8807_v1 }
 0x4ae   : > { %8438 = vmatprep.subr.bf16.mxu1 %v11149_v2 }
 0x4b0   : > { %v4204_v49 = vpop.f32.mrf.mxu1  ;;  %8415 = vmatmul.mubr.bf16.vlgmr.msra.gmra.mxu1 %v5470_v5 }
 0x4b1   : > { %v4210_v33 = vadd.f32 %v4204_v49, %v4097_v16  ;;  %8439 = vmatpush3.bf16.msra.mxu1 %v8808_v12  ;;  %8454 = vmatprep.mubr.msk.bf16.mxu1 %vm8893_vm2, %v11149_v2 }
 0x4b2   : > { %v8176_v7 = vpop.f32.mrf.mxu1  ;;  %v11030_v13 = vpop.f32.mrf.mxu0  ;;  %8440 = vmatprep.subr.bf16.mxu1 %v11149_v2 }
 0x4b3   : > { %v4322_v60 = vadd.f32 %v10922_v10, %v4210_v33  ;;  %v8815_v10 = vld [vmem:[%s11140_s5 + $0x580] sm:$0xff]  }
 0x4b4   : > { %v4207_v59 = vpop.f32.mrf.mxu1  ;;  %v8276_v19 = vpop.f32.mrf.mxu0 }
 0x4b5   : > { %8441 = vmatpush3.bf16.msra.mxu1 %v8809_v21 }
 0x4b6   : > { %v8177_v41 = vpop.f32.mrf.mxu1  ;;  %v4777_v42 = vpop.f32.mrf.mxu0  ;;  %8442 = vmatprep.subr.bf16.mxu1 %v11149_v2 }
 0x4b8   : > { %v8277_v25 = vpop.f32.mrf.mxu0 }
 0x4b9   : > { %8443 = vmatpush3.bf16.msra.mxu1 %v8810_v44 }
 0x4ba   : > { %8444 = vmatprep.subr.bf16.mxu1 %v11149_v2 }
 0x4bd   : > { %8445 = vmatpush3.bf16.msra.mxu1 %v8811_v61 }
 0x4be   : > { %8446 = vmatprep.subr.bf16.mxu1 %v11149_v2 }
 0x4c1   : > { %8447 = vmatpush3.bf16.msra.mxu1 %v8812_v28 }
 0x4c2   : > { %8448 = vmatprep.subr.bf16.mxu1 %v11149_v2 }
 0x4c5   : > { %8449 = vmatpush3.bf16.msra.mxu1 %v8813_v56 }
 0x4c6   : > { %8450 = vmatprep.subr.bf16.mxu1 %v11149_v2 }
 0x4c9   : > { %8451 = vmatpush3.bf16.msra.mxu1 %v8814_v3 }
 0x4ca   : > { %8452 = vmatprep.subr.bf16.mxu1 %v11149_v2 }
 0x4cd   : > { %8453 = vmatpush3.bf16.msra.mxu1 %v8815_v10 }
 0x4ce   : > { %8478 = vmatprep.subr.bf16.mxu1 %v11149_v2 }
 0x4d0   : > { %v4441_v54 = vpop.f32.mrf.mxu1  ;;  %8455 = vmatmul.mubr.bf16.vlgmr.msra.gmra.mxu1 %v5706_v62 }
 0x4d1   : > { %v4447_v39 = vadd.f32 %v4441_v54, %v4322_v60  ;;  %8479 = vmatpush3.bf16.msra.mxu1 %v8816_v63  ;;  %8494 = vmatprep.mubr.msk.bf16.mxu1 %vm8893_vm2, %v11149_v2 }
 0x4d2   : > { %v8216_v38 = vpop.f32.mrf.mxu1  ;;  %v5007_v45 = vpop.f32.mrf.mxu0  ;;  %8480 = vmatprep.subr.bf16.mxu1 %v11149_v2 }
 0x4d3   : > { %v4555_v48 = vadd.f32 %v10991_v22, %v4447_v39 }
 0x4d4   : > { %v4444_v0 = vpop.f32.mrf.mxu1  ;;  %v8316_v52 = vpop.f32.mrf.mxu0 }
 0x4d5   : > { %8481 = vmatpush3.bf16.msra.mxu1 %v8817_v23 }
 0x4d6   : > { %v8217_v58 = vpop.f32.mrf.mxu1  ;;  %v5010_v57 = vpop.f32.mrf.mxu0  ;;  %8482 = vmatprep.subr.bf16.mxu1 %v11149_v2 }
 0x4d8   : > { %v8317_v17 = vpop.f32.mrf.mxu0 }
 0x4d9   : > { %8483 = vmatpush3.bf16.msra.mxu1 %v8818_v18 }
 0x4da   : > { %8484 = vmatprep.subr.bf16.mxu1 %v11149_v2 }
 0x4dd   : > { %8485 = vmatpush3.bf16.msra.mxu1 %v8819_v24 }
 0x4de   : > { %8486 = vmatprep.subr.bf16.mxu1 %v11149_v2 }
 0x4e1   : > { %8487 = vmatpush3.bf16.msra.mxu1 %v8820_v46 }
 0x4e2   : > { %8488 = vmatprep.subr.bf16.mxu1 %v11149_v2 }
 0x4e5   : > { %8489 = vmatpush3.bf16.msra.mxu1 %v8821_v4 }
 0x4e6   : > { %8490 = vmatprep.subr.bf16.mxu1 %v11149_v2 }
 0x4e9   : > { %8491 = vmatpush3.bf16.msra.mxu1 %v8822_v31 }
 0x4ea   : > { %8492 = vmatprep.subr.bf16.mxu1 %v11149_v2 }
 0x4ed   : > { %8493 = vmatpush3.bf16.msra.mxu1 %v8823_v51 }
 0x4f0   : > { %v4662_v36 = vpop.f32.mrf.mxu1  ;;  %8495 = vmatmul.mubr.bf16.vlgmr.msra.gmra.mxu1 %v5911_v30 }
 0x4f1   : > { %v4668_v53 = vadd.f32 %v4662_v36, %v4555_v48 }
 0x4f2   : > { %v8256_v55 = vpop.f32.mrf.mxu1  ;;  %v5232_v20 = vpop.f32.mrf.mxu0 }
 0x4f3   : > { %v4780_v22 = vadd.f32 %v11030_v13, %v4668_v53 }
 0x4f4   : > { %v4665_v35 = vpop.f32.mrf.mxu1  ;;  %v8356_v16 = vpop.f32.mrf.mxu0 }
 0x4f6   : > { %v8257_v34 = vpop.f32.mrf.mxu1  ;;  %v5235_v9 = vpop.f32.mrf.mxu0 }
 0x4f8   : > { %v8357_v8 = vpop.f32.mrf.mxu0 }
 0x510   : > { %v4882_v37 = vpop.f32.mrf.mxu1 }
 0x511   : > { %v4888_v14 = vadd.f32 %v4882_v37, %v4780_v22 }
 0x512   : > { %v8296_v43 = vpop.f32.mrf.mxu1  ;;  %v5448_v40 = vpop.f32.mrf.mxu0 }
 0x513   : > { %v5013_v47 = vadd.f32 %v5007_v45, %v4888_v14 }
 0x514   : > { %v4885_v2 = vpop.f32.mrf.mxu1  ;;  %v8396_v11 = vpop.f32.mrf.mxu0 }
 0x516   : > { %v8297_v26 = vpop.f32.mrf.mxu1  ;;  %v5451_v29 = vpop.f32.mrf.mxu0 }
 0x518   : > { %v8397_v1 = vpop.f32.mrf.mxu0 }
 0x530   : > { %v5120_v50 = vpop.f32.mrf.mxu1 }
 0x531   : > { %v5126_v12 = vadd.f32 %v5120_v50, %v5013_v47 }
 0x532   : > { %v8336_v5 = vpop.f32.mrf.mxu1  ;;  %v5682_v49 = vpop.f32.mrf.mxu0 }
 0x533   : > { %v5238_v33 = vadd.f32 %v5232_v20, %v5126_v12 }
 0x534   : > { %v5123_v21 = vpop.f32.mrf.mxu1  ;;  %v8436_v7 = vpop.f32.mrf.mxu0 }
 0x536   : > { %v8337_v13 = vpop.f32.mrf.mxu1  ;;  %v5685_v60 = vpop.f32.mrf.mxu0 }
 0x538   : > { %v8437_v59 = vpop.f32.mrf.mxu0 }
 0x550   : > { %v5340_v19 = vpop.f32.mrf.mxu1 }
 0x551   : > { %v5346_v44 = vadd.f32 %v5340_v19, %v5238_v33 }
 0x552   : > { %v8376_v41 = vpop.f32.mrf.mxu1  ;;  %v5898_v42 = vpop.f32.mrf.mxu0 }
 0x553   : > { %v5454_v25 = vadd.f32 %v5448_v40, %v5346_v44 }
 0x554   : > { %v5343_v61 = vpop.f32.mrf.mxu1  ;;  %v8476_v28 = vpop.f32.mrf.mxu0 }
 0x556   : > { %v8377_v56 = vpop.f32.mrf.mxu1  ;;  %v5901_v3 = vpop.f32.mrf.mxu0 }
 0x558   : > { %v8477_v10 = vpop.f32.mrf.mxu0 }
 0x570   : > { %v5570_v63 = vpop.f32.mrf.mxu1 }
 0x571   : > { %v5576_v62 = vadd.f32 %v5570_v63, %v5454_v25 }
 0x572   : > { %v8416_v54 = vpop.f32.mrf.mxu1 }
 0x573   : > { %v5688_v39 = vadd.f32 %v5682_v49, %v5576_v62 }
 0x574   : > { %v5573_v23 = vpop.f32.mrf.mxu1 }
 0x576   : > { %v8417_v38 = vpop.f32.mrf.mxu1 }
 0x590   : > { %v5790_v45 = vpop.f32.mrf.mxu1 }
 0x591   : > { %v5796_v48 = vadd.f32 %v5790_v45, %v5688_v39 }
 0x592   : > { %v8456_v0 = vpop.f32.mrf.mxu1 }
 0x593   : > { %v5904_v52 = vadd.f32 %v5898_v42, %v5796_v48 }
 0x594   : > { %v5793_v18 = vpop.f32.mrf.mxu1 }
 0x596   : > { %v8457_v58 = vpop.f32.mrf.mxu1 }
 0x5b0   : > { %v6011_v57 = vpop.f32.mrf.mxu1 }
 0x5b1   : > { %v6017_v17 = vadd.f32 %v6011_v57, %v5904_v52 }
 0x5b2   : > { %v8496_v24 = vpop.f32.mrf.mxu1 }
 0x5b3   : > { %v6019_v46 = vsel %vm6018_vm8, %v6017_v17, -inf }
 0x5b4   : > { %v6014_v27 = vpop.f32.mrf.mxu1  ;;  %6020 = vmax.xlane.f32.xlu0 %v6019_v46 }
 0x5b6   : > { %v8497_v4 = vpop.f32.mrf.mxu1 }
 0x63d   : > { %v6021_v32 = vpop.xlane.xlu0 %6020 }
 0x63e   : > { %v6022_v31 = vsub.f32 %v6017_v17, %v6021_v32 }
 0x640   : > { %v6023_v6 = vmul.f32 1.442695, %v6022_v31 }
 0x642   : > { %8824 = vpow2.f32 %v6023_v6 }
 0x64f   : > { %v8825_v51 = vpop.eup %8824 }
 0x650   : > { %v6025_v15 = vsel %vm6018_vm8, %v8825_v51, 0.0 }
 0x651   : > { %6026 = vadd.xlane.f32.xlu0 %v6025_v15 }
 0x6da   : > { %v6027_v30 = vpop.xlane.xlu0 %6026 }
 0x6db   : > { %8826 = vrcp.f32 %v6027_v30 }
 0x6e8   : > { %v8827_v36 = vpop.eup %8826 }
 0x6e9   : > { %v6029_v53 = vmul.f32 %v8827_v36, %v8825_v51 }
 0x6eb   : > { %6030 = vst.msk [vmem:[%s270_s9] sm:$0x1] %vm6018_vm8, %v6029_v53 }
 0x6ec   : > { %8842 = shalt.err (!%p8839_p3)
}
 0x6ed   : > { %s8843_s21 = scalar_lea.hbm %s6042_s16, 16  ;;  %s8847_s29 = scalar_lea.hbm %s11142_s7, 32 }
 0x6ee   : > { %p8844_p4 = scmp.ne.s32.totalorder %s6042_s16, %s8843_s21  ;;  %p8848_p9 = scmp.lt.s32.totalorder %s6042_s16, %s11142_s7 }
 0x6ef   : > { %p8849_p10 = scmp.lt.s32.totalorder %s8847_s29, %s8843_s21 }
 0x6f0   : > { %p8845_p7 = pnand %p8844_p4, %p8973_p5 }
 0x6f1   : > { %p8850_p11 = por %p8849_p10, %p8848_p9 }
 0x6f2   : > { %p8846_p8 = pneg %p8845_p7 }
 0x6f4   : > { %p8851_p12 = pnand %p8850_p11, %p8846_p8 }
 0x6f6   : > { %8854 = shalt.err (!%p8851_p12)
}
 0x6f7   : > { %8501 = dma.vmem_to_hbm [thread:$0]  (%p8973_p5), %s6045_s13, 16, %s6042_s16, %s6032_s17  }
 0x6f8 PF: > { %p8507_p13 = scmp.ge.s32.totalorder %s8889_s27, 2  ;;  %s6056_s14 = sand.u32 1, %s8877_s24  }
 0x6f9   : > { %s6057_s15 = scalar_lea.sflag [#allocation4], %s6056_s14 }
 0x6fa   : > { %p8504_p0 = pnand %p8507_p13, %p8977_p6 }
 0x6fc   : > { %p8505_p1 = pneg %p8504_p0 }
 0x6fe   : > { %8872 = dma.done.wait (%p8505_p1), %s6057_s15, 16  }
 0x6ff   : > { %8874 = vsyncadd (%p8505_p1), %s6057_s15, 4294967280  ;;  %p17_p2 = scmp.ge.s32.totalorder %s8960_s30, 4   ;;  %s11166_s24 = smov %s8881_s25 }
 0x700   : > { %s11167_s25 = smov %s8885_s26  ;;  %s11168_s26 = smov %s8971_s10 }
 0x701   : > { %s11169_s27 = smov %s8960_s30  ;;  %19 = sbr.rel (!%p17_p2) target bundleno = 3 (0x3), region = 118 }
 0x706   :  { %6061 = vsyncpa [#allocation4], 1 }
 0x707   :  { %6063 = vsyncpa [#allocation4 + $0x1], 1 }

</bundles_post_ra>
